<compile_context>
chip_gen: v6e
topology: v6e:2x2x1
jax: 0.10.0
libtpu: 0.0.40
codegen_flags: <defaults>
</compile_context>

<pallas_src>
import functools
import numpy as np
import jax
import jax.numpy as jnp
from jax.experimental import pallas as pl
from jax.experimental.pallas import tpu as pltpu

# ----------------------- hyper-parameters (small, synthetic) -----------------
EMBEDDING_SIZE = 16
POS_EMBEDDING_SIZE = 16
LSTM_HIDDEN_SIZE = 32
NUM_LAYERS = 2
ARC_MLP_UNITS = 32
LABEL_MLP_UNITS = 16


# ============================ BiLSTM (single kernel) =========================
def _bilstm_kernel(*refs, T, B, H, num_layers, out_perm):
    """Full multi-layer BiLSTM. refs = [x, mask, (w_ih, b, whh, h0, c0)*L, y]."""
    x_ref, m_ref = refs[0], refs[1]
    y_ref = refs[2 + 5 * num_layers]
    H4 = 4 * H

    m_all = m_ref[...]                                    # (T*B, 1) validity mask
    layer_in = x_ref[...]                                 # (T*B, I)
    rows_t = None
    for l in range(num_layers):
        w_ih = refs[2 + 5 * l][...]                       # (I, 8H)  [fwd 4H | bwd 4H]
        bias = refs[3 + 5 * l][...]                       # (1, 8H)
        whh = refs[4 + 5 * l][...]                        # (2H, 8H) block-diagonal
        h0 = refs[5 + 5 * l][...]                         # (1, 2H)
        c0 = refs[6 + 5 * l][...]                         # (1, 2H)

        # Input projection for BOTH directions at once (hoisted out of recurrence).
        gx = jnp.dot(layer_in, w_ih, preferred_element_type=jnp.float32) + bias  # (T*B, 8H)

        h_f = jnp.broadcast_to(h0[:, :H], (B, H))
        h_b = jnp.broadcast_to(h0[:, H:], (B, H))
        c_f = jnp.broadcast_to(c0[:, :H], (B, H))
        c_b = jnp.broadcast_to(c0[:, H:], (B, H))

        ys_f = [None] * T
        ys_b = [None] * T
        # TODO(synk): switch to lax.fori_loop(unroll=2-4) if T grows beyond toy sizes.
        for s in range(T):                                # static unroll
            tf, tb = s, T - 1 - s                         # fwd time / bwd time (flip folded in)
            h_cat = jnp.concatenate([h_f, h_b], axis=-1)  # (B, 2H)
            ghh = jnp.dot(h_cat, whh, preferred_element_type=jnp.float32)  # (B, 8H)
            gf = gx[tf * B:(tf + 1) * B, 0:H4] + ghh[:, 0:H4]              # (B, 4H)
            gb = gx[tb * B:(tb + 1) * B, H4:2 * H4] + ghh[:, H4:2 * H4]    # (B, 4H)
            # full-width sigmoid per direction (redundant on g lanes; EUP has slack)
            sf = jax.nn.sigmoid(gf)
            sb = jax.nn.sigmoid(gb)
            tg_f = jnp.tanh(gf[:, 2 * H:3 * H])
            tg_b = jnp.tanh(gb[:, 2 * H:3 * H])
            # PyTorch gate order per direction: i, f, g, o
            cf_new = sf[:, H:2 * H] * c_f + sf[:, 0:H] * tg_f
            cb_new = sb[:, H:2 * H] * c_b + sb[:, 0:H] * tg_b
            hf_new = sf[:, 3 * H:4 * H] * jnp.tanh(cf_new)
            hb_new = sb[:, 3 * H:4 * H] * jnp.tanh(cb_new)
            mf = m_all[tf * B:(tf + 1) * B, :]            # (B, 1)
            mb = m_all[tb * B:(tb + 1) * B, :]
            yf = mf * hf_new                              # pad_packed zero-fills outputs
            yb = mb * hb_new
            h_f = yf + (1.0 - mf) * h_f                   # packed-seq: freeze state past length
            c_f = mf * cf_new + (1.0 - mf) * c_f
            h_b = yb + (1.0 - mb) * h_b
            c_b = mb * cb_new + (1.0 - mb) * c_b
            ys_f[tf] = yf
            ys_b[tb] = yb

        rows_t = [jnp.concatenate([ys_f[t], ys_b[t]], axis=-1) for t in range(T)]  # (B, 2H)
        if l < num_layers - 1:
            layer_in = jnp.concatenate(rows_t, axis=0)    # (T*B, 2H) time-major (sorted)

    # Write last layer's output batch-major in ORIGINAL (un-sorted) batch order.
    for b_orig, p in enumerate(out_perm):                 # p = sorted position of b_orig
        block = jnp.concatenate([rows_t[t][p:p + 1, :] for t in range(T)], axis=0)  # (T, 2H)
        y_ref[b_orig] = block


def bilstm_fused(x_tm, mask, lstm_prep, out_perm, *, T, B, H):
    num_layers = len(lstm_prep)
    args = [x_tm, mask]
    for lp in lstm_prep:
        args.extend([lp['w_ih'], lp['b'], lp['whh'], lp['h0'], lp['c0']])
    kernel = functools.partial(
        _bilstm_kernel, T=T, B=B, H=H, num_layers=num_layers,
        out_perm=tuple(int(p) for p in out_perm))
    # Single kernel instance, everything resident in VMEM (KB-scale buffers).
    return pl.pallas_call(
        kernel,
        out_shape=jax.ShapeDtypeStruct((B, T, 2 * H), jnp.float32),
    )(*args)


# ============================ Fused head (single kernel) =====================
def _head_kernel(*refs, T, UA, UL, C, training, slab):
    if training:
        x_ref, wm_ref, bm_ref, wblk_ref, arcs_ref, o_ref = refs
    else:
        x_ref, wm_ref, bm_ref, wblk_ref, o_ref = refs
        arcs_ref = None
    L1 = UL + 1

    x = x_ref[0]                                              # (T, 2H)
    # ---- fused 4-way MLP + LeakyReLU ----
    mlp = jnp.dot(x, wm_ref[...], preferred_element_type=jnp.float32) + bm_ref[...]
    mlp = jnp.where(mlp >= 0.0, mlp, 0.01 * mlp)              # LeakyReLU(0.01)
    h_arc_dep = mlp[:, 0:UA]
    h_arc_head = mlp[:, UA:2 * UA]
    h_lab_dep = mlp[:, 2 * UA:2 * UA + UL]
    h_lab_head = mlp[:, 2 * UA + UL:2 * UA + 2 * UL]

    ones = jnp.ones((T, 1), jnp.float32)
    # ---- one block matmul feeds both biaffines (arc bias folded via the 1-row) ----
    comb = jnp.concatenate([h_arc_dep, h_lab_dep, ones], axis=-1)        # (T, UA+UL+1)
    big = jnp.dot(comb, wblk_ref[...], preferred_element_type=jnp.float32)  # (T, UA + C*L1)
    lin_a = big[:, :UA]                                       # [h_arc_dep,1] @ W_arc
    r2 = big[:, UA:]                                          # [h_lab_dep,1] @ W_label_flat

    # ---- arc biaffine: s_arc[t, j] = lin_a[t] . h_arc_head[j] ----
    s_arc = jax.lax.dot_general(lin_a, h_arc_head, (((1,), (1,)), ((), ())),
                                preferred_element_type=jnp.float32)      # (T, T)

    # ---- predicted heads -> one-hot (argmax in eval, gold in training) ----
    iota_i = jax.lax.broadcasted_iota(jnp.int32, (T, T), 1)
    if training:
        onehot = (iota_i == arcs_ref[0]).astype(jnp.float32)             # (T, T)
    else:
        iota_f = iota_i.astype(jnp.float32)
        mx = jnp.max(s_arc, axis=-1, keepdims=True)
        cand = jnp.where(s_arc == mx, iota_f, float(T))
        pred = jnp.min(cand, axis=-1, keepdims=True)                     # first argmax
        onehot = (iota_f == pred).astype(jnp.float32)

    # ---- label biaffine, gathered at the predicted head (full CxTxT never built) ----
    y_sel = jnp.dot(onehot, h_lab_head, preferred_element_type=jnp.float32)  # (T, UL)
    ys1 = jnp.concatenate([y_sel, ones], axis=-1)                        # (T, L1)
    sel_cols = [jnp.sum(r2[:, c * L1:(c + 1) * L1] * ys1, axis=1, keepdims=True)
                for c in range(C)]
    sel = jnp.concatenate(sel_cols, axis=-1)                             # (T, C)

    # ---- single lane-dense 128-wide store: [arc scores | selected labels | pad] ----
    pad = jnp.zeros((T, slab - T - C), jnp.float32)
    o_ref[0] = jnp.concatenate([s_arc, sel, pad], axis=-1)


def fused_head(x_lstm, w_mlp, b_mlp, w_block, *, B, T, C, UA, UL, training, arcs=None):
    H2 = x_lstm.shape[-1]
    slab = int(pl.cdiv(T + C, 128) * 128)
    kernel = functools.partial(_head_kernel, T=T, UA=UA, UL=UL, C=C,
                               training=training, slab=slab)
    in_specs = [
        pl.BlockSpec((1, T, H2), lambda b: (b, 0, 0)),
        pl.BlockSpec((H2, w_mlp.shape[1]), lambda b: (0, 0)),
        pl.BlockSpec((1, b_mlp.shape[1]), lambda b: (0, 0)),
        pl.BlockSpec(w_block.shape, lambda b: (0, 0)),
    ]
    args = [x_lstm, w_mlp, b_mlp, w_block]
    if training:
        in_specs.append(pl.BlockSpec((1, T, 1), lambda b: (b, 0, 0)))
        args.append(arcs)
    return pl.pallas_call(
        kernel,
        out_shape=jax.ShapeDtypeStruct((B, T, slab), jnp.float32),
        grid=(B,),
        in_specs=in_specs,
        out_specs=pl.BlockSpec((1, T, slab), lambda b: (b, 0, 0)),
        compiler_params=pltpu.CompilerParams(dimension_semantics=("parallel",)),
    )(*args)


# -------------------------------- parameters ---------------------------------
def init_params(key, pos_vocab_size, n_classes):
    keys = iter(jax.random.split(key, 64))

    def nrm(shape, scale=0.1):
        return (scale * jax.random.normal(next(keys), shape)).astype(jnp.float32)

    params = {}
    emb = nrm((pos_vocab_size, POS_EMBEDDING_SIZE))
    params['pos_embed'] = emb.at[0].set(0.0)          # padding_idx = pos_vocab['<PAD>'] = 0

    lstm = []
    in_size = EMBEDDING_SIZE + POS_EMBEDDING_SIZE
    for _ in range(NUM_LAYERS):
        layer = {}
        for tag in ('f', 'b'):
            layer[f'w_ih_{tag}'] = nrm((in_size, 4 * LSTM_HIDDEN_SIZE))       # W_ih^T
            layer[f'w_hh_{tag}'] = nrm((LSTM_HIDDEN_SIZE, 4 * LSTM_HIDDEN_SIZE))
            # NOTE: when loading real PyTorch weights, b must be b_ih + b_hh.
            layer[f'b_{tag}'] = nrm((1, 4 * LSTM_HIDDEN_SIZE))
        lstm.append(layer)
        in_size = 2 * LSTM_HIDDEN_SIZE
    params['lstm'] = lstm
    params['h0'] = nrm((NUM_LAYERS * 2, 1, LSTM_HIDDEN_SIZE))   # initial_trainable_hidden_states
    params['c0'] = nrm((NUM_LAYERS * 2, 1, LSTM_HIDDEN_SIZE))

    for name, units in (('arc_dep', ARC_MLP_UNITS), ('arc_head', ARC_MLP_UNITS),
                        ('label_dep', LABEL_MLP_UNITS), ('label_head', LABEL_MLP_UNITS)):
        params[f'{name}_w'] = nrm((2 * LSTM_HIDDEN_SIZE, units))              # W^T
        params[f'{name}_b'] = nrm((1, units))

    params['W_arc'] = nrm((ARC_MLP_UNITS + 1, 1, ARC_MLP_UNITS))
    params['W_label'] = nrm((LABEL_MLP_UNITS + 1, n_classes, LABEL_MLP_UNITS + 1))
    return params


def prepare_params(params):
    """One-time parameter preprocessing (hoisted out of the forward path)."""
    H = LSTM_HIDDEN_SIZE
    UA, UL = ARC_MLP_UNITS, LABEL_MLP_UNITS
    L1 = UL + 1
    C = params['W_label'].shape[1]
    prep = {'pos_embed': params['pos_embed'], 'n_classes': C}

    lstm_prep = []
    for l, p in enumerate(params['lstm']):
        w_ih = jnp.concatenate([p['w_ih_f'], p['w_ih_b']], axis=1)            # (I, 8H)
        b = jnp.concatenate([p['b_f'], p['b_b']], axis=1)                     # (1, 8H)
        z = jnp.zeros((H, 4 * H), jnp.float32)
        whh = jnp.concatenate(
            [jnp.concatenate([p['w_hh_f'], z], axis=1),
             jnp.concatenate([z, p['w_hh_b']], axis=1)], axis=0)              # (2H, 8H)
        h0 = jnp.concatenate([params['h0'][2 * l], params['h0'][2 * l + 1]], axis=-1)
        c0 = jnp.concatenate([params['c0'][2 * l], params['c0'][2 * l + 1]], axis=-1)
        lstm_prep.append(dict(w_ih=w_ih, b=b, whh=whh, h0=h0, c0=c0))
    prep['lstm'] = lstm_prep

    prep['w_mlp'] = jnp.concatenate([params['arc_dep_w'], params['arc_head_w'],
                                     params['label_dep_w'], params['label_head_w']], axis=1)
    prep['b_mlp'] = jnp.concatenate([params['arc_dep_b'], params['arc_head_b'],
                                     params['label_dep_b'], params['label_head_b']], axis=1)

    W_arc = params['W_arc']          # (UA+1, 1, UA)
    W_label = params['W_label']      # (UL+1, C, UL+1)
    wb = jnp.zeros((UA + UL + 1, UA + C * L1), jnp.float32)
    wb = wb.at[:UA, :UA].set(W_arc[:UA, 0, :])
    wb = wb.at[UA:UA + UL, UA:].set(W_label[:UL].reshape(UL, C * L1))
    wb = wb.at[UA + UL, :UA].set(W_arc[UA, 0, :])                 # arc bias_x row
    wb = wb.at[UA + UL, UA:].set(W_label[UL].reshape(C * L1))     # label bias_x row
    prep['w_block'] = wb
    return prep


# --------------------------------- forward -----------------------------------
def biaffine_parser_forward(prep, embedded_sents, pos, gold_heads, data_lengths,
                            heads_pad_idx=0, training=False):
    B = embedded_sents.shape[0]
    H = LSTM_HIDDEN_SIZE
    lengths_all = np.asarray(data_lengths)
    sorted_indices = np.argsort(-lengths_all).astype(np.int64)
    lengths = lengths_all[sorted_indices]
    max_len = int(lengths[0])
    inv = np.argsort(sorted_indices).astype(np.int64)     # original batch -> sorted position

    embedded_sents = embedded_sents[:, :max_len]
    # TODO(synk): nn.Dropout2d / nn.Dropout are identity in eval mode; training dropout omitted.
    pos_t = pos[:, :max_len]
    embedded_pos = jnp.take(prep['pos_embed'], pos_t, axis=0)

    stacked_x = embedded_sents[sorted_indices]
    stacked_pos_x = embedded_pos[sorted_indices]
    # same unconditional doubling trick as the PyTorch reference forward()
    mask_words = (stacked_x - stacked_pos_x) == stacked_x
    mask_pos = (stacked_pos_x - stacked_x) == stacked_pos_x
    stacked_x = jnp.where(mask_words, stacked_x * 2.0, stacked_x)
    stacked_pos_x = jnp.where(mask_pos, stacked_pos_x * 2.0, stacked_pos_x)
    x_in = jnp.concatenate([stacked_x, stacked_pos_x], axis=2)        # (B, T, EMB+POS) sorted

    T = max_len
    x_tm = jnp.transpose(x_in, (1, 0, 2)).reshape(T * B, x_in.shape[-1])   # (T*B, I0) time-major
    valid = (np.arange(T)[:, None] < lengths[None, :]).astype(np.float32)  # (T, B) static
    mask = jnp.asarray(valid.reshape(T * B, 1))

    # Kernel 1: full BiLSTM (both layers + directions); output already un-sorted, (B, T, 2H).
    x_lstm = bilstm_fused(x_tm, mask, prep['lstm'], inv, T=T, B=B, H=H)

    C = prep['n_classes']
    arcs = None
    if training:
        gold = jnp.asarray(gold_heads)[:, :max_len].astype(jnp.int32)
        arcs = jnp.where(gold == heads_pad_idx, 0, gold)[:, :, None]   # (B, T, 1)

    # Kernel 2: fused MLPs + biaffines + argmax + label gather, lane-dense output slab.
    slab = fused_head(x_lstm, prep['w_mlp'], prep['b_mlp'], prep['w_block'],
                      B=B, T=T, C=C, UA=ARC_MLP_UNITS, UL=LABEL_MLP_UNITS,
                      training=training, arcs=arcs)                    # (B, T, 128)
    s_i_arc = slab[:, :, :T]
    selected_label_logits = slab[:, :, T:T + C]
    return s_i_arc, selected_label_logits, max_len, data_lengths


# ------------------------------------ main ------------------------------------
if __name__ == "__main__":
    key = jax.random.PRNGKey(0)
    B, T = 2, 8
    pos_vocab_size = 10          # pos_vocab with '<PAD>' = 0
    n_classes = 5                # len(rels_vocab)
    data_lengths = np.array([8, 5], dtype=np.int64)

    kp, ke, kpos, kh = jax.random.split(key, 4)
    params = init_params(kp, pos_vocab_size, n_classes)
    prep = prepare_params(params)

    embedded_sents = jax.random.normal(ke, (B, T, EMBEDDING_SIZE), dtype=jnp.float32)
    pos = jax.random.randint(kpos, (B, T), 1, pos_vocab_size, dtype=jnp.int32)
    gold_heads = jax.random.randint(kh, (B, T), 0, T, dtype=jnp.int32)

    # zero / PAD the padded tail positions, as a padded batch would be
    len_mask = jnp.arange(T)[None, :] < jnp.asarray(data_lengths)[:, None]
    embedded_sents = embedded_sents * len_mask[:, :, None].astype(jnp.float32)
    pos = jnp.where(len_mask, pos, 0)

    s_i_arc, selected_label_logits, max_len, dl = biaffine_parser_forward(
        prep, embedded_sents, pos, gold_heads, data_lengths, training=False)
    jax.block_until_ready((s_i_arc, selected_label_logits))
    assert s_i_arc.shape == (B, T, T)
    assert selected_label_logits.shape == (B, T, n_classes)
    print("KERNEL_OK")
</pallas_src>

<mosaic_0001>
module attributes {stable_mosaic.version = 11 : i64} {
  func.func @_bilstm_kernel(%arg0: memref<16x32xf32, #tpu.memory_space<vmem>>, %arg1: memref<16x1xf32, #tpu.memory_space<vmem>>, %arg2: memref<32x256xf32, #tpu.memory_space<vmem>>, %arg3: memref<1x256xf32, #tpu.memory_space<vmem>>, %arg4: memref<64x256xf32, #tpu.memory_space<vmem>>, %arg5: memref<1x64xf32, #tpu.memory_space<vmem>>, %arg6: memref<1x64xf32, #tpu.memory_space<vmem>>, %arg7: memref<64x256xf32, #tpu.memory_space<vmem>>, %arg8: memref<1x256xf32, #tpu.memory_space<vmem>>, %arg9: memref<64x256xf32, #tpu.memory_space<vmem>>, %arg10: memref<1x64xf32, #tpu.memory_space<vmem>>, %arg11: memref<1x64xf32, #tpu.memory_space<vmem>>, %arg12: memref<2x8x64xf32, #tpu.memory_space<vmem>>) attributes {dimension_semantics = [], scalar_prefetch = 0 : i64, scratch_operands = 0 : i64, tpu.core_type = #tpu.core_type<tc>} {
    %c0 = arith.constant 0 : index
    %c0_0 = arith.constant 0 : index
    %0 = vector.load %arg1[%c0, %c0_0] : memref<16x1xf32, #tpu.memory_space<vmem>>, vector<16x1xf32>
    %c0_1 = arith.constant 0 : index
    %c0_2 = arith.constant 0 : index
    %1 = vector.load %arg0[%c0_1, %c0_2] : memref<16x32xf32, #tpu.memory_space<vmem>>, vector<16x32xf32>
    %c0_3 = arith.constant 0 : index
    %c0_4 = arith.constant 0 : index
    %2 = vector.load %arg2[%c0_3, %c0_4] : memref<32x256xf32, #tpu.memory_space<vmem>>, vector<32x256xf32>
    %c0_5 = arith.constant 0 : index
    %c0_6 = arith.constant 0 : index
    %3 = vector.load %arg3[%c0_5, %c0_6] : memref<1x256xf32, #tpu.memory_space<vmem>>, vector<1x256xf32>
    %c0_7 = arith.constant 0 : index
    %c0_8 = arith.constant 0 : index
    %4 = vector.load %arg4[%c0_7, %c0_8] : memref<64x256xf32, #tpu.memory_space<vmem>>, vector<64x256xf32>
    %c0_9 = arith.constant 0 : index
    %c0_10 = arith.constant 0 : index
    %5 = vector.load %arg5[%c0_9, %c0_10] : memref<1x64xf32, #tpu.memory_space<vmem>>, vector<1x64xf32>
    %c0_11 = arith.constant 0 : index
    %c0_12 = arith.constant 0 : index
    %6 = vector.load %arg6[%c0_11, %c0_12] : memref<1x64xf32, #tpu.memory_space<vmem>>, vector<1x64xf32>
    %cst = arith.constant dense<0.000000e+00> : vector<16x256xf32>
    %7 = tpu.matmul %1, %2, %cst {dimension_numbers = #tpu.dot_dimension_numbers<[1], [0], [0], [1], [0, 0, 1, 1], [], []>} : vector<16x32xf32>, vector<32x256xf32>, vector<16x256xf32> -> vector<16x256xf32>
    %8 = vector.broadcast %3 : vector<1x256xf32> to vector<16x256xf32>
    %9 = arith.addf %7, %8 : vector<16x256xf32>
    %10 = vector.extract_strided_slice %5 {offsets = [0, 0], sizes = [1, 32], strides = [1, 1]} : vector<1x64xf32> to vector<1x32xf32>
    %11 = vector.shape_cast %10 : vector<1x32xf32> to vector<1x32xf32>
    %12 = vector.broadcast %11 : vector<1x32xf32> to vector<2x32xf32>
    %13 = vector.extract_strided_slice %5 {offsets = [0, 32], sizes = [1, 32], strides = [1, 1]} : vector<1x64xf32> to vector<1x32xf32>
    %14 = vector.shape_cast %13 : vector<1x32xf32> to vector<1x32xf32>
    %15 = vector.broadcast %14 : vector<1x32xf32> to vector<2x32xf32>
    %16 = vector.extract_strided_slice %6 {offsets = [0, 0], sizes = [1, 32], strides = [1, 1]} : vector<1x64xf32> to vector<1x32xf32>
    %17 = vector.shape_cast %16 : vector<1x32xf32> to vector<1x32xf32>
    %18 = vector.broadcast %17 : vector<1x32xf32> to vector<2x32xf32>
    %19 = vector.extract_strided_slice %6 {offsets = [0, 32], sizes = [1, 32], strides = [1, 1]} : vector<1x64xf32> to vector<1x32xf32>
    %20 = vector.shape_cast %19 : vector<1x32xf32> to vector<1x32xf32>
    %21 = vector.broadcast %20 : vector<1x32xf32> to vector<2x32xf32>
    %22 = tpu.concatenate %12, %15 in 1 : vector<2x32xf32>, vector<2x32xf32> -> vector<2x64xf32>
    %cst_13 = arith.constant dense<0.000000e+00> : vector<2x256xf32>
    %23 = tpu.matmul %22, %4, %cst_13 {dimension_numbers = #tpu.dot_dimension_numbers<[1], [0], [0], [1], [0, 0, 1, 1], [], []>} : vector<2x64xf32>, vector<64x256xf32>, vector<2x256xf32> -> vector<2x256xf32>
    %24 = vector.extract_strided_slice %9 {offsets = [0, 0], sizes = [2, 128], strides = [1, 1]} : vector<16x256xf32> to vector<2x128xf32>
    %25 = vector.extract_strided_slice %23 {offsets = [0, 0], sizes = [2, 128], strides = [1, 1]} : vector<2x256xf32> to vector<2x128xf32>
    %26 = arith.addf %24, %25 : vector<2x128xf32>
    %27 = vector.extract_strided_slice %9 {offsets = [14, 128], sizes = [2, 128], strides = [1, 1]} : vector<16x256xf32> to vector<2x128xf32>
    %28 = vector.extract_strided_slice %23 {offsets = [0, 128], sizes = [2, 128], strides = [1, 1]} : vector<2x256xf32> to vector<2x128xf32>
    %29 = arith.addf %27, %28 : vector<2x128xf32>
    %30 = arith.negf %26 : vector<2x128xf32>
    %31 = math.exp %30 : vector<2x128xf32>
    %cst_14 = arith.constant 1.000000e+00 : f32
    %32 = vector.broadcast %cst_14 : f32 to vector<2x128xf32>
    %33 = arith.addf %32, %31 : vector<2x128xf32>
    %34 = arith.divf %32, %33 : vector<2x128xf32>
    %35 = arith.negf %29 : vector<2x128xf32>
    %36 = math.exp %35 : vector<2x128xf32>
    %cst_15 = arith.constant 1.000000e+00 : f32
    %37 = vector.broadcast %cst_15 : f32 to vector<2x128xf32>
    %38 = arith.addf %37, %36 : vector<2x128xf32>
    %39 = arith.divf %37, %38 : vector<2x128xf32>
    %40 = vector.extract_strided_slice %26 {offsets = [0, 64], sizes = [2, 32], strides = [1, 1]} : vector<2x128xf32> to vector<2x32xf32>
    %41 = math.tanh %40 : vector<2x32xf32>
    %42 = vector.extract_strided_slice %29 {offsets = [0, 64], sizes = [2, 32], strides = [1, 1]} : vector<2x128xf32> to vector<2x32xf32>
    %43 = math.tanh %42 : vector<2x32xf32>
    %44 = vector.extract_strided_slice %34 {offsets = [0, 32], sizes = [2, 32], strides = [1, 1]} : vector<2x128xf32> to vector<2x32xf32>
    %45 = arith.mulf %44, %18 : vector<2x32xf32>
    %46 = vector.extract_strided_slice %34 {offsets = [0, 0], sizes = [2, 32], strides = [1, 1]} : vector<2x128xf32> to vector<2x32xf32>
    %47 = arith.mulf %46, %41 : vector<2x32xf32>
    %48 = arith.addf %45, %47 : vector<2x32xf32>
    %49 = vector.extract_strided_slice %39 {offsets = [0, 32], sizes = [2, 32], strides = [1, 1]} : vector<2x128xf32> to vector<2x32xf32>
    %50 = arith.mulf %49, %21 : vector<2x32xf32>
    %51 = vector.extract_strided_slice %39 {offsets = [0, 0], sizes = [2, 32], strides = [1, 1]} : vector<2x128xf32> to vector<2x32xf32>
    %52 = arith.mulf %51, %43 : vector<2x32xf32>
    %53 = arith.addf %50, %52 : vector<2x32xf32>
    %54 = vector.extract_strided_slice %34 {offsets = [0, 96], sizes = [2, 32], strides = [1, 1]} : vector<2x128xf32> to vector<2x32xf32>
    %55 = math.tanh %48 : vector<2x32xf32>
    %56 = arith.mulf %54, %55 : vector<2x32xf32>
    %57 = vector.extract_strided_slice %39 {offsets = [0, 96], sizes = [2, 32], strides = [1, 1]} : vector<2x128xf32> to vector<2x32xf32>
    %58 = math.tanh %53 : vector<2x32xf32>
    %59 = arith.mulf %57, %58 : vector<2x32xf32>
    %60 = vector.extract_strided_slice %0 {offsets = [0, 0], sizes = [2, 1], strides = [1, 1]} : vector<16x1xf32> to vector<2x1xf32>
    %61 = vector.extract_strided_slice %0 {offsets = [14, 0], sizes = [2, 1], strides = [1, 1]} : vector<16x1xf32> to vector<2x1xf32>
    %62 = vector.broadcast %60 : vector<2x1xf32> to vector<2x32xf32>
    %63 = arith.mulf %62, %56 : vector<2x32xf32>
    %64 = vector.broadcast %61 : vector<2x1xf32> to vector<2x32xf32>
    %65 = arith.mulf %64, %59 : vector<2x32xf32>
    %cst_16 = arith.constant 1.000000e+00 : f32
    %66 = vector.broadcast %cst_16 : f32 to vector<2x1xf32>
    %67 = arith.subf %66, %60 : vector<2x1xf32>
    %68 = vector.broadcast %67 : vector<2x1xf32> to vector<2x32xf32>
    %69 = arith.mulf %68, %12 : vector<2x32xf32>
    %70 = arith.addf %63, %69 : vector<2x32xf32>
    %71 = vector.broadcast %60 : vector<2x1xf32> to vector<2x32xf32>
    %72 = arith.mulf %71, %48 : vector<2x32xf32>
    %cst_17 = arith.constant 1.000000e+00 : f32
    %73 = vector.broadcast %cst_17 : f32 to vector<2x1xf32>
    %74 = arith.subf %73, %60 : vector<2x1xf32>
    %75 = vector.broadcast %74 : vector<2x1xf32> to vector<2x32xf32>
    %76 = arith.mulf %75, %18 : vector<2x32xf32>
    %77 = arith.addf %72, %76 : vector<2x32xf32>
    %cst_18 = arith.constant 1.000000e+00 : f32
    %78 = vector.broadcast %cst_18 : f32 to vector<2x1xf32>
    %79 = arith.subf %78, %61 : vector<2x1xf32>
    %80 = vector.broadcast %79 : vector<2x1xf32> to vector<2x32xf32>
    %81 = arith.mulf %80, %15 : vector<2x32xf32>
    %82 = arith.addf %65, %81 : vector<2x32xf32>
    %83 = vector.broadcast %61 : vector<2x1xf32> to vector<2x32xf32>
    %84 = arith.mulf %83, %53 : vector<2x32xf32>
    %cst_19 = arith.constant 1.000000e+00 : f32
    %85 = vector.broadcast %cst_19 : f32 to vector<2x1xf32>
    %86 = arith.subf %85, %61 : vector<2x1xf32>
    %87 = vector.broadcast %86 : vector<2x1xf32> to vector<2x32xf32>
    %88 = arith.mulf %87, %21 : vector<2x32xf32>
    %89 = arith.addf %84, %88 : vector<2x32xf32>
    %90 = tpu.concatenate %70, %82 in 1 : vector<2x32xf32>, vector<2x32xf32> -> vector<2x64xf32>
    %cst_20 = arith.constant dense<0.000000e+00> : vector<2x256xf32>
    %91 = tpu.matmul %90, %4, %cst_20 {dimension_numbers = #tpu.dot_dimension_numbers<[1], [0], [0], [1], [0, 0, 1, 1], [], []>} : vector<2x64xf32>, vector<64x256xf32>, vector<2x256xf32> -> vector<2x256xf32>
    %92 = vector.extract_strided_slice %9 {offsets = [2, 0], sizes = [2, 128], strides = [1, 1]} : vector<16x256xf32> to vector<2x128xf32>
    %93 = vector.extract_strided_slice %91 {offsets = [0, 0], sizes = [2, 128], strides = [1, 1]} : vector<2x256xf32> to vector<2x128xf32>
    %94 = arith.addf %92, %93 : vector<2x128xf32>
    %95 = vector.extract_strided_slice %9 {offsets = [12, 128], sizes = [2, 128], strides = [1, 1]} : vector<16x256xf32> to vector<2x128xf32>
    %96 = vector.extract_strided_slice %91 {offsets = [0, 128], sizes = [2, 128], strides = [1, 1]} : vector<2x256xf32> to vector<2x128xf32>
    %97 = arith.addf %95, %96 : vector<2x128xf32>
    %98 = arith.negf %94 : vector<2x128xf32>
    %99 = math.exp %98 : vector<2x128xf32>
    %cst_21 = arith.constant 1.000000e+00 : f32
    %100 = vector.broadcast %cst_21 : f32 to vector<2x128xf32>
    %101 = arith.addf %100, %99 : vector<2x128xf32>
    %102 = arith.divf %100, %101 : vector<2x128xf32>
    %103 = arith.negf %97 : vector<2x128xf32>
    %104 = math.exp %103 : vector<2x128xf32>
    %cst_22 = arith.constant 1.000000e+00 : f32
    %105 = vector.broadcast %cst_22 : f32 to vector<2x128xf32>
    %106 = arith.addf %105, %104 : vector<2x128xf32>
    %107 = arith.divf %105, %106 : vector<2x128xf32>
    %108 = vector.extract_strided_slice %94 {offsets = [0, 64], sizes = [2, 32], strides = [1, 1]} : vector<2x128xf32> to vector<2x32xf32>
    %109 = math.tanh %108 : vector<2x32xf32>
    %110 = vector.extract_strided_slice %97 {offsets = [0, 64], sizes = [2, 32], strides = [1, 1]} : vector<2x128xf32> to vector<2x32xf32>
    %111 = math.tanh %110 : vector<2x32xf32>
    %112 = vector.extract_strided_slice %102 {offsets = [0, 32], sizes = [2, 32], strides = [1, 1]} : vector<2x128xf32> to vector<2x32xf32>
    %113 = arith.mulf %112, %77 : vector<2x32xf32>
    %114 = vector.extract_strided_slice %102 {offsets = [0, 0], sizes = [2, 32], strides = [1, 1]} : vector<2x128xf32> to vector<2x32xf32>
    %115 = arith.mulf %114, %109 : vector<2x32xf32>
    %116 = arith.addf %113, %115 : vector<2x32xf32>
    %117 = vector.extract_strided_slice %107 {offsets = [0, 32], sizes = [2, 32], strides = [1, 1]} : vector<2x128xf32> to vector<2x32xf32>
    %118 = arith.mulf %117, %89 : vector<2x32xf32>
    %119 = vector.extract_strided_slice %107 {offsets = [0, 0], sizes = [2, 32], strides = [1, 1]} : vector<2x128xf32> to vector<2x32xf32>
    %120 = arith.mulf %119, %111 : vector<2x32xf32>
    %121 = arith.addf %118, %120 : vector<2x32xf32>
    %122 = vector.extract_strided_slice %102 {offsets = [0, 96], sizes = [2, 32], strides = [1, 1]} : vector<2x128xf32> to vector<2x32xf32>
    %123 = math.tanh %116 : vector<2x32xf32>
    %124 = arith.mulf %122, %123 : vector<2x32xf32>
    %125 = vector.extract_strided_slice %107 {offsets = [0, 96], sizes = [2, 32], strides = [1, 1]} : vector<2x128xf32> to vector<2x32xf32>
    %126 = math.tanh %121 : vector<2x32xf32>
    %127 = arith.mulf %125, %126 : vector<2x32xf32>
    %128 = vector.extract_strided_slice %0 {offsets = [2, 0], sizes = [2, 1], strides = [1, 1]} : vector<16x1xf32> to vector<2x1xf32>
    %129 = vector.extract_strided_slice %0 {offsets = [12, 0], sizes = [2, 1], strides = [1, 1]} : vector<16x1xf32> to vector<2x1xf32>
    %130 = vector.broadcast %128 : vector<2x1xf32> to vector<2x32xf32>
    %131 = arith.mulf %130, %124 : vector<2x32xf32>
    %132 = vector.broadcast %129 : vector<2x1xf32> to vector<2x32xf32>
    %133 = arith.mulf %132, %127 : vector<2x32xf32>
    %cst_23 = arith.constant 1.000000e+00 : f32
    %134 = vector.broadcast %cst_23 : f32 to vector<2x1xf32>
    %135 = arith.subf %134, %128 : vector<2x1xf32>
    %136 = vector.broadcast %135 : vector<2x1xf32> to vector<2x32xf32>
    %137 = arith.mulf %136, %70 : vector<2x32xf32>
    %138 = arith.addf %131, %137 : vector<2x32xf32>
    %139 = vector.broadcast %128 : vector<2x1xf32> to vector<2x32xf32>
    %140 = arith.mulf %139, %116 : vector<2x32xf32>
    %cst_24 = arith.constant 1.000000e+00 : f32
    %141 = vector.broadcast %cst_24 : f32 to vector<2x1xf32>
    %142 = arith.subf %141, %128 : vector<2x1xf32>
    %143 = vector.broadcast %142 : vector<2x1xf32> to vector<2x32xf32>
    %144 = arith.mulf %143, %77 : vector<2x32xf32>
    %145 = arith.addf %140, %144 : vector<2x32xf32>
    %cst_25 = arith.constant 1.000000e+00 : f32
    %146 = vector.broadcast %cst_25 : f32 to vector<2x1xf32>
    %147 = arith.subf %146, %129 : vector<2x1xf32>
    %148 = vector.broadcast %147 : vector<2x1xf32> to vector<2x32xf32>
    %149 = arith.mulf %148, %82 : vector<2x32xf32>
    %150 = arith.addf %133, %149 : vector<2x32xf32>
    %151 = vector.broadcast %129 : vector<2x1xf32> to vector<2x32xf32>
    %152 = arith.mulf %151, %121 : vector<2x32xf32>
    %cst_26 = arith.constant 1.000000e+00 : f32
    %153 = vector.broadcast %cst_26 : f32 to vector<2x1xf32>
    %154 = arith.subf %153, %129 : vector<2x1xf32>
    %155 = vector.broadcast %154 : vector<2x1xf32> to vector<2x32xf32>
    %156 = arith.mulf %155, %89 : vector<2x32xf32>
    %157 = arith.addf %152, %156 : vector<2x32xf32>
    %158 = tpu.concatenate %138, %150 in 1 : vector<2x32xf32>, vector<2x32xf32> -> vector<2x64xf32>
    %cst_27 = arith.constant dense<0.000000e+00> : vector<2x256xf32>
    %159 = tpu.matmul %158, %4, %cst_27 {dimension_numbers = #tpu.dot_dimension_numbers<[1], [0], [0], [1], [0, 0, 1, 1], [], []>} : vector<2x64xf32>, vector<64x256xf32>, vector<2x256xf32> -> vector<2x256xf32>
    %160 = vector.extract_strided_slice %9 {offsets = [4, 0], sizes = [2, 128], strides = [1, 1]} : vector<16x256xf32> to vector<2x128xf32>
    %161 = vector.extract_strided_slice %159 {offsets = [0, 0], sizes = [2, 128], strides = [1, 1]} : vector<2x256xf32> to vector<2x128xf32>
    %162 = arith.addf %160, %161 : vector<2x128xf32>
    %163 = vector.extract_strided_slice %9 {offsets = [10, 128], sizes = [2, 128], strides = [1, 1]} : vector<16x256xf32> to vector<2x128xf32>
    %164 = vector.extract_strided_slice %159 {offsets = [0, 128], sizes = [2, 128], strides = [1, 1]} : vector<2x256xf32> to vector<2x128xf32>
    %165 = arith.addf %163, %164 : vector<2x128xf32>
    %166 = arith.negf %162 : vector<2x128xf32>
    %167 = math.exp %166 : vector<2x128xf32>
    %cst_28 = arith.constant 1.000000e+00 : f32
    %168 = vector.broadcast %cst_28 : f32 to vector<2x128xf32>
    %169 = arith.addf %168, %167 : vector<2x128xf32>
    %170 = arith.divf %168, %169 : vector<2x128xf32>
    %171 = arith.negf %165 : vector<2x128xf32>
    %172 = math.exp %171 : vector<2x128xf32>
    %cst_29 = arith.constant 1.000000e+00 : f32
    %173 = vector.broadcast %cst_29 : f32 to vector<2x128xf32>
    %174 = arith.addf %173, %172 : vector<2x128xf32>
    %175 = arith.divf %173, %174 : vector<2x128xf32>
    %176 = vector.extract_strided_slice %162 {offsets = [0, 64], sizes = [2, 32], strides = [1, 1]} : vector<2x128xf32> to vector<2x32xf32>
    %177 = math.tanh %176 : vector<2x32xf32>
    %178 = vector.extract_strided_slice %165 {offsets = [0, 64], sizes = [2, 32], strides = [1, 1]} : vector<2x128xf32> to vector<2x32xf32>
    %179 = math.tanh %178 : vector<2x32xf32>
    %180 = vector.extract_strided_slice %170 {offsets = [0, 32], sizes = [2, 32], strides = [1, 1]} : vector<2x128xf32> to vector<2x32xf32>
    %181 = arith.mulf %180, %145 : vector<2x32xf32>
    %182 = vector.extract_strided_slice %170 {offsets = [0, 0], sizes = [2, 32], strides = [1, 1]} : vector<2x128xf32> to vector<2x32xf32>
    %183 = arith.mulf %182, %177 : vector<2x32xf32>
    %184 = arith.addf %181, %183 : vector<2x32xf32>
    %185 = vector.extract_strided_slice %175 {offsets = [0, 32], sizes = [2, 32], strides = [1, 1]} : vector<2x128xf32> to vector<2x32xf32>
    %186 = arith.mulf %185, %157 : vector<2x32xf32>
    %187 = vector.extract_strided_slice %175 {offsets = [0, 0], sizes = [2, 32], strides = [1, 1]} : vector<2x128xf32> to vector<2x32xf32>
    %188 = arith.mulf %187, %179 : vector<2x32xf32>
    %189 = arith.addf %186, %188 : vector<2x32xf32>
    %190 = vector.extract_strided_slice %170 {offsets = [0, 96], sizes = [2, 32], strides = [1, 1]} : vector<2x128xf32> to vector<2x32xf32>
    %191 = math.tanh %184 : vector<2x32xf32>
    %192 = arith.mulf %190, %191 : vector<2x32xf32>
    %193 = vector.extract_strided_slice %175 {offsets = [0, 96], sizes = [2, 32], strides = [1, 1]} : vector<2x128xf32> to vector<2x32xf32>
    %194 = math.tanh %189 : vector<2x32xf32>
    %195 = arith.mulf %193, %194 : vector<2x32xf32>
    %196 = vector.extract_strided_slice %0 {offsets = [4, 0], sizes = [2, 1], strides = [1, 1]} : vector<16x1xf32> to vector<2x1xf32>
    %197 = vector.extract_strided_slice %0 {offsets = [10, 0], sizes = [2, 1], strides = [1, 1]} : vector<16x1xf32> to vector<2x1xf32>
    %198 = vector.broadcast %196 : vector<2x1xf32> to vector<2x32xf32>
    %199 = arith.mulf %198, %192 : vector<2x32xf32>
    %200 = vector.broadcast %197 : vector<2x1xf32> to vector<2x32xf32>
    %201 = arith.mulf %200, %195 : vector<2x32xf32>
    %cst_30 = arith.constant 1.000000e+00 : f32
    %202 = vector.broadcast %cst_30 : f32 to vector<2x1xf32>
    %203 = arith.subf %202, %196 : vector<2x1xf32>
    %204 = vector.broadcast %203 : vector<2x1xf32> to vector<2x32xf32>
    %205 = arith.mulf %204, %138 : vector<2x32xf32>
    %206 = arith.addf %199, %205 : vector<2x32xf32>
    %207 = vector.broadcast %196 : vector<2x1xf32> to vector<2x32xf32>
    %208 = arith.mulf %207, %184 : vector<2x32xf32>
    %cst_31 = arith.constant 1.000000e+00 : f32
    %209 = vector.broadcast %cst_31 : f32 to vector<2x1xf32>
    %210 = arith.subf %209, %196 : vector<2x1xf32>
    %211 = vector.broadcast %210 : vector<2x1xf32> to vector<2x32xf32>
    %212 = arith.mulf %211, %145 : vector<2x32xf32>
    %213 = arith.addf %208, %212 : vector<2x32xf32>
    %cst_32 = arith.constant 1.000000e+00 : f32
    %214 = vector.broadcast %cst_32 : f32 to vector<2x1xf32>
    %215 = arith.subf %214, %197 : vector<2x1xf32>
    %216 = vector.broadcast %215 : vector<2x1xf32> to vector<2x32xf32>
    %217 = arith.mulf %216, %150 : vector<2x32xf32>
    %218 = arith.addf %201, %217 : vector<2x32xf32>
    %219 = vector.broadcast %197 : vector<2x1xf32> to vector<2x32xf32>
    %220 = arith.mulf %219, %189 : vector<2x32xf32>
    %cst_33 = arith.constant 1.000000e+00 : f32
    %221 = vector.broadcast %cst_33 : f32 to vector<2x1xf32>
    %222 = arith.subf %221, %197 : vector<2x1xf32>
    %223 = vector.broadcast %222 : vector<2x1xf32> to vector<2x32xf32>
    %224 = arith.mulf %223, %157 : vector<2x32xf32>
    %225 = arith.addf %220, %224 : vector<2x32xf32>
    %226 = tpu.concatenate %206, %218 in 1 : vector<2x32xf32>, vector<2x32xf32> -> vector<2x64xf32>
    %cst_34 = arith.constant dense<0.000000e+00> : vector<2x256xf32>
    %227 = tpu.matmul %226, %4, %cst_34 {dimension_numbers = #tpu.dot_dimension_numbers<[1], [0], [0], [1], [0, 0, 1, 1], [], []>} : vector<2x64xf32>, vector<64x256xf32>, vector<2x256xf32> -> vector<2x256xf32>
    %228 = vector.extract_strided_slice %9 {offsets = [6, 0], sizes = [2, 128], strides = [1, 1]} : vector<16x256xf32> to vector<2x128xf32>
    %229 = vector.extract_strided_slice %227 {offsets = [0, 0], sizes = [2, 128], strides = [1, 1]} : vector<2x256xf32> to vector<2x128xf32>
    %230 = arith.addf %228, %229 : vector<2x128xf32>
    %231 = vector.extract_strided_slice %9 {offsets = [8, 128], sizes = [2, 128], strides = [1, 1]} : vector<16x256xf32> to vector<2x128xf32>
    %232 = vector.extract_strided_slice %227 {offsets = [0, 128], sizes = [2, 128], strides = [1, 1]} : vector<2x256xf32> to vector<2x128xf32>
    %233 = arith.addf %231, %232 : vector<2x128xf32>
    %234 = arith.negf %230 : vector<2x128xf32>
    %235 = math.exp %234 : vector<2x128xf32>
    %cst_35 = arith.constant 1.000000e+00 : f32
    %236 = vector.broadcast %cst_35 : f32 to vector<2x128xf32>
    %237 = arith.addf %236, %235 : vector<2x128xf32>
    %238 = arith.divf %236, %237 : vector<2x128xf32>
    %239 = arith.negf %233 : vector<2x128xf32>
    %240 = math.exp %239 : vector<2x128xf32>
    %cst_36 = arith.constant 1.000000e+00 : f32
    %241 = vector.broadcast %cst_36 : f32 to vector<2x128xf32>
    %242 = arith.addf %241, %240 : vector<2x128xf32>
    %243 = arith.divf %241, %242 : vector<2x128xf32>
    %244 = vector.extract_strided_slice %230 {offsets = [0, 64], sizes = [2, 32], strides = [1, 1]} : vector<2x128xf32> to vector<2x32xf32>
    %245 = math.tanh %244 : vector<2x32xf32>
    %246 = vector.extract_strided_slice %233 {offsets = [0, 64], sizes = [2, 32], strides = [1, 1]} : vector<2x128xf32> to vector<2x32xf32>
    %247 = math.tanh %246 : vector<2x32xf32>
    %248 = vector.extract_strided_slice %238 {offsets = [0, 32], sizes = [2, 32], strides = [1, 1]} : vector<2x128xf32> to vector<2x32xf32>
    %249 = arith.mulf %248, %213 : vector<2x32xf32>
    %250 = vector.extract_strided_slice %238 {offsets = [0, 0], sizes = [2, 32], strides = [1, 1]} : vector<2x128xf32> to vector<2x32xf32>
    %251 = arith.mulf %250, %245 : vector<2x32xf32>
    %252 = arith.addf %249, %251 : vector<2x32xf32>
    %253 = vector.extract_strided_slice %243 {offsets = [0, 32], sizes = [2, 32], strides = [1, 1]} : vector<2x128xf32> to vector<2x32xf32>
    %254 = arith.mulf %253, %225 : vector<2x32xf32>
    %255 = vector.extract_strided_slice %243 {offsets = [0, 0], sizes = [2, 32], strides = [1, 1]} : vector<2x128xf32> to vector<2x32xf32>
    %256 = arith.mulf %255, %247 : vector<2x32xf32>
    %257 = arith.addf %254, %256 : vector<2x32xf32>
    %258 = vector.extract_strided_slice %238 {offsets = [0, 96], sizes = [2, 32], strides = [1, 1]} : vector<2x128xf32> to vector<2x32xf32>
    %259 = math.tanh %252 : vector<2x32xf32>
    %260 = arith.mulf %258, %259 : vector<2x32xf32>
    %261 = vector.extract_strided_slice %243 {offsets = [0, 96], sizes = [2, 32], strides = [1, 1]} : vector<2x128xf32> to vector<2x32xf32>
    %262 = math.tanh %257 : vector<2x32xf32>
    %263 = arith.mulf %261, %262 : vector<2x32xf32>
    %264 = vector.extract_strided_slice %0 {offsets = [6, 0], sizes = [2, 1], strides = [1, 1]} : vector<16x1xf32> to vector<2x1xf32>
    %265 = vector.extract_strided_slice %0 {offsets = [8, 0], sizes = [2, 1], strides = [1, 1]} : vector<16x1xf32> to vector<2x1xf32>
    %266 = vector.broadcast %264 : vector<2x1xf32> to vector<2x32xf32>
    %267 = arith.mulf %266, %260 : vector<2x32xf32>
    %268 = vector.broadcast %265 : vector<2x1xf32> to vector<2x32xf32>
    %269 = arith.mulf %268, %263 : vector<2x32xf32>
    %cst_37 = arith.constant 1.000000e+00 : f32
    %270 = vector.broadcast %cst_37 : f32 to vector<2x1xf32>
    %271 = arith.subf %270, %264 : vector<2x1xf32>
    %272 = vector.broadcast %271 : vector<2x1xf32> to vector<2x32xf32>
    %273 = arith.mulf %272, %206 : vector<2x32xf32>
    %274 = arith.addf %267, %273 : vector<2x32xf32>
    %275 = vector.broadcast %264 : vector<2x1xf32> to vector<2x32xf32>
    %276 = arith.mulf %275, %252 : vector<2x32xf32>
    %cst_38 = arith.constant 1.000000e+00 : f32
    %277 = vector.broadcast %cst_38 : f32 to vector<2x1xf32>
    %278 = arith.subf %277, %264 : vector<2x1xf32>
    %279 = vector.broadcast %278 : vector<2x1xf32> to vector<2x32xf32>
    %280 = arith.mulf %279, %213 : vector<2x32xf32>
    %281 = arith.addf %276, %280 : vector<2x32xf32>
    %cst_39 = arith.constant 1.000000e+00 : f32
    %282 = vector.broadcast %cst_39 : f32 to vector<2x1xf32>
    %283 = arith.subf %282, %265 : vector<2x1xf32>
    %284 = vector.broadcast %283 : vector<2x1xf32> to vector<2x32xf32>
    %285 = arith.mulf %284, %218 : vector<2x32xf32>
    %286 = arith.addf %269, %285 : vector<2x32xf32>
    %287 = vector.broadcast %265 : vector<2x1xf32> to vector<2x32xf32>
    %288 = arith.mulf %287, %257 : vector<2x32xf32>
    %cst_40 = arith.constant 1.000000e+00 : f32
    %289 = vector.broadcast %cst_40 : f32 to vector<2x1xf32>
    %290 = arith.subf %289, %265 : vector<2x1xf32>
    %291 = vector.broadcast %290 : vector<2x1xf32> to vector<2x32xf32>
    %292 = arith.mulf %291, %225 : vector<2x32xf32>
    %293 = arith.addf %288, %292 : vector<2x32xf32>
    %294 = tpu.concatenate %274, %286 in 1 : vector<2x32xf32>, vector<2x32xf32> -> vector<2x64xf32>
    %cst_41 = arith.constant dense<0.000000e+00> : vector<2x256xf32>
    %295 = tpu.matmul %294, %4, %cst_41 {dimension_numbers = #tpu.dot_dimension_numbers<[1], [0], [0], [1], [0, 0, 1, 1], [], []>} : vector<2x64xf32>, vector<64x256xf32>, vector<2x256xf32> -> vector<2x256xf32>
    %296 = vector.extract_strided_slice %9 {offsets = [8, 0], sizes = [2, 128], strides = [1, 1]} : vector<16x256xf32> to vector<2x128xf32>
    %297 = vector.extract_strided_slice %295 {offsets = [0, 0], sizes = [2, 128], strides = [1, 1]} : vector<2x256xf32> to vector<2x128xf32>
    %298 = arith.addf %296, %297 : vector<2x128xf32>
    %299 = vector.extract_strided_slice %9 {offsets = [6, 128], sizes = [2, 128], strides = [1, 1]} : vector<16x256xf32> to vector<2x128xf32>
    %300 = vector.extract_strided_slice %295 {offsets = [0, 128], sizes = [2, 128], strides = [1, 1]} : vector<2x256xf32> to vector<2x128xf32>
    %301 = arith.addf %299, %300 : vector<2x128xf32>
    %302 = arith.negf %298 : vector<2x128xf32>
    %303 = math.exp %302 : vector<2x128xf32>
    %cst_42 = arith.constant 1.000000e+00 : f32
    %304 = vector.broadcast %cst_42 : f32 to vector<2x128xf32>
    %305 = arith.addf %304, %303 : vector<2x128xf32>
    %306 = arith.divf %304, %305 : vector<2x128xf32>
    %307 = arith.negf %301 : vector<2x128xf32>
    %308 = math.exp %307 : vector<2x128xf32>
    %cst_43 = arith.constant 1.000000e+00 : f32
    %309 = vector.broadcast %cst_43 : f32 to vector<2x128xf32>
    %310 = arith.addf %309, %308 : vector<2x128xf32>
    %311 = arith.divf %309, %310 : vector<2x128xf32>
    %312 = vector.extract_strided_slice %298 {offsets = [0, 64], sizes = [2, 32], strides = [1, 1]} : vector<2x128xf32> to vector<2x32xf32>
    %313 = math.tanh %312 : vector<2x32xf32>
    %314 = vector.extract_strided_slice %301 {offsets = [0, 64], sizes = [2, 32], strides = [1, 1]} : vector<2x128xf32> to vector<2x32xf32>
    %315 = math.tanh %314 : vector<2x32xf32>
    %316 = vector.extract_strided_slice %306 {offsets = [0, 32], sizes = [2, 32], strides = [1, 1]} : vector<2x128xf32> to vector<2x32xf32>
    %317 = arith.mulf %316, %281 : vector<2x32xf32>
    %318 = vector.extract_strided_slice %306 {offsets = [0, 0], sizes = [2, 32], strides = [1, 1]} : vector<2x128xf32> to vector<2x32xf32>
    %319 = arith.mulf %318, %313 : vector<2x32xf32>
    %320 = arith.addf %317, %319 : vector<2x32xf32>
    %321 = vector.extract_strided_slice %311 {offsets = [0, 32], sizes = [2, 32], strides = [1, 1]} : vector<2x128xf32> to vector<2x32xf32>
    %322 = arith.mulf %321, %293 : vector<2x32xf32>
    %323 = vector.extract_strided_slice %311 {offsets = [0, 0], sizes = [2, 32], strides = [1, 1]} : vector<2x128xf32> to vector<2x32xf32>
    %324 = arith.mulf %323, %315 : vector<2x32xf32>
    %325 = arith.addf %322, %324 : vector<2x32xf32>
    %326 = vector.extract_strided_slice %306 {offsets = [0, 96], sizes = [2, 32], strides = [1, 1]} : vector<2x128xf32> to vector<2x32xf32>
    %327 = math.tanh %320 : vector<2x32xf32>
    %328 = arith.mulf %326, %327 : vector<2x32xf32>
    %329 = vector.extract_strided_slice %311 {offsets = [0, 96], sizes = [2, 32], strides = [1, 1]} : vector<2x128xf32> to vector<2x32xf32>
    %330 = math.tanh %325 : vector<2x32xf32>
    %331 = arith.mulf %329, %330 : vector<2x32xf32>
    %332 = vector.extract_strided_slice %0 {offsets = [8, 0], sizes = [2, 1], strides = [1, 1]} : vector<16x1xf32> to vector<2x1xf32>
    %333 = vector.extract_strided_slice %0 {offsets = [6, 0], sizes = [2, 1], strides = [1, 1]} : vector<16x1xf32> to vector<2x1xf32>
    %334 = vector.broadcast %332 : vector<2x1xf32> to vector<2x32xf32>
    %335 = arith.mulf %334, %328 : vector<2x32xf32>
    %336 = vector.broadcast %333 : vector<2x1xf32> to vector<2x32xf32>
    %337 = arith.mulf %336, %331 : vector<2x32xf32>
    %cst_44 = arith.constant 1.000000e+00 : f32
    %338 = vector.broadcast %cst_44 : f32 to vector<2x1xf32>
    %339 = arith.subf %338, %332 : vector<2x1xf32>
    %340 = vector.broadcast %339 : vector<2x1xf32> to vector<2x32xf32>
    %341 = arith.mulf %340, %274 : vector<2x32xf32>
    %342 = arith.addf %335, %341 : vector<2x32xf32>
    %343 = vector.broadcast %332 : vector<2x1xf32> to vector<2x32xf32>
    %344 = arith.mulf %343, %320 : vector<2x32xf32>
    %cst_45 = arith.constant 1.000000e+00 : f32
    %345 = vector.broadcast %cst_45 : f32 to vector<2x1xf32>
    %346 = arith.subf %345, %332 : vector<2x1xf32>
    %347 = vector.broadcast %346 : vector<2x1xf32> to vector<2x32xf32>
    %348 = arith.mulf %347, %281 : vector<2x32xf32>
    %349 = arith.addf %344, %348 : vector<2x32xf32>
    %cst_46 = arith.constant 1.000000e+00 : f32
    %350 = vector.broadcast %cst_46 : f32 to vector<2x1xf32>
    %351 = arith.subf %350, %333 : vector<2x1xf32>
    %352 = vector.broadcast %351 : vector<2x1xf32> to vector<2x32xf32>
    %353 = arith.mulf %352, %286 : vector<2x32xf32>
    %354 = arith.addf %337, %353 : vector<2x32xf32>
    %355 = vector.broadcast %333 : vector<2x1xf32> to vector<2x32xf32>
    %356 = arith.mulf %355, %325 : vector<2x32xf32>
    %cst_47 = arith.constant 1.000000e+00 : f32
    %357 = vector.broadcast %cst_47 : f32 to vector<2x1xf32>
    %358 = arith.subf %357, %333 : vector<2x1xf32>
    %359 = vector.broadcast %358 : vector<2x1xf32> to vector<2x32xf32>
    %360 = arith.mulf %359, %293 : vector<2x32xf32>
    %361 = arith.addf %356, %360 : vector<2x32xf32>
    %362 = tpu.concatenate %342, %354 in 1 : vector<2x32xf32>, vector<2x32xf32> -> vector<2x64xf32>
    %cst_48 = arith.constant dense<0.000000e+00> : vector<2x256xf32>
    %363 = tpu.matmul %362, %4, %cst_48 {dimension_numbers = #tpu.dot_dimension_numbers<[1], [0], [0], [1], [0, 0, 1, 1], [], []>} : vector<2x64xf32>, vector<64x256xf32>, vector<2x256xf32> -> vector<2x256xf32>
    %364 = vector.extract_strided_slice %9 {offsets = [10, 0], sizes = [2, 128], strides = [1, 1]} : vector<16x256xf32> to vector<2x128xf32>
    %365 = vector.extract_strided_slice %363 {offsets = [0, 0], sizes = [2, 128], strides = [1, 1]} : vector<2x256xf32> to vector<2x128xf32>
    %366 = arith.addf %364, %365 : vector<2x128xf32>
    %367 = vector.extract_strided_slice %9 {offsets = [4, 128], sizes = [2, 128], strides = [1, 1]} : vector<16x256xf32> to vector<2x128xf32>
    %368 = vector.extract_strided_slice %363 {offsets = [0, 128], sizes = [2, 128], strides = [1, 1]} : vector<2x256xf32> to vector<2x128xf32>
    %369 = arith.addf %367, %368 : vector<2x128xf32>
    %370 = arith.negf %366 : vector<2x128xf32>
    %371 = math.exp %370 : vector<2x128xf32>
    %cst_49 = arith.constant 1.000000e+00 : f32
    %372 = vector.broadcast %cst_49 : f32 to vector<2x128xf32>
    %373 = arith.addf %372, %371 : vector<2x128xf32>
    %374 = arith.divf %372, %373 : vector<2x128xf32>
    %375 = arith.negf %369 : vector<2x128xf32>
    %376 = math.exp %375 : vector<2x128xf32>
    %cst_50 = arith.constant 1.000000e+00 : f32
    %377 = vector.broadcast %cst_50 : f32 to vector<2x128xf32>
    %378 = arith.addf %377, %376 : vector<2x128xf32>
    %379 = arith.divf %377, %378 : vector<2x128xf32>
    %380 = vector.extract_strided_slice %366 {offsets = [0, 64], sizes = [2, 32], strides = [1, 1]} : vector<2x128xf32> to vector<2x32xf32>
    %381 = math.tanh %380 : vector<2x32xf32>
    %382 = vector.extract_strided_slice %369 {offsets = [0, 64], sizes = [2, 32], strides = [1, 1]} : vector<2x128xf32> to vector<2x32xf32>
    %383 = math.tanh %382 : vector<2x32xf32>
    %384 = vector.extract_strided_slice %374 {offsets = [0, 32], sizes = [2, 32], strides = [1, 1]} : vector<2x128xf32> to vector<2x32xf32>
    %385 = arith.mulf %384, %349 : vector<2x32xf32>
    %386 = vector.extract_strided_slice %374 {offsets = [0, 0], sizes = [2, 32], strides = [1, 1]} : vector<2x128xf32> to vector<2x32xf32>
    %387 = arith.mulf %386, %381 : vector<2x32xf32>
    %388 = arith.addf %385, %387 : vector<2x32xf32>
    %389 = vector.extract_strided_slice %379 {offsets = [0, 32], sizes = [2, 32], strides = [1, 1]} : vector<2x128xf32> to vector<2x32xf32>
    %390 = arith.mulf %389, %361 : vector<2x32xf32>
    %391 = vector.extract_strided_slice %379 {offsets = [0, 0], sizes = [2, 32], strides = [1, 1]} : vector<2x128xf32> to vector<2x32xf32>
    %392 = arith.mulf %391, %383 : vector<2x32xf32>
    %393 = arith.addf %390, %392 : vector<2x32xf32>
    %394 = vector.extract_strided_slice %374 {offsets = [0, 96], sizes = [2, 32], strides = [1, 1]} : vector<2x128xf32> to vector<2x32xf32>
    %395 = math.tanh %388 : vector<2x32xf32>
    %396 = arith.mulf %394, %395 : vector<2x32xf32>
    %397 = vector.extract_strided_slice %379 {offsets = [0, 96], sizes = [2, 32], strides = [1, 1]} : vector<2x128xf32> to vector<2x32xf32>
    %398 = math.tanh %393 : vector<2x32xf32>
    %399 = arith.mulf %397, %398 : vector<2x32xf32>
    %400 = vector.extract_strided_slice %0 {offsets = [10, 0], sizes = [2, 1], strides = [1, 1]} : vector<16x1xf32> to vector<2x1xf32>
    %401 = vector.extract_strided_slice %0 {offsets = [4, 0], sizes = [2, 1], strides = [1, 1]} : vector<16x1xf32> to vector<2x1xf32>
    %402 = vector.broadcast %400 : vector<2x1xf32> to vector<2x32xf32>
    %403 = arith.mulf %402, %396 : vector<2x32xf32>
    %404 = vector.broadcast %401 : vector<2x1xf32> to vector<2x32xf32>
    %405 = arith.mulf %404, %399 : vector<2x32xf32>
    %cst_51 = arith.constant 1.000000e+00 : f32
    %406 = vector.broadcast %cst_51 : f32 to vector<2x1xf32>
    %407 = arith.subf %406, %400 : vector<2x1xf32>
    %408 = vector.broadcast %407 : vector<2x1xf32> to vector<2x32xf32>
    %409 = arith.mulf %408, %342 : vector<2x32xf32>
    %410 = arith.addf %403, %409 : vector<2x32xf32>
    %411 = vector.broadcast %400 : vector<2x1xf32> to vector<2x32xf32>
    %412 = arith.mulf %411, %388 : vector<2x32xf32>
    %cst_52 = arith.constant 1.000000e+00 : f32
    %413 = vector.broadcast %cst_52 : f32 to vector<2x1xf32>
    %414 = arith.subf %413, %400 : vector<2x1xf32>
    %415 = vector.broadcast %414 : vector<2x1xf32> to vector<2x32xf32>
    %416 = arith.mulf %415, %349 : vector<2x32xf32>
    %417 = arith.addf %412, %416 : vector<2x32xf32>
    %cst_53 = arith.constant 1.000000e+00 : f32
    %418 = vector.broadcast %cst_53 : f32 to vector<2x1xf32>
    %419 = arith.subf %418, %401 : vector<2x1xf32>
    %420 = vector.broadcast %419 : vector<2x1xf32> to vector<2x32xf32>
    %421 = arith.mulf %420, %354 : vector<2x32xf32>
    %422 = arith.addf %405, %421 : vector<2x32xf32>
    %423 = vector.broadcast %401 : vector<2x1xf32> to vector<2x32xf32>
    %424 = arith.mulf %423, %393 : vector<2x32xf32>
    %cst_54 = arith.constant 1.000000e+00 : f32
    %425 = vector.broadcast %cst_54 : f32 to vector<2x1xf32>
    %426 = arith.subf %425, %401 : vector<2x1xf32>
    %427 = vector.broadcast %426 : vector<2x1xf32> to vector<2x32xf32>
    %428 = arith.mulf %427, %361 : vector<2x32xf32>
    %429 = arith.addf %424, %428 : vector<2x32xf32>
    %430 = tpu.concatenate %410, %422 in 1 : vector<2x32xf32>, vector<2x32xf32> -> vector<2x64xf32>
    %cst_55 = arith.constant dense<0.000000e+00> : vector<2x256xf32>
    %431 = tpu.matmul %430, %4, %cst_55 {dimension_numbers = #tpu.dot_dimension_numbers<[1], [0], [0], [1], [0, 0, 1, 1], [], []>} : vector<2x64xf32>, vector<64x256xf32>, vector<2x256xf32> -> vector<2x256xf32>
    %432 = vector.extract_strided_slice %9 {offsets = [12, 0], sizes = [2, 128], strides = [1, 1]} : vector<16x256xf32> to vector<2x128xf32>
    %433 = vector.extract_strided_slice %431 {offsets = [0, 0], sizes = [2, 128], strides = [1, 1]} : vector<2x256xf32> to vector<2x128xf32>
    %434 = arith.addf %432, %433 : vector<2x128xf32>
    %435 = vector.extract_strided_slice %9 {offsets = [2, 128], sizes = [2, 128], strides = [1, 1]} : vector<16x256xf32> to vector<2x128xf32>
    %436 = vector.extract_strided_slice %431 {offsets = [0, 128], sizes = [2, 128], strides = [1, 1]} : vector<2x256xf32> to vector<2x128xf32>
    %437 = arith.addf %435, %436 : vector<2x128xf32>
    %438 = arith.negf %434 : vector<2x128xf32>
    %439 = math.exp %438 : vector<2x128xf32>
    %cst_56 = arith.constant 1.000000e+00 : f32
    %440 = vector.broadcast %cst_56 : f32 to vector<2x128xf32>
    %441 = arith.addf %440, %439 : vector<2x128xf32>
    %442 = arith.divf %440, %441 : vector<2x128xf32>
    %443 = arith.negf %437 : vector<2x128xf32>
    %444 = math.exp %443 : vector<2x128xf32>
    %cst_57 = arith.constant 1.000000e+00 : f32
    %445 = vector.broadcast %cst_57 : f32 to vector<2x128xf32>
    %446 = arith.addf %445, %444 : vector<2x128xf32>
    %447 = arith.divf %445, %446 : vector<2x128xf32>
    %448 = vector.extract_strided_slice %434 {offsets = [0, 64], sizes = [2, 32], strides = [1, 1]} : vector<2x128xf32> to vector<2x32xf32>
    %449 = math.tanh %448 : vector<2x32xf32>
    %450 = vector.extract_strided_slice %437 {offsets = [0, 64], sizes = [2, 32], strides = [1, 1]} : vector<2x128xf32> to vector<2x32xf32>
    %451 = math.tanh %450 : vector<2x32xf32>
    %452 = vector.extract_strided_slice %442 {offsets = [0, 32], sizes = [2, 32], strides = [1, 1]} : vector<2x128xf32> to vector<2x32xf32>
    %453 = arith.mulf %452, %417 : vector<2x32xf32>
    %454 = vector.extract_strided_slice %442 {offsets = [0, 0], sizes = [2, 32], strides = [1, 1]} : vector<2x128xf32> to vector<2x32xf32>
    %455 = arith.mulf %454, %449 : vector<2x32xf32>
    %456 = arith.addf %453, %455 : vector<2x32xf32>
    %457 = vector.extract_strided_slice %447 {offsets = [0, 32], sizes = [2, 32], strides = [1, 1]} : vector<2x128xf32> to vector<2x32xf32>
    %458 = arith.mulf %457, %429 : vector<2x32xf32>
    %459 = vector.extract_strided_slice %447 {offsets = [0, 0], sizes = [2, 32], strides = [1, 1]} : vector<2x128xf32> to vector<2x32xf32>
    %460 = arith.mulf %459, %451 : vector<2x32xf32>
    %461 = arith.addf %458, %460 : vector<2x32xf32>
    %462 = vector.extract_strided_slice %442 {offsets = [0, 96], sizes = [2, 32], strides = [1, 1]} : vector<2x128xf32> to vector<2x32xf32>
    %463 = math.tanh %456 : vector<2x32xf32>
    %464 = arith.mulf %462, %463 : vector<2x32xf32>
    %465 = vector.extract_strided_slice %447 {offsets = [0, 96], sizes = [2, 32], strides = [1, 1]} : vector<2x128xf32> to vector<2x32xf32>
    %466 = math.tanh %461 : vector<2x32xf32>
    %467 = arith.mulf %465, %466 : vector<2x32xf32>
    %468 = vector.extract_strided_slice %0 {offsets = [12, 0], sizes = [2, 1], strides = [1, 1]} : vector<16x1xf32> to vector<2x1xf32>
    %469 = vector.extract_strided_slice %0 {offsets = [2, 0], sizes = [2, 1], strides = [1, 1]} : vector<16x1xf32> to vector<2x1xf32>
    %470 = vector.broadcast %468 : vector<2x1xf32> to vector<2x32xf32>
    %471 = arith.mulf %470, %464 : vector<2x32xf32>
    %472 = vector.broadcast %469 : vector<2x1xf32> to vector<2x32xf32>
    %473 = arith.mulf %472, %467 : vector<2x32xf32>
    %cst_58 = arith.constant 1.000000e+00 : f32
    %474 = vector.broadcast %cst_58 : f32 to vector<2x1xf32>
    %475 = arith.subf %474, %468 : vector<2x1xf32>
    %476 = vector.broadcast %475 : vector<2x1xf32> to vector<2x32xf32>
    %477 = arith.mulf %476, %410 : vector<2x32xf32>
    %478 = arith.addf %471, %477 : vector<2x32xf32>
    %479 = vector.broadcast %468 : vector<2x1xf32> to vector<2x32xf32>
    %480 = arith.mulf %479, %456 : vector<2x32xf32>
    %cst_59 = arith.constant 1.000000e+00 : f32
    %481 = vector.broadcast %cst_59 : f32 to vector<2x1xf32>
    %482 = arith.subf %481, %468 : vector<2x1xf32>
    %483 = vector.broadcast %482 : vector<2x1xf32> to vector<2x32xf32>
    %484 = arith.mulf %483, %417 : vector<2x32xf32>
    %485 = arith.addf %480, %484 : vector<2x32xf32>
    %cst_60 = arith.constant 1.000000e+00 : f32
    %486 = vector.broadcast %cst_60 : f32 to vector<2x1xf32>
    %487 = arith.subf %486, %469 : vector<2x1xf32>
    %488 = vector.broadcast %487 : vector<2x1xf32> to vector<2x32xf32>
    %489 = arith.mulf %488, %422 : vector<2x32xf32>
    %490 = arith.addf %473, %489 : vector<2x32xf32>
    %491 = vector.broadcast %469 : vector<2x1xf32> to vector<2x32xf32>
    %492 = arith.mulf %491, %461 : vector<2x32xf32>
    %cst_61 = arith.constant 1.000000e+00 : f32
    %493 = vector.broadcast %cst_61 : f32 to vector<2x1xf32>
    %494 = arith.subf %493, %469 : vector<2x1xf32>
    %495 = vector.broadcast %494 : vector<2x1xf32> to vector<2x32xf32>
    %496 = arith.mulf %495, %429 : vector<2x32xf32>
    %497 = arith.addf %492, %496 : vector<2x32xf32>
    %498 = tpu.concatenate %478, %490 in 1 : vector<2x32xf32>, vector<2x32xf32> -> vector<2x64xf32>
    %cst_62 = arith.constant dense<0.000000e+00> : vector<2x256xf32>
    %499 = tpu.matmul %498, %4, %cst_62 {dimension_numbers = #tpu.dot_dimension_numbers<[1], [0], [0], [1], [0, 0, 1, 1], [], []>} : vector<2x64xf32>, vector<64x256xf32>, vector<2x256xf32> -> vector<2x256xf32>
    %500 = vector.extract_strided_slice %9 {offsets = [14, 0], sizes = [2, 128], strides = [1, 1]} : vector<16x256xf32> to vector<2x128xf32>
    %501 = vector.extract_strided_slice %499 {offsets = [0, 0], sizes = [2, 128], strides = [1, 1]} : vector<2x256xf32> to vector<2x128xf32>
    %502 = arith.addf %500, %501 : vector<2x128xf32>
    %503 = vector.extract_strided_slice %9 {offsets = [0, 128], sizes = [2, 128], strides = [1, 1]} : vector<16x256xf32> to vector<2x128xf32>
    %504 = vector.extract_strided_slice %499 {offsets = [0, 128], sizes = [2, 128], strides = [1, 1]} : vector<2x256xf32> to vector<2x128xf32>
    %505 = arith.addf %503, %504 : vector<2x128xf32>
    %506 = arith.negf %502 : vector<2x128xf32>
    %507 = math.exp %506 : vector<2x128xf32>
    %cst_63 = arith.constant 1.000000e+00 : f32
    %508 = vector.broadcast %cst_63 : f32 to vector<2x128xf32>
    %509 = arith.addf %508, %507 : vector<2x128xf32>
    %510 = arith.divf %508, %509 : vector<2x128xf32>
    %511 = arith.negf %505 : vector<2x128xf32>
    %512 = math.exp %511 : vector<2x128xf32>
    %cst_64 = arith.constant 1.000000e+00 : f32
    %513 = vector.broadcast %cst_64 : f32 to vector<2x128xf32>
    %514 = arith.addf %513, %512 : vector<2x128xf32>
    %515 = arith.divf %513, %514 : vector<2x128xf32>
    %516 = vector.extract_strided_slice %502 {offsets = [0, 64], sizes = [2, 32], strides = [1, 1]} : vector<2x128xf32> to vector<2x32xf32>
    %517 = math.tanh %516 : vector<2x32xf32>
    %518 = vector.extract_strided_slice %505 {offsets = [0, 64], sizes = [2, 32], strides = [1, 1]} : vector<2x128xf32> to vector<2x32xf32>
    %519 = math.tanh %518 : vector<2x32xf32>
    %520 = vector.extract_strided_slice %510 {offsets = [0, 32], sizes = [2, 32], strides = [1, 1]} : vector<2x128xf32> to vector<2x32xf32>
    %521 = arith.mulf %520, %485 : vector<2x32xf32>
    %522 = vector.extract_strided_slice %510 {offsets = [0, 0], sizes = [2, 32], strides = [1, 1]} : vector<2x128xf32> to vector<2x32xf32>
    %523 = arith.mulf %522, %517 : vector<2x32xf32>
    %524 = arith.addf %521, %523 : vector<2x32xf32>
    %525 = vector.extract_strided_slice %515 {offsets = [0, 32], sizes = [2, 32], strides = [1, 1]} : vector<2x128xf32> to vector<2x32xf32>
    %526 = arith.mulf %525, %497 : vector<2x32xf32>
    %527 = vector.extract_strided_slice %515 {offsets = [0, 0], sizes = [2, 32], strides = [1, 1]} : vector<2x128xf32> to vector<2x32xf32>
    %528 = arith.mulf %527, %519 : vector<2x32xf32>
    %529 = arith.addf %526, %528 : vector<2x32xf32>
    %530 = vector.extract_strided_slice %510 {offsets = [0, 96], sizes = [2, 32], strides = [1, 1]} : vector<2x128xf32> to vector<2x32xf32>
    %531 = math.tanh %524 : vector<2x32xf32>
    %532 = arith.mulf %530, %531 : vector<2x32xf32>
    %533 = vector.extract_strided_slice %515 {offsets = [0, 96], sizes = [2, 32], strides = [1, 1]} : vector<2x128xf32> to vector<2x32xf32>
    %534 = math.tanh %529 : vector<2x32xf32>
    %535 = arith.mulf %533, %534 : vector<2x32xf32>
    %536 = vector.extract_strided_slice %0 {offsets = [14, 0], sizes = [2, 1], strides = [1, 1]} : vector<16x1xf32> to vector<2x1xf32>
    %537 = vector.extract_strided_slice %0 {offsets = [0, 0], sizes = [2, 1], strides = [1, 1]} : vector<16x1xf32> to vector<2x1xf32>
    %538 = vector.broadcast %536 : vector<2x1xf32> to vector<2x32xf32>
    %539 = arith.mulf %538, %532 : vector<2x32xf32>
    %540 = vector.broadcast %537 : vector<2x1xf32> to vector<2x32xf32>
    %541 = arith.mulf %540, %535 : vector<2x32xf32>
    %542 = tpu.concatenate %63, %541 in 1 : vector<2x32xf32>, vector<2x32xf32> -> vector<2x64xf32>
    %543 = tpu.concatenate %131, %473 in 1 : vector<2x32xf32>, vector<2x32xf32> -> vector<2x64xf32>
    %544 = tpu.concatenate %199, %405 in 1 : vector<2x32xf32>, vector<2x32xf32> -> vector<2x64xf32>
    %545 = tpu.concatenate %267, %337 in 1 : vector<2x32xf32>, vector<2x32xf32> -> vector<2x64xf32>
    %546 = tpu.concatenate %335, %269 in 1 : vector<2x32xf32>, vector<2x32xf32> -> vector<2x64xf32>
    %547 = tpu.concatenate %403, %201 in 1 : vector<2x32xf32>, vector<2x32xf32> -> vector<2x64xf32>
    %548 = tpu.concatenate %471, %133 in 1 : vector<2x32xf32>, vector<2x32xf32> -> vector<2x64xf32>
    %549 = tpu.concatenate %539, %65 in 1 : vector<2x32xf32>, vector<2x32xf32> -> vector<2x64xf32>
    %550 = tpu.concatenate %542, %543, %544, %545, %546, %547, %548, %549 in 0 : vector<2x64xf32>, vector<2x64xf32>, vector<2x64xf32>, vector<2x64xf32>, vector<2x64xf32>, vector<2x64xf32>, vector<2x64xf32>, vector<2x64xf32> -> vector<16x64xf32>
    %c0_65 = arith.constant 0 : index
    %c0_66 = arith.constant 0 : index
    %551 = vector.load %arg7[%c0_65, %c0_66] : memref<64x256xf32, #tpu.memory_space<vmem>>, vector<64x256xf32>
    %c0_67 = arith.constant 0 : index
    %c0_68 = arith.constant 0 : index
    %552 = vector.load %arg8[%c0_67, %c0_68] : memref<1x256xf32, #tpu.memory_space<vmem>>, vector<1x256xf32>
    %c0_69 = arith.constant 0 : index
    %c0_70 = arith.constant 0 : index
    %553 = vector.load %arg9[%c0_69, %c0_70] : memref<64x256xf32, #tpu.memory_space<vmem>>, vector<64x256xf32>
    %c0_71 = arith.constant 0 : index
    %c0_72 = arith.constant 0 : index
    %554 = vector.load %arg10[%c0_71, %c0_72] : memref<1x64xf32, #tpu.memory_space<vmem>>, vector<1x64xf32>
    %c0_73 = arith.constant 0 : index
    %c0_74 = arith.constant 0 : index
    %555 = vector.load %arg11[%c0_73, %c0_74] : memref<1x64xf32, #tpu.memory_space<vmem>>, vector<1x64xf32>
    %cst_75 = arith.constant dense<0.000000e+00> : vector<16x256xf32>
    %556 = tpu.matmul %550, %551, %cst_75 {dimension_numbers = #tpu.dot_dimension_numbers<[1], [0], [0], [1], [0, 0, 1, 1], [], []>} : vector<16x64xf32>, vector<64x256xf32>, vector<16x256xf32> -> vector<16x256xf32>
    %557 = vector.broadcast %552 : vector<1x256xf32> to vector<16x256xf32>
    %558 = arith.addf %556, %557 : vector<16x256xf32>
    %559 = vector.extract_strided_slice %554 {offsets = [0, 0], sizes = [1, 32], strides = [1, 1]} : vector<1x64xf32> to vector<1x32xf32>
    %560 = vector.shape_cast %559 : vector<1x32xf32> to vector<1x32xf32>
    %561 = vector.broadcast %560 : vector<1x32xf32> to vector<2x32xf32>
    %562 = vector.extract_strided_slice %554 {offsets = [0, 32], sizes = [1, 32], strides = [1, 1]} : vector<1x64xf32> to vector<1x32xf32>
    %563 = vector.shape_cast %562 : vector<1x32xf32> to vector<1x32xf32>
    %564 = vector.broadcast %563 : vector<1x32xf32> to vector<2x32xf32>
    %565 = vector.extract_strided_slice %555 {offsets = [0, 0], sizes = [1, 32], strides = [1, 1]} : vector<1x64xf32> to vector<1x32xf32>
    %566 = vector.shape_cast %565 : vector<1x32xf32> to vector<1x32xf32>
    %567 = vector.broadcast %566 : vector<1x32xf32> to vector<2x32xf32>
    %568 = vector.extract_strided_slice %555 {offsets = [0, 32], sizes = [1, 32], strides = [1, 1]} : vector<1x64xf32> to vector<1x32xf32>
    %569 = vector.shape_cast %568 : vector<1x32xf32> to vector<1x32xf32>
    %570 = vector.broadcast %569 : vector<1x32xf32> to vector<2x32xf32>
    %571 = tpu.concatenate %561, %564 in 1 : vector<2x32xf32>, vector<2x32xf32> -> vector<2x64xf32>
    %cst_76 = arith.constant dense<0.000000e+00> : vector<2x256xf32>
    %572 = tpu.matmul %571, %553, %cst_76 {dimension_numbers = #tpu.dot_dimension_numbers<[1], [0], [0], [1], [0, 0, 1, 1], [], []>} : vector<2x64xf32>, vector<64x256xf32>, vector<2x256xf32> -> vector<2x256xf32>
    %573 = vector.extract_strided_slice %558 {offsets = [0, 0], sizes = [2, 128], strides = [1, 1]} : vector<16x256xf32> to vector<2x128xf32>
    %574 = vector.extract_strided_slice %572 {offsets = [0, 0], sizes = [2, 128], strides = [1, 1]} : vector<2x256xf32> to vector<2x128xf32>
    %575 = arith.addf %573, %574 : vector<2x128xf32>
    %576 = vector.extract_strided_slice %558 {offsets = [14, 128], sizes = [2, 128], strides = [1, 1]} : vector<16x256xf32> to vector<2x128xf32>
    %577 = vector.extract_strided_slice %572 {offsets = [0, 128], sizes = [2, 128], strides = [1, 1]} : vector<2x256xf32> to vector<2x128xf32>
    %578 = arith.addf %576, %577 : vector<2x128xf32>
    %579 = arith.negf %575 : vector<2x128xf32>
    %580 = math.exp %579 : vector<2x128xf32>
    %cst_77 = arith.constant 1.000000e+00 : f32
    %581 = vector.broadcast %cst_77 : f32 to vector<2x128xf32>
    %582 = arith.addf %581, %580 : vector<2x128xf32>
    %583 = arith.divf %581, %582 : vector<2x128xf32>
    %584 = arith.negf %578 : vector<2x128xf32>
    %585 = math.exp %584 : vector<2x128xf32>
    %cst_78 = arith.constant 1.000000e+00 : f32
    %586 = vector.broadcast %cst_78 : f32 to vector<2x128xf32>
    %587 = arith.addf %586, %585 : vector<2x128xf32>
    %588 = arith.divf %586, %587 : vector<2x128xf32>
    %589 = vector.extract_strided_slice %575 {offsets = [0, 64], sizes = [2, 32], strides = [1, 1]} : vector<2x128xf32> to vector<2x32xf32>
    %590 = math.tanh %589 : vector<2x32xf32>
    %591 = vector.extract_strided_slice %578 {offsets = [0, 64], sizes = [2, 32], strides = [1, 1]} : vector<2x128xf32> to vector<2x32xf32>
    %592 = math.tanh %591 : vector<2x32xf32>
    %593 = vector.extract_strided_slice %583 {offsets = [0, 32], sizes = [2, 32], strides = [1, 1]} : vector<2x128xf32> to vector<2x32xf32>
    %594 = arith.mulf %593, %567 : vector<2x32xf32>
    %595 = vector.extract_strided_slice %583 {offsets = [0, 0], sizes = [2, 32], strides = [1, 1]} : vector<2x128xf32> to vector<2x32xf32>
    %596 = arith.mulf %595, %590 : vector<2x32xf32>
    %597 = arith.addf %594, %596 : vector<2x32xf32>
    %598 = vector.extract_strided_slice %588 {offsets = [0, 32], sizes = [2, 32], strides = [1, 1]} : vector<2x128xf32> to vector<2x32xf32>
    %599 = arith.mulf %598, %570 : vector<2x32xf32>
    %600 = vector.extract_strided_slice %588 {offsets = [0, 0], sizes = [2, 32], strides = [1, 1]} : vector<2x128xf32> to vector<2x32xf32>
    %601 = arith.mulf %600, %592 : vector<2x32xf32>
    %602 = arith.addf %599, %601 : vector<2x32xf32>
    %603 = vector.extract_strided_slice %583 {offsets = [0, 96], sizes = [2, 32], strides = [1, 1]} : vector<2x128xf32> to vector<2x32xf32>
    %604 = math.tanh %597 : vector<2x32xf32>
    %605 = arith.mulf %603, %604 : vector<2x32xf32>
    %606 = vector.extract_strided_slice %588 {offsets = [0, 96], sizes = [2, 32], strides = [1, 1]} : vector<2x128xf32> to vector<2x32xf32>
    %607 = math.tanh %602 : vector<2x32xf32>
    %608 = arith.mulf %606, %607 : vector<2x32xf32>
    %609 = vector.extract_strided_slice %0 {offsets = [0, 0], sizes = [2, 1], strides = [1, 1]} : vector<16x1xf32> to vector<2x1xf32>
    %610 = vector.extract_strided_slice %0 {offsets = [14, 0], sizes = [2, 1], strides = [1, 1]} : vector<16x1xf32> to vector<2x1xf32>
    %611 = vector.broadcast %609 : vector<2x1xf32> to vector<2x32xf32>
    %612 = arith.mulf %611, %605 : vector<2x32xf32>
    %613 = vector.broadcast %610 : vector<2x1xf32> to vector<2x32xf32>
    %614 = arith.mulf %613, %608 : vector<2x32xf32>
    %cst_79 = arith.constant 1.000000e+00 : f32
    %615 = vector.broadcast %cst_79 : f32 to vector<2x1xf32>
    %616 = arith.subf %615, %609 : vector<2x1xf32>
    %617 = vector.broadcast %616 : vector<2x1xf32> to vector<2x32xf32>
    %618 = arith.mulf %617, %561 : vector<2x32xf32>
    %619 = arith.addf %612, %618 : vector<2x32xf32>
    %620 = vector.broadcast %609 : vector<2x1xf32> to vector<2x32xf32>
    %621 = arith.mulf %620, %597 : vector<2x32xf32>
    %cst_80 = arith.constant 1.000000e+00 : f32
    %622 = vector.broadcast %cst_80 : f32 to vector<2x1xf32>
    %623 = arith.subf %622, %609 : vector<2x1xf32>
    %624 = vector.broadcast %623 : vector<2x1xf32> to vector<2x32xf32>
    %625 = arith.mulf %624, %567 : vector<2x32xf32>
    %626 = arith.addf %621, %625 : vector<2x32xf32>
    %cst_81 = arith.constant 1.000000e+00 : f32
    %627 = vector.broadcast %cst_81 : f32 to vector<2x1xf32>
    %628 = arith.subf %627, %610 : vector<2x1xf32>
    %629 = vector.broadcast %628 : vector<2x1xf32> to vector<2x32xf32>
    %630 = arith.mulf %629, %564 : vector<2x32xf32>
    %631 = arith.addf %614, %630 : vector<2x32xf32>
    %632 = vector.broadcast %610 : vector<2x1xf32> to vector<2x32xf32>
    %633 = arith.mulf %632, %602 : vector<2x32xf32>
    %cst_82 = arith.constant 1.000000e+00 : f32
    %634 = vector.broadcast %cst_82 : f32 to vector<2x1xf32>
    %635 = arith.subf %634, %610 : vector<2x1xf32>
    %636 = vector.broadcast %635 : vector<2x1xf32> to vector<2x32xf32>
    %637 = arith.mulf %636, %570 : vector<2x32xf32>
    %638 = arith.addf %633, %637 : vector<2x32xf32>
    %639 = tpu.concatenate %619, %631 in 1 : vector<2x32xf32>, vector<2x32xf32> -> vector<2x64xf32>
    %cst_83 = arith.constant dense<0.000000e+00> : vector<2x256xf32>
    %640 = tpu.matmul %639, %553, %cst_83 {dimension_numbers = #tpu.dot_dimension_numbers<[1], [0], [0], [1], [0, 0, 1, 1], [], []>} : vector<2x64xf32>, vector<64x256xf32>, vector<2x256xf32> -> vector<2x256xf32>
    %641 = vector.extract_strided_slice %558 {offsets = [2, 0], sizes = [2, 128], strides = [1, 1]} : vector<16x256xf32> to vector<2x128xf32>
    %642 = vector.extract_strided_slice %640 {offsets = [0, 0], sizes = [2, 128], strides = [1, 1]} : vector<2x256xf32> to vector<2x128xf32>
    %643 = arith.addf %641, %642 : vector<2x128xf32>
    %644 = vector.extract_strided_slice %558 {offsets = [12, 128], sizes = [2, 128], strides = [1, 1]} : vector<16x256xf32> to vector<2x128xf32>
    %645 = vector.extract_strided_slice %640 {offsets = [0, 128], sizes = [2, 128], strides = [1, 1]} : vector<2x256xf32> to vector<2x128xf32>
    %646 = arith.addf %644, %645 : vector<2x128xf32>
    %647 = arith.negf %643 : vector<2x128xf32>
    %648 = math.exp %647 : vector<2x128xf32>
    %cst_84 = arith.constant 1.000000e+00 : f32
    %649 = vector.broadcast %cst_84 : f32 to vector<2x128xf32>
    %650 = arith.addf %649, %648 : vector<2x128xf32>
    %651 = arith.divf %649, %650 : vector<2x128xf32>
    %652 = arith.negf %646 : vector<2x128xf32>
    %653 = math.exp %652 : vector<2x128xf32>
    %cst_85 = arith.constant 1.000000e+00 : f32
    %654 = vector.broadcast %cst_85 : f32 to vector<2x128xf32>
    %655 = arith.addf %654, %653 : vector<2x128xf32>
    %656 = arith.divf %654, %655 : vector<2x128xf32>
    %657 = vector.extract_strided_slice %643 {offsets = [0, 64], sizes = [2, 32], strides = [1, 1]} : vector<2x128xf32> to vector<2x32xf32>
    %658 = math.tanh %657 : vector<2x32xf32>
    %659 = vector.extract_strided_slice %646 {offsets = [0, 64], sizes = [2, 32], strides = [1, 1]} : vector<2x128xf32> to vector<2x32xf32>
    %660 = math.tanh %659 : vector<2x32xf32>
    %661 = vector.extract_strided_slice %651 {offsets = [0, 32], sizes = [2, 32], strides = [1, 1]} : vector<2x128xf32> to vector<2x32xf32>
    %662 = arith.mulf %661, %626 : vector<2x32xf32>
    %663 = vector.extract_strided_slice %651 {offsets = [0, 0], sizes = [2, 32], strides = [1, 1]} : vector<2x128xf32> to vector<2x32xf32>
    %664 = arith.mulf %663, %658 : vector<2x32xf32>
    %665 = arith.addf %662, %664 : vector<2x32xf32>
    %666 = vector.extract_strided_slice %656 {offsets = [0, 32], sizes = [2, 32], strides = [1, 1]} : vector<2x128xf32> to vector<2x32xf32>
    %667 = arith.mulf %666, %638 : vector<2x32xf32>
    %668 = vector.extract_strided_slice %656 {offsets = [0, 0], sizes = [2, 32], strides = [1, 1]} : vector<2x128xf32> to vector<2x32xf32>
    %669 = arith.mulf %668, %660 : vector<2x32xf32>
    %670 = arith.addf %667, %669 : vector<2x32xf32>
    %671 = vector.extract_strided_slice %651 {offsets = [0, 96], sizes = [2, 32], strides = [1, 1]} : vector<2x128xf32> to vector<2x32xf32>
    %672 = math.tanh %665 : vector<2x32xf32>
    %673 = arith.mulf %671, %672 : vector<2x32xf32>
    %674 = vector.extract_strided_slice %656 {offsets = [0, 96], sizes = [2, 32], strides = [1, 1]} : vector<2x128xf32> to vector<2x32xf32>
    %675 = math.tanh %670 : vector<2x32xf32>
    %676 = arith.mulf %674, %675 : vector<2x32xf32>
    %677 = vector.extract_strided_slice %0 {offsets = [2, 0], sizes = [2, 1], strides = [1, 1]} : vector<16x1xf32> to vector<2x1xf32>
    %678 = vector.extract_strided_slice %0 {offsets = [12, 0], sizes = [2, 1], strides = [1, 1]} : vector<16x1xf32> to vector<2x1xf32>
    %679 = vector.broadcast %677 : vector<2x1xf32> to vector<2x32xf32>
    %680 = arith.mulf %679, %673 : vector<2x32xf32>
    %681 = vector.broadcast %678 : vector<2x1xf32> to vector<2x32xf32>
    %682 = arith.mulf %681, %676 : vector<2x32xf32>
    %cst_86 = arith.constant 1.000000e+00 : f32
    %683 = vector.broadcast %cst_86 : f32 to vector<2x1xf32>
    %684 = arith.subf %683, %677 : vector<2x1xf32>
    %685 = vector.broadcast %684 : vector<2x1xf32> to vector<2x32xf32>
    %686 = arith.mulf %685, %619 : vector<2x32xf32>
    %687 = arith.addf %680, %686 : vector<2x32xf32>
    %688 = vector.broadcast %677 : vector<2x1xf32> to vector<2x32xf32>
    %689 = arith.mulf %688, %665 : vector<2x32xf32>
    %cst_87 = arith.constant 1.000000e+00 : f32
    %690 = vector.broadcast %cst_87 : f32 to vector<2x1xf32>
    %691 = arith.subf %690, %677 : vector<2x1xf32>
    %692 = vector.broadcast %691 : vector<2x1xf32> to vector<2x32xf32>
    %693 = arith.mulf %692, %626 : vector<2x32xf32>
    %694 = arith.addf %689, %693 : vector<2x32xf32>
    %cst_88 = arith.constant 1.000000e+00 : f32
    %695 = vector.broadcast %cst_88 : f32 to vector<2x1xf32>
    %696 = arith.subf %695, %678 : vector<2x1xf32>
    %697 = vector.broadcast %696 : vector<2x1xf32> to vector<2x32xf32>
    %698 = arith.mulf %697, %631 : vector<2x32xf32>
    %699 = arith.addf %682, %698 : vector<2x32xf32>
    %700 = vector.broadcast %678 : vector<2x1xf32> to vector<2x32xf32>
    %701 = arith.mulf %700, %670 : vector<2x32xf32>
    %cst_89 = arith.constant 1.000000e+00 : f32
    %702 = vector.broadcast %cst_89 : f32 to vector<2x1xf32>
    %703 = arith.subf %702, %678 : vector<2x1xf32>
    %704 = vector.broadcast %703 : vector<2x1xf32> to vector<2x32xf32>
    %705 = arith.mulf %704, %638 : vector<2x32xf32>
    %706 = arith.addf %701, %705 : vector<2x32xf32>
    %707 = tpu.concatenate %687, %699 in 1 : vector<2x32xf32>, vector<2x32xf32> -> vector<2x64xf32>
    %cst_90 = arith.constant dense<0.000000e+00> : vector<2x256xf32>
    %708 = tpu.matmul %707, %553, %cst_90 {dimension_numbers = #tpu.dot_dimension_numbers<[1], [0], [0], [1], [0, 0, 1, 1], [], []>} : vector<2x64xf32>, vector<64x256xf32>, vector<2x256xf32> -> vector<2x256xf32>
    %709 = vector.extract_strided_slice %558 {offsets = [4, 0], sizes = [2, 128], strides = [1, 1]} : vector<16x256xf32> to vector<2x128xf32>
    %710 = vector.extract_strided_slice %708 {offsets = [0, 0], sizes = [2, 128], strides = [1, 1]} : vector<2x256xf32> to vector<2x128xf32>
    %711 = arith.addf %709, %710 : vector<2x128xf32>
    %712 = vector.extract_strided_slice %558 {offsets = [10, 128], sizes = [2, 128], strides = [1, 1]} : vector<16x256xf32> to vector<2x128xf32>
    %713 = vector.extract_strided_slice %708 {offsets = [0, 128], sizes = [2, 128], strides = [1, 1]} : vector<2x256xf32> to vector<2x128xf32>
    %714 = arith.addf %712, %713 : vector<2x128xf32>
    %715 = arith.negf %711 : vector<2x128xf32>
    %716 = math.exp %715 : vector<2x128xf32>
    %cst_91 = arith.constant 1.000000e+00 : f32
    %717 = vector.broadcast %cst_91 : f32 to vector<2x128xf32>
    %718 = arith.addf %717, %716 : vector<2x128xf32>
    %719 = arith.divf %717, %718 : vector<2x128xf32>
    %720 = arith.negf %714 : vector<2x128xf32>
    %721 = math.exp %720 : vector<2x128xf32>
    %cst_92 = arith.constant 1.000000e+00 : f32
    %722 = vector.broadcast %cst_92 : f32 to vector<2x128xf32>
    %723 = arith.addf %722, %721 : vector<2x128xf32>
    %724 = arith.divf %722, %723 : vector<2x128xf32>
    %725 = vector.extract_strided_slice %711 {offsets = [0, 64], sizes = [2, 32], strides = [1, 1]} : vector<2x128xf32> to vector<2x32xf32>
    %726 = math.tanh %725 : vector<2x32xf32>
    %727 = vector.extract_strided_slice %714 {offsets = [0, 64], sizes = [2, 32], strides = [1, 1]} : vector<2x128xf32> to vector<2x32xf32>
    %728 = math.tanh %727 : vector<2x32xf32>
    %729 = vector.extract_strided_slice %719 {offsets = [0, 32], sizes = [2, 32], strides = [1, 1]} : vector<2x128xf32> to vector<2x32xf32>
    %730 = arith.mulf %729, %694 : vector<2x32xf32>
    %731 = vector.extract_strided_slice %719 {offsets = [0, 0], sizes = [2, 32], strides = [1, 1]} : vector<2x128xf32> to vector<2x32xf32>
    %732 = arith.mulf %731, %726 : vector<2x32xf32>
    %733 = arith.addf %730, %732 : vector<2x32xf32>
    %734 = vector.extract_strided_slice %724 {offsets = [0, 32], sizes = [2, 32], strides = [1, 1]} : vector<2x128xf32> to vector<2x32xf32>
    %735 = arith.mulf %734, %706 : vector<2x32xf32>
    %736 = vector.extract_strided_slice %724 {offsets = [0, 0], sizes = [2, 32], strides = [1, 1]} : vector<2x128xf32> to vector<2x32xf32>
    %737 = arith.mulf %736, %728 : vector<2x32xf32>
    %738 = arith.addf %735, %737 : vector<2x32xf32>
    %739 = vector.extract_strided_slice %719 {offsets = [0, 96], sizes = [2, 32], strides = [1, 1]} : vector<2x128xf32> to vector<2x32xf32>
    %740 = math.tanh %733 : vector<2x32xf32>
    %741 = arith.mulf %739, %740 : vector<2x32xf32>
    %742 = vector.extract_strided_slice %724 {offsets = [0, 96], sizes = [2, 32], strides = [1, 1]} : vector<2x128xf32> to vector<2x32xf32>
    %743 = math.tanh %738 : vector<2x32xf32>
    %744 = arith.mulf %742, %743 : vector<2x32xf32>
    %745 = vector.extract_strided_slice %0 {offsets = [4, 0], sizes = [2, 1], strides = [1, 1]} : vector<16x1xf32> to vector<2x1xf32>
    %746 = vector.extract_strided_slice %0 {offsets = [10, 0], sizes = [2, 1], strides = [1, 1]} : vector<16x1xf32> to vector<2x1xf32>
    %747 = vector.broadcast %745 : vector<2x1xf32> to vector<2x32xf32>
    %748 = arith.mulf %747, %741 : vector<2x32xf32>
    %749 = vector.broadcast %746 : vector<2x1xf32> to vector<2x32xf32>
    %750 = arith.mulf %749, %744 : vector<2x32xf32>
    %cst_93 = arith.constant 1.000000e+00 : f32
    %751 = vector.broadcast %cst_93 : f32 to vector<2x1xf32>
    %752 = arith.subf %751, %745 : vector<2x1xf32>
    %753 = vector.broadcast %752 : vector<2x1xf32> to vector<2x32xf32>
    %754 = arith.mulf %753, %687 : vector<2x32xf32>
    %755 = arith.addf %748, %754 : vector<2x32xf32>
    %756 = vector.broadcast %745 : vector<2x1xf32> to vector<2x32xf32>
    %757 = arith.mulf %756, %733 : vector<2x32xf32>
    %cst_94 = arith.constant 1.000000e+00 : f32
    %758 = vector.broadcast %cst_94 : f32 to vector<2x1xf32>
    %759 = arith.subf %758, %745 : vector<2x1xf32>
    %760 = vector.broadcast %759 : vector<2x1xf32> to vector<2x32xf32>
    %761 = arith.mulf %760, %694 : vector<2x32xf32>
    %762 = arith.addf %757, %761 : vector<2x32xf32>
    %cst_95 = arith.constant 1.000000e+00 : f32
    %763 = vector.broadcast %cst_95 : f32 to vector<2x1xf32>
    %764 = arith.subf %763, %746 : vector<2x1xf32>
    %765 = vector.broadcast %764 : vector<2x1xf32> to vector<2x32xf32>
    %766 = arith.mulf %765, %699 : vector<2x32xf32>
    %767 = arith.addf %750, %766 : vector<2x32xf32>
    %768 = vector.broadcast %746 : vector<2x1xf32> to vector<2x32xf32>
    %769 = arith.mulf %768, %738 : vector<2x32xf32>
    %cst_96 = arith.constant 1.000000e+00 : f32
    %770 = vector.broadcast %cst_96 : f32 to vector<2x1xf32>
    %771 = arith.subf %770, %746 : vector<2x1xf32>
    %772 = vector.broadcast %771 : vector<2x1xf32> to vector<2x32xf32>
    %773 = arith.mulf %772, %706 : vector<2x32xf32>
    %774 = arith.addf %769, %773 : vector<2x32xf32>
    %775 = tpu.concatenate %755, %767 in 1 : vector<2x32xf32>, vector<2x32xf32> -> vector<2x64xf32>
    %cst_97 = arith.constant dense<0.000000e+00> : vector<2x256xf32>
    %776 = tpu.matmul %775, %553, %cst_97 {dimension_numbers = #tpu.dot_dimension_numbers<[1], [0], [0], [1], [0, 0, 1, 1], [], []>} : vector<2x64xf32>, vector<64x256xf32>, vector<2x256xf32> -> vector<2x256xf32>
    %777 = vector.extract_strided_slice %558 {offsets = [6, 0], sizes = [2, 128], strides = [1, 1]} : vector<16x256xf32> to vector<2x128xf32>
    %778 = vector.extract_strided_slice %776 {offsets = [0, 0], sizes = [2, 128], strides = [1, 1]} : vector<2x256xf32> to vector<2x128xf32>
    %779 = arith.addf %777, %778 : vector<2x128xf32>
    %780 = vector.extract_strided_slice %558 {offsets = [8, 128], sizes = [2, 128], strides = [1, 1]} : vector<16x256xf32> to vector<2x128xf32>
    %781 = vector.extract_strided_slice %776 {offsets = [0, 128], sizes = [2, 128], strides = [1, 1]} : vector<2x256xf32> to vector<2x128xf32>
    %782 = arith.addf %780, %781 : vector<2x128xf32>
    %783 = arith.negf %779 : vector<2x128xf32>
    %784 = math.exp %783 : vector<2x128xf32>
    %cst_98 = arith.constant 1.000000e+00 : f32
    %785 = vector.broadcast %cst_98 : f32 to vector<2x128xf32>
    %786 = arith.addf %785, %784 : vector<2x128xf32>
    %787 = arith.divf %785, %786 : vector<2x128xf32>
    %788 = arith.negf %782 : vector<2x128xf32>
    %789 = math.exp %788 : vector<2x128xf32>
    %cst_99 = arith.constant 1.000000e+00 : f32
    %790 = vector.broadcast %cst_99 : f32 to vector<2x128xf32>
    %791 = arith.addf %790, %789 : vector<2x128xf32>
    %792 = arith.divf %790, %791 : vector<2x128xf32>
    %793 = vector.extract_strided_slice %779 {offsets = [0, 64], sizes = [2, 32], strides = [1, 1]} : vector<2x128xf32> to vector<2x32xf32>
    %794 = math.tanh %793 : vector<2x32xf32>
    %795 = vector.extract_strided_slice %782 {offsets = [0, 64], sizes = [2, 32], strides = [1, 1]} : vector<2x128xf32> to vector<2x32xf32>
    %796 = math.tanh %795 : vector<2x32xf32>
    %797 = vector.extract_strided_slice %787 {offsets = [0, 32], sizes = [2, 32], strides = [1, 1]} : vector<2x128xf32> to vector<2x32xf32>
    %798 = arith.mulf %797, %762 : vector<2x32xf32>
    %799 = vector.extract_strided_slice %787 {offsets = [0, 0], sizes = [2, 32], strides = [1, 1]} : vector<2x128xf32> to vector<2x32xf32>
    %800 = arith.mulf %799, %794 : vector<2x32xf32>
    %801 = arith.addf %798, %800 : vector<2x32xf32>
    %802 = vector.extract_strided_slice %792 {offsets = [0, 32], sizes = [2, 32], strides = [1, 1]} : vector<2x128xf32> to vector<2x32xf32>
    %803 = arith.mulf %802, %774 : vector<2x32xf32>
    %804 = vector.extract_strided_slice %792 {offsets = [0, 0], sizes = [2, 32], strides = [1, 1]} : vector<2x128xf32> to vector<2x32xf32>
    %805 = arith.mulf %804, %796 : vector<2x32xf32>
    %806 = arith.addf %803, %805 : vector<2x32xf32>
    %807 = vector.extract_strided_slice %787 {offsets = [0, 96], sizes = [2, 32], strides = [1, 1]} : vector<2x128xf32> to vector<2x32xf32>
    %808 = math.tanh %801 : vector<2x32xf32>
    %809 = arith.mulf %807, %808 : vector<2x32xf32>
    %810 = vector.extract_strided_slice %792 {offsets = [0, 96], sizes = [2, 32], strides = [1, 1]} : vector<2x128xf32> to vector<2x32xf32>
    %811 = math.tanh %806 : vector<2x32xf32>
    %812 = arith.mulf %810, %811 : vector<2x32xf32>
    %813 = vector.extract_strided_slice %0 {offsets = [6, 0], sizes = [2, 1], strides = [1, 1]} : vector<16x1xf32> to vector<2x1xf32>
    %814 = vector.extract_strided_slice %0 {offsets = [8, 0], sizes = [2, 1], strides = [1, 1]} : vector<16x1xf32> to vector<2x1xf32>
    %815 = vector.broadcast %813 : vector<2x1xf32> to vector<2x32xf32>
    %816 = arith.mulf %815, %809 : vector<2x32xf32>
    %817 = vector.broadcast %814 : vector<2x1xf32> to vector<2x32xf32>
    %818 = arith.mulf %817, %812 : vector<2x32xf32>
    %cst_100 = arith.constant 1.000000e+00 : f32
    %819 = vector.broadcast %cst_100 : f32 to vector<2x1xf32>
    %820 = arith.subf %819, %813 : vector<2x1xf32>
    %821 = vector.broadcast %820 : vector<2x1xf32> to vector<2x32xf32>
    %822 = arith.mulf %821, %755 : vector<2x32xf32>
    %823 = arith.addf %816, %822 : vector<2x32xf32>
    %824 = vector.broadcast %813 : vector<2x1xf32> to vector<2x32xf32>
    %825 = arith.mulf %824, %801 : vector<2x32xf32>
    %cst_101 = arith.constant 1.000000e+00 : f32
    %826 = vector.broadcast %cst_101 : f32 to vector<2x1xf32>
    %827 = arith.subf %826, %813 : vector<2x1xf32>
    %828 = vector.broadcast %827 : vector<2x1xf32> to vector<2x32xf32>
    %829 = arith.mulf %828, %762 : vector<2x32xf32>
    %830 = arith.addf %825, %829 : vector<2x32xf32>
    %cst_102 = arith.constant 1.000000e+00 : f32
    %831 = vector.broadcast %cst_102 : f32 to vector<2x1xf32>
    %832 = arith.subf %831, %814 : vector<2x1xf32>
    %833 = vector.broadcast %832 : vector<2x1xf32> to vector<2x32xf32>
    %834 = arith.mulf %833, %767 : vector<2x32xf32>
    %835 = arith.addf %818, %834 : vector<2x32xf32>
    %836 = vector.broadcast %814 : vector<2x1xf32> to vector<2x32xf32>
    %837 = arith.mulf %836, %806 : vector<2x32xf32>
    %cst_103 = arith.constant 1.000000e+00 : f32
    %838 = vector.broadcast %cst_103 : f32 to vector<2x1xf32>
    %839 = arith.subf %838, %814 : vector<2x1xf32>
    %840 = vector.broadcast %839 : vector<2x1xf32> to vector<2x32xf32>
    %841 = arith.mulf %840, %774 : vector<2x32xf32>
    %842 = arith.addf %837, %841 : vector<2x32xf32>
    %843 = tpu.concatenate %823, %835 in 1 : vector<2x32xf32>, vector<2x32xf32> -> vector<2x64xf32>
    %cst_104 = arith.constant dense<0.000000e+00> : vector<2x256xf32>
    %844 = tpu.matmul %843, %553, %cst_104 {dimension_numbers = #tpu.dot_dimension_numbers<[1], [0], [0], [1], [0, 0, 1, 1], [], []>} : vector<2x64xf32>, vector<64x256xf32>, vector<2x256xf32> -> vector<2x256xf32>
    %845 = vector.extract_strided_slice %558 {offsets = [8, 0], sizes = [2, 128], strides = [1, 1]} : vector<16x256xf32> to vector<2x128xf32>
    %846 = vector.extract_strided_slice %844 {offsets = [0, 0], sizes = [2, 128], strides = [1, 1]} : vector<2x256xf32> to vector<2x128xf32>
    %847 = arith.addf %845, %846 : vector<2x128xf32>
    %848 = vector.extract_strided_slice %558 {offsets = [6, 128], sizes = [2, 128], strides = [1, 1]} : vector<16x256xf32> to vector<2x128xf32>
    %849 = vector.extract_strided_slice %844 {offsets = [0, 128], sizes = [2, 128], strides = [1, 1]} : vector<2x256xf32> to vector<2x128xf32>
    %850 = arith.addf %848, %849 : vector<2x128xf32>
    %851 = arith.negf %847 : vector<2x128xf32>
    %852 = math.exp %851 : vector<2x128xf32>
    %cst_105 = arith.constant 1.000000e+00 : f32
    %853 = vector.broadcast %cst_105 : f32 to vector<2x128xf32>
    %854 = arith.addf %853, %852 : vector<2x128xf32>
    %855 = arith.divf %853, %854 : vector<2x128xf32>
    %856 = arith.negf %850 : vector<2x128xf32>
    %857 = math.exp %856 : vector<2x128xf32>
    %cst_106 = arith.constant 1.000000e+00 : f32
    %858 = vector.broadcast %cst_106 : f32 to vector<2x128xf32>
    %859 = arith.addf %858, %857 : vector<2x128xf32>
    %860 = arith.divf %858, %859 : vector<2x128xf32>
    %861 = vector.extract_strided_slice %847 {offsets = [0, 64], sizes = [2, 32], strides = [1, 1]} : vector<2x128xf32> to vector<2x32xf32>
    %862 = math.tanh %861 : vector<2x32xf32>
    %863 = vector.extract_strided_slice %850 {offsets = [0, 64], sizes = [2, 32], strides = [1, 1]} : vector<2x128xf32> to vector<2x32xf32>
    %864 = math.tanh %863 : vector<2x32xf32>
    %865 = vector.extract_strided_slice %855 {offsets = [0, 32], sizes = [2, 32], strides = [1, 1]} : vector<2x128xf32> to vector<2x32xf32>
    %866 = arith.mulf %865, %830 : vector<2x32xf32>
    %867 = vector.extract_strided_slice %855 {offsets = [0, 0], sizes = [2, 32], strides = [1, 1]} : vector<2x128xf32> to vector<2x32xf32>
    %868 = arith.mulf %867, %862 : vector<2x32xf32>
    %869 = arith.addf %866, %868 : vector<2x32xf32>
    %870 = vector.extract_strided_slice %860 {offsets = [0, 32], sizes = [2, 32], strides = [1, 1]} : vector<2x128xf32> to vector<2x32xf32>
    %871 = arith.mulf %870, %842 : vector<2x32xf32>
    %872 = vector.extract_strided_slice %860 {offsets = [0, 0], sizes = [2, 32], strides = [1, 1]} : vector<2x128xf32> to vector<2x32xf32>
    %873 = arith.mulf %872, %864 : vector<2x32xf32>
    %874 = arith.addf %871, %873 : vector<2x32xf32>
    %875 = vector.extract_strided_slice %855 {offsets = [0, 96], sizes = [2, 32], strides = [1, 1]} : vector<2x128xf32> to vector<2x32xf32>
    %876 = math.tanh %869 : vector<2x32xf32>
    %877 = arith.mulf %875, %876 : vector<2x32xf32>
    %878 = vector.extract_strided_slice %860 {offsets = [0, 96], sizes = [2, 32], strides = [1, 1]} : vector<2x128xf32> to vector<2x32xf32>
    %879 = math.tanh %874 : vector<2x32xf32>
    %880 = arith.mulf %878, %879 : vector<2x32xf32>
    %881 = vector.extract_strided_slice %0 {offsets = [8, 0], sizes = [2, 1], strides = [1, 1]} : vector<16x1xf32> to vector<2x1xf32>
    %882 = vector.extract_strided_slice %0 {offsets = [6, 0], sizes = [2, 1], strides = [1, 1]} : vector<16x1xf32> to vector<2x1xf32>
    %883 = vector.broadcast %881 : vector<2x1xf32> to vector<2x32xf32>
    %884 = arith.mulf %883, %877 : vector<2x32xf32>
    %885 = vector.broadcast %882 : vector<2x1xf32> to vector<2x32xf32>
    %886 = arith.mulf %885, %880 : vector<2x32xf32>
    %cst_107 = arith.constant 1.000000e+00 : f32
    %887 = vector.broadcast %cst_107 : f32 to vector<2x1xf32>
    %888 = arith.subf %887, %881 : vector<2x1xf32>
    %889 = vector.broadcast %888 : vector<2x1xf32> to vector<2x32xf32>
    %890 = arith.mulf %889, %823 : vector<2x32xf32>
    %891 = arith.addf %884, %890 : vector<2x32xf32>
    %892 = vector.broadcast %881 : vector<2x1xf32> to vector<2x32xf32>
    %893 = arith.mulf %892, %869 : vector<2x32xf32>
    %cst_108 = arith.constant 1.000000e+00 : f32
    %894 = vector.broadcast %cst_108 : f32 to vector<2x1xf32>
    %895 = arith.subf %894, %881 : vector<2x1xf32>
    %896 = vector.broadcast %895 : vector<2x1xf32> to vector<2x32xf32>
    %897 = arith.mulf %896, %830 : vector<2x32xf32>
    %898 = arith.addf %893, %897 : vector<2x32xf32>
    %cst_109 = arith.constant 1.000000e+00 : f32
    %899 = vector.broadcast %cst_109 : f32 to vector<2x1xf32>
    %900 = arith.subf %899, %882 : vector<2x1xf32>
    %901 = vector.broadcast %900 : vector<2x1xf32> to vector<2x32xf32>
    %902 = arith.mulf %901, %835 : vector<2x32xf32>
    %903 = arith.addf %886, %902 : vector<2x32xf32>
    %904 = vector.broadcast %882 : vector<2x1xf32> to vector<2x32xf32>
    %905 = arith.mulf %904, %874 : vector<2x32xf32>
    %cst_110 = arith.constant 1.000000e+00 : f32
    %906 = vector.broadcast %cst_110 : f32 to vector<2x1xf32>
    %907 = arith.subf %906, %882 : vector<2x1xf32>
    %908 = vector.broadcast %907 : vector<2x1xf32> to vector<2x32xf32>
    %909 = arith.mulf %908, %842 : vector<2x32xf32>
    %910 = arith.addf %905, %909 : vector<2x32xf32>
    %911 = tpu.concatenate %891, %903 in 1 : vector<2x32xf32>, vector<2x32xf32> -> vector<2x64xf32>
    %cst_111 = arith.constant dense<0.000000e+00> : vector<2x256xf32>
    %912 = tpu.matmul %911, %553, %cst_111 {dimension_numbers = #tpu.dot_dimension_numbers<[1], [0], [0], [1], [0, 0, 1, 1], [], []>} : vector<2x64xf32>, vector<64x256xf32>, vector<2x256xf32> -> vector<2x256xf32>
    %913 = vector.extract_strided_slice %558 {offsets = [10, 0], sizes = [2, 128], strides = [1, 1]} : vector<16x256xf32> to vector<2x128xf32>
    %914 = vector.extract_strided_slice %912 {offsets = [0, 0], sizes = [2, 128], strides = [1, 1]} : vector<2x256xf32> to vector<2x128xf32>
    %915 = arith.addf %913, %914 : vector<2x128xf32>
    %916 = vector.extract_strided_slice %558 {offsets = [4, 128], sizes = [2, 128], strides = [1, 1]} : vector<16x256xf32> to vector<2x128xf32>
    %917 = vector.extract_strided_slice %912 {offsets = [0, 128], sizes = [2, 128], strides = [1, 1]} : vector<2x256xf32> to vector<2x128xf32>
    %918 = arith.addf %916, %917 : vector<2x128xf32>
    %919 = arith.negf %915 : vector<2x128xf32>
    %920 = math.exp %919 : vector<2x128xf32>
    %cst_112 = arith.constant 1.000000e+00 : f32
    %921 = vector.broadcast %cst_112 : f32 to vector<2x128xf32>
    %922 = arith.addf %921, %920 : vector<2x128xf32>
    %923 = arith.divf %921, %922 : vector<2x128xf32>
    %924 = arith.negf %918 : vector<2x128xf32>
    %925 = math.exp %924 : vector<2x128xf32>
    %cst_113 = arith.constant 1.000000e+00 : f32
    %926 = vector.broadcast %cst_113 : f32 to vector<2x128xf32>
    %927 = arith.addf %926, %925 : vector<2x128xf32>
    %928 = arith.divf %926, %927 : vector<2x128xf32>
    %929 = vector.extract_strided_slice %915 {offsets = [0, 64], sizes = [2, 32], strides = [1, 1]} : vector<2x128xf32> to vector<2x32xf32>
    %930 = math.tanh %929 : vector<2x32xf32>
    %931 = vector.extract_strided_slice %918 {offsets = [0, 64], sizes = [2, 32], strides = [1, 1]} : vector<2x128xf32> to vector<2x32xf32>
    %932 = math.tanh %931 : vector<2x32xf32>
    %933 = vector.extract_strided_slice %923 {offsets = [0, 32], sizes = [2, 32], strides = [1, 1]} : vector<2x128xf32> to vector<2x32xf32>
    %934 = arith.mulf %933, %898 : vector<2x32xf32>
    %935 = vector.extract_strided_slice %923 {offsets = [0, 0], sizes = [2, 32], strides = [1, 1]} : vector<2x128xf32> to vector<2x32xf32>
    %936 = arith.mulf %935, %930 : vector<2x32xf32>
    %937 = arith.addf %934, %936 : vector<2x32xf32>
    %938 = vector.extract_strided_slice %928 {offsets = [0, 32], sizes = [2, 32], strides = [1, 1]} : vector<2x128xf32> to vector<2x32xf32>
    %939 = arith.mulf %938, %910 : vector<2x32xf32>
    %940 = vector.extract_strided_slice %928 {offsets = [0, 0], sizes = [2, 32], strides = [1, 1]} : vector<2x128xf32> to vector<2x32xf32>
    %941 = arith.mulf %940, %932 : vector<2x32xf32>
    %942 = arith.addf %939, %941 : vector<2x32xf32>
    %943 = vector.extract_strided_slice %923 {offsets = [0, 96], sizes = [2, 32], strides = [1, 1]} : vector<2x128xf32> to vector<2x32xf32>
    %944 = math.tanh %937 : vector<2x32xf32>
    %945 = arith.mulf %943, %944 : vector<2x32xf32>
    %946 = vector.extract_strided_slice %928 {offsets = [0, 96], sizes = [2, 32], strides = [1, 1]} : vector<2x128xf32> to vector<2x32xf32>
    %947 = math.tanh %942 : vector<2x32xf32>
    %948 = arith.mulf %946, %947 : vector<2x32xf32>
    %949 = vector.extract_strided_slice %0 {offsets = [10, 0], sizes = [2, 1], strides = [1, 1]} : vector<16x1xf32> to vector<2x1xf32>
    %950 = vector.extract_strided_slice %0 {offsets = [4, 0], sizes = [2, 1], strides = [1, 1]} : vector<16x1xf32> to vector<2x1xf32>
    %951 = vector.broadcast %949 : vector<2x1xf32> to vector<2x32xf32>
    %952 = arith.mulf %951, %945 : vector<2x32xf32>
    %953 = vector.broadcast %950 : vector<2x1xf32> to vector<2x32xf32>
    %954 = arith.mulf %953, %948 : vector<2x32xf32>
    %cst_114 = arith.constant 1.000000e+00 : f32
    %955 = vector.broadcast %cst_114 : f32 to vector<2x1xf32>
    %956 = arith.subf %955, %949 : vector<2x1xf32>
    %957 = vector.broadcast %956 : vector<2x1xf32> to vector<2x32xf32>
    %958 = arith.mulf %957, %891 : vector<2x32xf32>
    %959 = arith.addf %952, %958 : vector<2x32xf32>
    %960 = vector.broadcast %949 : vector<2x1xf32> to vector<2x32xf32>
    %961 = arith.mulf %960, %937 : vector<2x32xf32>
    %cst_115 = arith.constant 1.000000e+00 : f32
    %962 = vector.broadcast %cst_115 : f32 to vector<2x1xf32>
    %963 = arith.subf %962, %949 : vector<2x1xf32>
    %964 = vector.broadcast %963 : vector<2x1xf32> to vector<2x32xf32>
    %965 = arith.mulf %964, %898 : vector<2x32xf32>
    %966 = arith.addf %961, %965 : vector<2x32xf32>
    %cst_116 = arith.constant 1.000000e+00 : f32
    %967 = vector.broadcast %cst_116 : f32 to vector<2x1xf32>
    %968 = arith.subf %967, %950 : vector<2x1xf32>
    %969 = vector.broadcast %968 : vector<2x1xf32> to vector<2x32xf32>
    %970 = arith.mulf %969, %903 : vector<2x32xf32>
    %971 = arith.addf %954, %970 : vector<2x32xf32>
    %972 = vector.broadcast %950 : vector<2x1xf32> to vector<2x32xf32>
    %973 = arith.mulf %972, %942 : vector<2x32xf32>
    %cst_117 = arith.constant 1.000000e+00 : f32
    %974 = vector.broadcast %cst_117 : f32 to vector<2x1xf32>
    %975 = arith.subf %974, %950 : vector<2x1xf32>
    %976 = vector.broadcast %975 : vector<2x1xf32> to vector<2x32xf32>
    %977 = arith.mulf %976, %910 : vector<2x32xf32>
    %978 = arith.addf %973, %977 : vector<2x32xf32>
    %979 = tpu.concatenate %959, %971 in 1 : vector<2x32xf32>, vector<2x32xf32> -> vector<2x64xf32>
    %cst_118 = arith.constant dense<0.000000e+00> : vector<2x256xf32>
    %980 = tpu.matmul %979, %553, %cst_118 {dimension_numbers = #tpu.dot_dimension_numbers<[1], [0], [0], [1], [0, 0, 1, 1], [], []>} : vector<2x64xf32>, vector<64x256xf32>, vector<2x256xf32> -> vector<2x256xf32>
    %981 = vector.extract_strided_slice %558 {offsets = [12, 0], sizes = [2, 128], strides = [1, 1]} : vector<16x256xf32> to vector<2x128xf32>
    %982 = vector.extract_strided_slice %980 {offsets = [0, 0], sizes = [2, 128], strides = [1, 1]} : vector<2x256xf32> to vector<2x128xf32>
    %983 = arith.addf %981, %982 : vector<2x128xf32>
    %984 = vector.extract_strided_slice %558 {offsets = [2, 128], sizes = [2, 128], strides = [1, 1]} : vector<16x256xf32> to vector<2x128xf32>
    %985 = vector.extract_strided_slice %980 {offsets = [0, 128], sizes = [2, 128], strides = [1, 1]} : vector<2x256xf32> to vector<2x128xf32>
    %986 = arith.addf %984, %985 : vector<2x128xf32>
    %987 = arith.negf %983 : vector<2x128xf32>
    %988 = math.exp %987 : vector<2x128xf32>
    %cst_119 = arith.constant 1.000000e+00 : f32
    %989 = vector.broadcast %cst_119 : f32 to vector<2x128xf32>
    %990 = arith.addf %989, %988 : vector<2x128xf32>
    %991 = arith.divf %989, %990 : vector<2x128xf32>
    %992 = arith.negf %986 : vector<2x128xf32>
    %993 = math.exp %992 : vector<2x128xf32>
    %cst_120 = arith.constant 1.000000e+00 : f32
    %994 = vector.broadcast %cst_120 : f32 to vector<2x128xf32>
    %995 = arith.addf %994, %993 : vector<2x128xf32>
    %996 = arith.divf %994, %995 : vector<2x128xf32>
    %997 = vector.extract_strided_slice %983 {offsets = [0, 64], sizes = [2, 32], strides = [1, 1]} : vector<2x128xf32> to vector<2x32xf32>
    %998 = math.tanh %997 : vector<2x32xf32>
    %999 = vector.extract_strided_slice %986 {offsets = [0, 64], sizes = [2, 32], strides = [1, 1]} : vector<2x128xf32> to vector<2x32xf32>
    %1000 = math.tanh %999 : vector<2x32xf32>
    %1001 = vector.extract_strided_slice %991 {offsets = [0, 32], sizes = [2, 32], strides = [1, 1]} : vector<2x128xf32> to vector<2x32xf32>
    %1002 = arith.mulf %1001, %966 : vector<2x32xf32>
    %1003 = vector.extract_strided_slice %991 {offsets = [0, 0], sizes = [2, 32], strides = [1, 1]} : vector<2x128xf32> to vector<2x32xf32>
    %1004 = arith.mulf %1003, %998 : vector<2x32xf32>
    %1005 = arith.addf %1002, %1004 : vector<2x32xf32>
    %1006 = vector.extract_strided_slice %996 {offsets = [0, 32], sizes = [2, 32], strides = [1, 1]} : vector<2x128xf32> to vector<2x32xf32>
    %1007 = arith.mulf %1006, %978 : vector<2x32xf32>
    %1008 = vector.extract_strided_slice %996 {offsets = [0, 0], sizes = [2, 32], strides = [1, 1]} : vector<2x128xf32> to vector<2x32xf32>
    %1009 = arith.mulf %1008, %1000 : vector<2x32xf32>
    %1010 = arith.addf %1007, %1009 : vector<2x32xf32>
    %1011 = vector.extract_strided_slice %991 {offsets = [0, 96], sizes = [2, 32], strides = [1, 1]} : vector<2x128xf32> to vector<2x32xf32>
    %1012 = math.tanh %1005 : vector<2x32xf32>
    %1013 = arith.mulf %1011, %1012 : vector<2x32xf32>
    %1014 = vector.extract_strided_slice %996 {offsets = [0, 96], sizes = [2, 32], strides = [1, 1]} : vector<2x128xf32> to vector<2x32xf32>
    %1015 = math.tanh %1010 : vector<2x32xf32>
    %1016 = arith.mulf %1014, %1015 : vector<2x32xf32>
    %1017 = vector.extract_strided_slice %0 {offsets = [12, 0], sizes = [2, 1], strides = [1, 1]} : vector<16x1xf32> to vector<2x1xf32>
    %1018 = vector.extract_strided_slice %0 {offsets = [2, 0], sizes = [2, 1], strides = [1, 1]} : vector<16x1xf32> to vector<2x1xf32>
    %1019 = vector.broadcast %1017 : vector<2x1xf32> to vector<2x32xf32>
    %1020 = arith.mulf %1019, %1013 : vector<2x32xf32>
    %1021 = vector.broadcast %1018 : vector<2x1xf32> to vector<2x32xf32>
    %1022 = arith.mulf %1021, %1016 : vector<2x32xf32>
    %cst_121 = arith.constant 1.000000e+00 : f32
    %1023 = vector.broadcast %cst_121 : f32 to vector<2x1xf32>
    %1024 = arith.subf %1023, %1017 : vector<2x1xf32>
    %1025 = vector.broadcast %1024 : vector<2x1xf32> to vector<2x32xf32>
    %1026 = arith.mulf %1025, %959 : vector<2x32xf32>
    %1027 = arith.addf %1020, %1026 : vector<2x32xf32>
    %1028 = vector.broadcast %1017 : vector<2x1xf32> to vector<2x32xf32>
    %1029 = arith.mulf %1028, %1005 : vector<2x32xf32>
    %cst_122 = arith.constant 1.000000e+00 : f32
    %1030 = vector.broadcast %cst_122 : f32 to vector<2x1xf32>
    %1031 = arith.subf %1030, %1017 : vector<2x1xf32>
    %1032 = vector.broadcast %1031 : vector<2x1xf32> to vector<2x32xf32>
    %1033 = arith.mulf %1032, %966 : vector<2x32xf32>
    %1034 = arith.addf %1029, %1033 : vector<2x32xf32>
    %cst_123 = arith.constant 1.000000e+00 : f32
    %1035 = vector.broadcast %cst_123 : f32 to vector<2x1xf32>
    %1036 = arith.subf %1035, %1018 : vector<2x1xf32>
    %1037 = vector.broadcast %1036 : vector<2x1xf32> to vector<2x32xf32>
    %1038 = arith.mulf %1037, %971 : vector<2x32xf32>
    %1039 = arith.addf %1022, %1038 : vector<2x32xf32>
    %1040 = vector.broadcast %1018 : vector<2x1xf32> to vector<2x32xf32>
    %1041 = arith.mulf %1040, %1010 : vector<2x32xf32>
    %cst_124 = arith.constant 1.000000e+00 : f32
    %1042 = vector.broadcast %cst_124 : f32 to vector<2x1xf32>
    %1043 = arith.subf %1042, %1018 : vector<2x1xf32>
    %1044 = vector.broadcast %1043 : vector<2x1xf32> to vector<2x32xf32>
    %1045 = arith.mulf %1044, %978 : vector<2x32xf32>
    %1046 = arith.addf %1041, %1045 : vector<2x32xf32>
    %1047 = tpu.concatenate %1027, %1039 in 1 : vector<2x32xf32>, vector<2x32xf32> -> vector<2x64xf32>
    %cst_125 = arith.constant dense<0.000000e+00> : vector<2x256xf32>
    %1048 = tpu.matmul %1047, %553, %cst_125 {dimension_numbers = #tpu.dot_dimension_numbers<[1], [0], [0], [1], [0, 0, 1, 1], [], []>} : vector<2x64xf32>, vector<64x256xf32>, vector<2x256xf32> -> vector<2x256xf32>
    %1049 = vector.extract_strided_slice %558 {offsets = [14, 0], sizes = [2, 128], strides = [1, 1]} : vector<16x256xf32> to vector<2x128xf32>
    %1050 = vector.extract_strided_slice %1048 {offsets = [0, 0], sizes = [2, 128], strides = [1, 1]} : vector<2x256xf32> to vector<2x128xf32>
    %1051 = arith.addf %1049, %1050 : vector<2x128xf32>
    %1052 = vector.extract_strided_slice %558 {offsets = [0, 128], sizes = [2, 128], strides = [1, 1]} : vector<16x256xf32> to vector<2x128xf32>
    %1053 = vector.extract_strided_slice %1048 {offsets = [0, 128], sizes = [2, 128], strides = [1, 1]} : vector<2x256xf32> to vector<2x128xf32>
    %1054 = arith.addf %1052, %1053 : vector<2x128xf32>
    %1055 = arith.negf %1051 : vector<2x128xf32>
    %1056 = math.exp %1055 : vector<2x128xf32>
    %cst_126 = arith.constant 1.000000e+00 : f32
    %1057 = vector.broadcast %cst_126 : f32 to vector<2x128xf32>
    %1058 = arith.addf %1057, %1056 : vector<2x128xf32>
    %1059 = arith.divf %1057, %1058 : vector<2x128xf32>
    %1060 = arith.negf %1054 : vector<2x128xf32>
    %1061 = math.exp %1060 : vector<2x128xf32>
    %cst_127 = arith.constant 1.000000e+00 : f32
    %1062 = vector.broadcast %cst_127 : f32 to vector<2x128xf32>
    %1063 = arith.addf %1062, %1061 : vector<2x128xf32>
    %1064 = arith.divf %1062, %1063 : vector<2x128xf32>
    %1065 = vector.extract_strided_slice %1051 {offsets = [0, 64], sizes = [2, 32], strides = [1, 1]} : vector<2x128xf32> to vector<2x32xf32>
    %1066 = math.tanh %1065 : vector<2x32xf32>
    %1067 = vector.extract_strided_slice %1054 {offsets = [0, 64], sizes = [2, 32], strides = [1, 1]} : vector<2x128xf32> to vector<2x32xf32>
    %1068 = math.tanh %1067 : vector<2x32xf32>
    %1069 = vector.extract_strided_slice %1059 {offsets = [0, 32], sizes = [2, 32], strides = [1, 1]} : vector<2x128xf32> to vector<2x32xf32>
    %1070 = arith.mulf %1069, %1034 : vector<2x32xf32>
    %1071 = vector.extract_strided_slice %1059 {offsets = [0, 0], sizes = [2, 32], strides = [1, 1]} : vector<2x128xf32> to vector<2x32xf32>
    %1072 = arith.mulf %1071, %1066 : vector<2x32xf32>
    %1073 = arith.addf %1070, %1072 : vector<2x32xf32>
    %1074 = vector.extract_strided_slice %1064 {offsets = [0, 32], sizes = [2, 32], strides = [1, 1]} : vector<2x128xf32> to vector<2x32xf32>
    %1075 = arith.mulf %1074, %1046 : vector<2x32xf32>
    %1076 = vector.extract_strided_slice %1064 {offsets = [0, 0], sizes = [2, 32], strides = [1, 1]} : vector<2x128xf32> to vector<2x32xf32>
    %1077 = arith.mulf %1076, %1068 : vector<2x32xf32>
    %1078 = arith.addf %1075, %1077 : vector<2x32xf32>
    %1079 = vector.extract_strided_slice %1059 {offsets = [0, 96], sizes = [2, 32], strides = [1, 1]} : vector<2x128xf32> to vector<2x32xf32>
    %1080 = math.tanh %1073 : vector<2x32xf32>
    %1081 = arith.mulf %1079, %1080 : vector<2x32xf32>
    %1082 = vector.extract_strided_slice %1064 {offsets = [0, 96], sizes = [2, 32], strides = [1, 1]} : vector<2x128xf32> to vector<2x32xf32>
    %1083 = math.tanh %1078 : vector<2x32xf32>
    %1084 = arith.mulf %1082, %1083 : vector<2x32xf32>
    %1085 = vector.extract_strided_slice %0 {offsets = [14, 0], sizes = [2, 1], strides = [1, 1]} : vector<16x1xf32> to vector<2x1xf32>
    %1086 = vector.extract_strided_slice %0 {offsets = [0, 0], sizes = [2, 1], strides = [1, 1]} : vector<16x1xf32> to vector<2x1xf32>
    %1087 = vector.broadcast %1085 : vector<2x1xf32> to vector<2x32xf32>
    %1088 = arith.mulf %1087, %1081 : vector<2x32xf32>
    %1089 = vector.broadcast %1086 : vector<2x1xf32> to vector<2x32xf32>
    %1090 = arith.mulf %1089, %1084 : vector<2x32xf32>
    %1091 = tpu.concatenate %612, %1090 in 1 : vector<2x32xf32>, vector<2x32xf32> -> vector<2x64xf32>
    %1092 = tpu.concatenate %680, %1022 in 1 : vector<2x32xf32>, vector<2x32xf32> -> vector<2x64xf32>
    %1093 = tpu.concatenate %748, %954 in 1 : vector<2x32xf32>, vector<2x32xf32> -> vector<2x64xf32>
    %1094 = tpu.concatenate %816, %886 in 1 : vector<2x32xf32>, vector<2x32xf32> -> vector<2x64xf32>
    %1095 = tpu.concatenate %884, %818 in 1 : vector<2x32xf32>, vector<2x32xf32> -> vector<2x64xf32>
    %1096 = tpu.concatenate %952, %750 in 1 : vector<2x32xf32>, vector<2x32xf32> -> vector<2x64xf32>
    %1097 = tpu.concatenate %1020, %682 in 1 : vector<2x32xf32>, vector<2x32xf32> -> vector<2x64xf32>
    %1098 = tpu.concatenate %1088, %614 in 1 : vector<2x32xf32>, vector<2x32xf32> -> vector<2x64xf32>
    %1099 = vector.extract_strided_slice %1091 {offsets = [0, 0], sizes = [1, 64], strides = [1, 1]} : vector<2x64xf32> to vector<1x64xf32>
    %1100 = vector.extract_strided_slice %1092 {offsets = [0, 0], sizes = [1, 64], strides = [1, 1]} : vector<2x64xf32> to vector<1x64xf32>
    %1101 = vector.extract_strided_slice %1093 {offsets = [0, 0], sizes = [1, 64], strides = [1, 1]} : vector<2x64xf32> to vector<1x64xf32>
    %1102 = vector.extract_strided_slice %1094 {offsets = [0, 0], sizes = [1, 64], strides = [1, 1]} : vector<2x64xf32> to vector<1x64xf32>
    %1103 = vector.extract_strided_slice %1095 {offsets = [0, 0], sizes = [1, 64], strides = [1, 1]} : vector<2x64xf32> to vector<1x64xf32>
    %1104 = vector.extract_strided_slice %1096 {offsets = [0, 0], sizes = [1, 64], strides = [1, 1]} : vector<2x64xf32> to vector<1x64xf32>
    %1105 = vector.extract_strided_slice %1097 {offsets = [0, 0], sizes = [1, 64], strides = [1, 1]} : vector<2x64xf32> to vector<1x64xf32>
    %1106 = vector.extract_strided_slice %1098 {offsets = [0, 0], sizes = [1, 64], strides = [1, 1]} : vector<2x64xf32> to vector<1x64xf32>
    %1107 = tpu.concatenate %1099, %1100, %1101, %1102, %1103, %1104, %1105, %1106 in 0 : vector<1x64xf32>, vector<1x64xf32>, vector<1x64xf32>, vector<1x64xf32>, vector<1x64xf32>, vector<1x64xf32>, vector<1x64xf32>, vector<1x64xf32> -> vector<8x64xf32>
    %c0_128 = arith.constant 0 : index
    %c0_129 = arith.constant 0 : index
    %c0_130 = arith.constant 0 : index
    %1108 = vector.load %arg12[%c0_128, %c0_129, %c0_130] : memref<2x8x64xf32, #tpu.memory_space<vmem>>, vector<1x8x64xf32>
    %1109 = vector.shape_cast %1108 : vector<1x8x64xf32> to vector<8x64xf32>
    %1110 = vector.shape_cast %1107 : vector<8x64xf32> to vector<1x8x64xf32>
    tpu.vector_store %arg12[%c0_128, %c0_129, %c0_130], %1110 {strides = array<i32>} : memref<2x8x64xf32, #tpu.memory_space<vmem>>, vector<1x8x64xf32>,
    %1111 = vector.extract_strided_slice %1091 {offsets = [1, 0], sizes = [1, 64], strides = [1, 1]} : vector<2x64xf32> to vector<1x64xf32>
    %1112 = vector.extract_strided_slice %1092 {offsets = [1, 0], sizes = [1, 64], strides = [1, 1]} : vector<2x64xf32> to vector<1x64xf32>
    %1113 = vector.extract_strided_slice %1093 {offsets = [1, 0], sizes = [1, 64], strides = [1, 1]} : vector<2x64xf32> to vector<1x64xf32>
    %1114 = vector.extract_strided_slice %1094 {offsets = [1, 0], sizes = [1, 64], strides = [1, 1]} : vector<2x64xf32> to vector<1x64xf32>
    %1115 = vector.extract_strided_slice %1095 {offsets = [1, 0], sizes = [1, 64], strides = [1, 1]} : vector<2x64xf32> to vector<1x64xf32>
    %1116 = vector.extract_strided_slice %1096 {offsets = [1, 0], sizes = [1, 64], strides = [1, 1]} : vector<2x64xf32> to vector<1x64xf32>
    %1117 = vector.extract_strided_slice %1097 {offsets = [1, 0], sizes = [1, 64], strides = [1, 1]} : vector<2x64xf32> to vector<1x64xf32>
    %1118 = vector.extract_strided_slice %1098 {offsets = [1, 0], sizes = [1, 64], strides = [1, 1]} : vector<2x64xf32> to vector<1x64xf32>
    %1119 = tpu.concatenate %1111, %1112, %1113, %1114, %1115, %1116, %1117, %1118 in 0 : vector<1x64xf32>, vector<1x64xf32>, vector<1x64xf32>, vector<1x64xf32>, vector<1x64xf32>, vector<1x64xf32>, vector<1x64xf32>, vector<1x64xf32> -> vector<8x64xf32>
    %c1 = arith.constant 1 : index
    %c0_131 = arith.constant 0 : index
    %c0_132 = arith.constant 0 : index
    %1120 = vector.load %arg12[%c1, %c0_131, %c0_132] : memref<2x8x64xf32, #tpu.memory_space<vmem>>, vector<1x8x64xf32>
    %1121 = vector.shape_cast %1120 : vector<1x8x64xf32> to vector<8x64xf32>
    %1122 = vector.shape_cast %1119 : vector<8x64xf32> to vector<1x8x64xf32>
    tpu.vector_store %arg12[%c1, %c0_131, %c0_132], %1122 {strides = array<i32>} : memref<2x8x64xf32, #tpu.memory_space<vmem>>, vector<1x8x64xf32>,
    return
  }
}

</mosaic_0001>

<bundles_post_ra>
// kernel: tpu_custom_call.1
= control target key start
LH: loop header
LB: loop body
LE: loop exit
PB: predicated region body
PF: predicated region fallthrough
CT: control target
= control target key end

     0   :  { %17 = vsyncpa [#allocation3], 0  ;;  %s5251_s0 = inlined_call_operand.vmem [shape: f32[16,32], index: 0, kind: input, shape index: {}]   ;;  %s5252_s1 = inlined_call_operand.vmem [shape: f32[16,1], index: 1, kind: input, shape index: {}]   ;;  %s5253_s2 = inlined_call_operand.hbm [shape: f32[32,256], index: 2, kind: input, shape index: {}]   ;;  %s5254_s3 = inlined_call_operand.vmem [shape: f32[1,256], index: 3, kind: input, shape index: {}]   ;;  %s5255_s4 = inlined_call_operand.hbm [shape: f32[64,256], index: 4, kind: input, shape index: {}]   ;;  %s5256_s5 = inlined_call_operand.vmem [shape: f32[1,64], index: 5, kind: input, shape index: {}]   ;;  %s5257_s6 = inlined_call_operand.vmem [shape: f32[1,64], index: 6, kind: input, shape index: {}]   ;;  %s5258_s7 = inlined_call_operand.hbm [shape: f32[64,256], index: 7, kind: input, shape index: {}]   ;;  %s5259_s8 = inlined_call_operand.vmem [shape: f32[1,256], index: 8, kind: input, shape index: {}]   ;;  %s5260_s9 = inlined_call_operand.hbm [shape: f32[64,256], index: 9, kind: input, shape index: {}]   ;;  %s5261_s10 = inlined_call_operand.vmem [shape: f32[1,64], index: 10, kind: input, shape index: {}]   ;;  %s5262_s11 = inlined_call_operand.vmem [shape: f32[1,64], index: 11, kind: input, shape index: {}]   ;;  %s5263_s12 = inlined_call_operand.hbm [shape: f32[2,8,64], index: 12, kind: output, shape index: {}]  }
   0x1   :  { %18 = vsyncpa [#allocation6], 0 }
   0x2   :  { %19 = vsyncpa [#allocation9], 0 }
   0x3   :  { %20 = vsyncpa [#allocation4], 0  ;;  %s3940_s21 = smov [#allocation5]   ;;  %s3941_s23 = smov [#allocation2]  }
   0x4   :  { %s44_s22 = sshll.u32 %s3940_s21, 4  ;;  %s30_s24 = sshll.u32 %s3941_s23, 4  ;;  %s45_s22 = int_to_ptr.vmem [resolvable:$true] %s44_s22  ;;  %s31_s24 = int_to_ptr.vmem [resolvable:$true] %s30_s24 }
   0x5   :  { %s3840_s25 = scalar_lea.vmem %s45_s22, 2048  ;;  %p3845_p1 = scmp.lt.s32.totalorder %s45_s22, %s45_s22 }
   0x6   :  { %p3841_p0 = scmp.ne.s32.totalorder %s45_s22, %s3840_s25  ;;  %p3846_p2 = scmp.lt.s32.totalorder %s3840_s25, %s3840_s25 }
   0x8   :  { %p3847_p3 = por %p3846_p2, %p3845_p1 }
   0xa   :  { %p3848_p4 = pnand %p3847_p3, %p3841_p0 }
   0xc   :  { %3851 = shalt.err (!%p3848_p4)
}
   0xd   :  { %s3942_s26 = smov 256   ;;  %s3943_s27 = smov 16  }
   0xe   :  { %50 = dma.hbm_to_vmem [thread:$0]  %s5255_s4, 2048, %s45_s22, [#allocation6], %s3942_s26, %s3942_s26, %s3943_s27  }
   0xf   :  { %s3860_s30 = scalar_lea.vmem %s31_s24, 1024  ;;  %p3865_p6 = scmp.lt.s32.totalorder %s31_s24, %s31_s24 }
  0x10   :  { %p3861_p5 = scmp.ne.s32.totalorder %s31_s24, %s3860_s30  ;;  %p3866_p7 = scmp.lt.s32.totalorder %s3860_s30, %s3860_s30 }
  0x12   :  { %p3867_p8 = por %p3866_p7, %p3865_p6 }
  0x14   :  { %p3868_p9 = pnand %p3867_p8, %p3861_p5 }
  0x16   :  { %3871 = shalt.err (!%p3868_p9)
}
  0x17   :  { %36 = dma.hbm_to_vmem [thread:$0]  %s5253_s2, 1024, %s31_s24, [#allocation3], %s3942_s26, %s3942_s26, %s3943_s27  }
  0x18   :  { %s3944_s15 = smov [#allocation7]   ;;  %s3945_s17 = smov [#allocation8]  }
  0x19   :  { %s60_s16 = sshll.u32 %s3944_s15, 4  ;;  %s74_s18 = sshll.u32 %s3945_s17, 4  ;;  %s61_s16 = int_to_ptr.vmem [resolvable:$true] %s60_s16  ;;  %s75_s18 = int_to_ptr.vmem [resolvable:$true] %s74_s18 }
  0x1a   :  { %s3880_s4 = scalar_lea.vmem %s61_s16, 2048  ;;  %p3885_p11 = scmp.lt.s32.totalorder %s61_s16, %s61_s16 }
  0x1b   :  { %p3881_p10 = scmp.ne.s32.totalorder %s61_s16, %s3880_s4  ;;  %p3886_p12 = scmp.lt.s32.totalorder %s3880_s4, %s3880_s4 }
  0x1d   :  { %p3887_p13 = por %p3886_p12, %p3885_p11 }
  0x1f   :  { %p3888_p0 = pnand %p3887_p13, %p3881_p10 }
  0x21   :  { %3891 = shalt.err (!%p3888_p0)
}
  0x22   :  { %66 = dma.hbm_to_vmem [thread:$0]  %s5258_s7, 2048, %s61_s16, [#allocation6], %s3942_s26, %s3942_s26, %s3943_s27  }
  0x23   :  { %s3900_s2 = scalar_lea.vmem %s75_s18, 2048  ;;  %p3905_p2 = scmp.lt.s32.totalorder %s75_s18, %s75_s18 }
  0x24   :  { %p3901_p1 = scmp.ne.s32.totalorder %s75_s18, %s3900_s2  ;;  %p3906_p3 = scmp.lt.s32.totalorder %s3900_s2, %s3900_s2 }
  0x26   :  { %p3907_p4 = por %p3906_p3, %p3905_p2 }
  0x28   :  { %p3908_p5 = pnand %p3907_p4, %p3901_p1 }
  0x2a   :  { %3911 = shalt.err (!%p3908_p5)
}
  0x2b   :  { %80 = dma.hbm_to_vmem [thread:$0]  %s5260_s9, 2048, %s75_s18, [#allocation9], %s3942_s26, %s3942_s26, %s3943_s27  }
  0x2c   :  { %3932 = dma.done.wait [#allocation3], 1024  }
  0x2d   :  { %3933 = vsyncadd [#allocation3], 4294966272 }
  0x2e   :  { %3934 = dma.done.wait [#allocation6], 4096  }
  0x2f   :  { %3935 = vsyncadd [#allocation6], 4294963200 }
  0x30   :  { %3936 = dma.done.wait [#allocation9], 2048  }
  0x31   :  { %3937 = vsyncadd [#allocation9], 4294965248  ;;  %v3946_v0 = vmov 0.0   ;;  %v4045_v1 = vld [vmem:[#allocation5 + $0x78] sm:$0xff]  ;;  %v4047_v2 = vld [vmem:[#allocation5 + $0x70] sm:$0xff]  ;;  %vm139_vm0 = vcmask 261120   ;;  %v129_v29 = vlaneseq }
  0x32   :  { %210 = vmatprep.mubr.f32.mxu0 %v3946_v0  ;;  %303 = vmatprep.mubr.f32.mxu1 %v3946_v0  ;;  %v108_v3 = vld [vmem:[#allocation2 + $0x38] sm:$0xff]  ;;  %v4050_v4 = vld [vmem:[#allocation5 + $0x68] sm:$0xff]  ;;  %v107_v5 = vld [vmem:[#allocation2 + $0x30] sm:$0xff]  ;;  %s3947_s27 = smov 32   ;;  %vm235_vm1 = vcmask 523264   ;;  %v3948_v49 = vmov 0  }
  0x33   :  { %255 = vmatprep.subr.mxu1 %v4045_v1  ;;  %170 = vmatprep.subr.mxu0 %v108_v3  ;;  %v4052_v6 = vld [vmem:[#allocation5 + $0x60] sm:$0xff]  ;;  %v106_v7 = vld [vmem:[#allocation2 + $0x28] sm:$0xff]  ;;  %v4055_v8 = vld [vmem:[#allocation5 + $0x58] sm:$0xff]  ;;  %v4152_v30 = vshrl.u32 %v129_v29, 7  ;;  %vm1755_vm2 = vcmask 1043456   ;;  %vm1753_vm3 = vcmask 1041408  }
  0x34   :  { %256 = vmatpush1.msra.mxu1 %v4047_v2  ;;  %171 = vmatpush1.msra.mxu0 %v107_v5  ;;  %v105_v9 = vld [vmem:[#allocation2 + $0x20] sm:$0xff]  ;;  %v4058_v10 = vld [vmem:[#allocation5 + $0x50] sm:$0xff]  ;;  %v104_v11 = vld [vmem:[#allocation2 + $0x18] sm:$0xff]  ;;  %vm1757_vm4 = vcmask 1045504   ;;  %vm3419_vm5 = vcmask 1040384   ;;  %vm3422_vm6 = vcmask 1042432  }
  0x35   :  { %257 = vmatprep.subr.mxu1 %v4050_v4  ;;  %172 = vmatprep.subr.mxu0 %v106_v7  ;;  %v4061_v12 = vld [vmem:[#allocation5 + $0x48] sm:$0xff]  ;;  %v103_v13 = vld [vmem:[#allocation2 + $0x10] sm:$0xff]  ;;  %v4064_v15 = vld [vmem:[#allocation5 + $0x40] sm:$0xff]  ;;  %v135_v31 = vsub.s32 1, %v4152_v30  ;;  %v131_v33 = vsub.s32 0, %v4152_v30  ;;  %vm3425_vm7 = vcmask 1044480  }
  0x36   :  { %258 = vmatpush1.msra.mxu1 %v4052_v6  ;;  %173 = vmatpush1.msra.mxu0 %v105_v9  ;;  %v102_v14 = vld [vmem:[#allocation2 + $0x8] sm:$0xff]  ;;  %v101_v16 = vld [vmem:[#allocation2] sm:$0xff]  ;;  %v4067_v17 = vld [vmem:[#allocation5 + $0x38] sm:$0xff]  ;;  %vm3428_vm8 = vcmask 1046528  }
  0x37   :  { %259 = vmatprep.subr.mxu1 %v4055_v8  ;;  %174 = vmatprep.subr.mxu0 %v104_v11  ;;  %v99_v18 = vld [vmem:[%s5251_s0] sm:$0xff]  ;;  %v4073_v19 = vld [vmem:[#allocation5 + $0x30] sm:$0xff]  ;;  %v4076_v20 = vld [vmem:[#allocation5 + $0x28] sm:$0xff] }
  0x38   :  { %260 = vmatpush1.msra.mxu1 %v4058_v10  ;;  %175 = vmatpush1.msra.mxu0 %v103_v13  ;;  %v4080_v21 = vld [vmem:[#allocation5 + $0x20] sm:$0xff]  ;;  %v4088_v23 = vld [vmem:[#allocation5 + $0x18] sm:$0xff]  ;;  %v100_v24 = vld [vmem:[%s5251_s0 + $0x8] sm:$0xff] }
  0x39   :  { %261 = vmatprep.subr.mxu1 %v4061_v12  ;;  %176 = vmatprep.subr.mxu0 %v102_v14  ;;  %v4085_v22 = vld [vmem:[%s5257_s6] ss:$0 sm:$0xff]  ;;  %v4095_v25 = vld [vmem:[#allocation5 + $0x10] sm:$0xff]  ;;  %v4100_v26 = vld [vmem:[#allocation5 + $0x8] sm:$0xff] }
  0x3a   :  { %262 = vmatpush1.msra.mxu1 %v4064_v15  ;;  %177 = vmatpush1.msra.mxu0 %v101_v16  ;;  %v4105_v27 = vld [vmem:[#allocation5] sm:$0xff]  ;;  %v98_v60 = vld [vmem:[%s5252_s1 + $0x8] sm:$0xff] }
  0x3b   :  { %263 = vmatprep.subr.mxu1 %v4067_v17  ;;  %3474 = vmatmul.mubr.msk.f32.vlgmr.msra.gmra.mxu0 %vm139_vm0, %v99_v18  ;;  %v4111_v28 = vld [vmem:[%s5256_s5] ss:$0 sm:$0xff]  ;;  %v397_v62 = vsub.f32 1.0, %v98_v60 }
  0x3c   :  { %264 = vmatpush1.msra.mxu1 %v4073_v19  ;;  %216 = vmatprep.mubr.f32.mxu0 %v3946_v0  ;;  %v109_v32 = vld [vmem:[%s5254_s3] sm:$0x3]  ;;  %s3949_s3 = smov 64  }
  0x3d   :  { %265 = vmatprep.subr.mxu1 %v4076_v20  ;;  %329 = vrot.lane.b32.xlu1 %v4085_v22, %s3947_s27  ;;  %v136_v34 = vrot.slane %v109_v32, %v135_v31  ;;  %v132_v37 = vrot.slane %v109_v32, %v131_v33  ;;  %v97_v5 = vld [vmem:[%s5252_s1] sm:$0xff]  ;;  %s3950_s1 = smov 96  }
  0x3e   :  { %266 = vmatpush1.msra.mxu1 %v4080_v21  ;;  %441 = vmatprep.subr.mxu0 %v4045_v1  ;;  %v378_v9 = vsub.f32 1.0, %v97_v5 }
  0x3f   :  { %267 = vmatprep.subr.mxu1 %v4088_v23  ;;  %3475 = vmatmul.mubr.msk.f32.gmra.mxu0 %vm139_vm0, %v100_v24 }
  0x40   :  { %268 = vmatpush1.msra.mxu1 %v4095_v25  ;;  %442 = vmatpush1.msra.mxu0 %v4047_v2 }
  0x41   :  { %269 = vmatprep.subr.mxu1 %v4100_v26  ;;  %443 = vmatprep.subr.mxu0 %v4050_v4 }
  0x42   :  { %270 = vmatpush1.msra.mxu1 %v4105_v27  ;;  %444 = vmatpush1.msra.mxu0 %v4052_v6 }
  0x43   :  { %3478 = vmatmul.mubr.msk.f32.vlgmr.msra.gmra.mxu1 %vm235_vm1, %v4111_v28  ;;  %445 = vmatprep.subr.mxu0 %v4055_v8 }
  0x44   :  { %446 = vmatpush1.msra.mxu0 %v4058_v10  ;;  %489 = vmatprep.mubr.f32.mxu0 %v3946_v0 }
  0x45   :  { %447 = vmatprep.subr.mxu0 %v4061_v12  ;;  %630 = vmatprep.subr.mxu1 %v4045_v1 }
  0x46   :  { %448 = vmatpush1.msra.mxu0 %v4064_v15  ;;  %631 = vmatpush1.msra.mxu1 %v4047_v2 }
  0x47   :  { %449 = vmatprep.subr.mxu0 %v4067_v17  ;;  %632 = vmatprep.subr.mxu1 %v4050_v4 }
  0x48   :  { %450 = vmatpush1.msra.mxu0 %v4073_v19  ;;  %633 = vmatpush1.msra.mxu1 %v4052_v6 }
  0x49   :  { %451 = vmatprep.subr.mxu0 %v4076_v20  ;;  %634 = vmatprep.subr.mxu1 %v4055_v8 }
  0x4a   :  { %452 = vmatpush1.msra.mxu0 %v4080_v21  ;;  %635 = vmatpush1.msra.mxu1 %v4058_v10 }
  0x4b   :  { %453 = vmatprep.subr.mxu0 %v4088_v23  ;;  %636 = vmatprep.subr.mxu1 %v4061_v12 }
  0x4c   :  { %454 = vmatpush1.msra.mxu0 %v4095_v25  ;;  %637 = vmatpush1.msra.mxu1 %v4064_v15 }
  0x4d   :  { %455 = vmatprep.subr.mxu0 %v4100_v26  ;;  %638 = vmatprep.subr.mxu1 %v4067_v17 }
  0x4e   :  { %456 = vmatpush1.msra.mxu0 %v4105_v27  ;;  %639 = vmatpush1.msra.mxu1 %v4073_v19 }
  0x4f   :  { %640 = vmatprep.subr.mxu1 %v4076_v20  ;;  %678 = vmatprep.mubr.f32.mxu1 %v3946_v0 }
  0x50   :  { %641 = vmatpush1.msra.mxu1 %v4080_v21  ;;  %818 = vmatprep.subr.mxu0 %v4045_v1 }
  0x51   :  { %642 = vmatprep.subr.mxu1 %v4088_v23  ;;  %3544 = vset.pattern.permute.xlu1 %v3948_v49 }
  0x52   :  { %643 = vmatpush1.msra.mxu1 %v4095_v25  ;;  %3545 = vset.pattern.permute.xlu0 %v3948_v49 }
  0x53   :  { %644 = vmatprep.subr.mxu1 %v4100_v26 }
  0x54   :  { %645 = vmatpush1.msra.mxu1 %v4105_v27 }
  0x55   :  { %1004 = vmatprep.subr.mxu1 %v4045_v1 }
  0xaf   :  { %v330_v11 = vpop.permute.xlu1 %329 }
  0xfb   :  { %v212_v35 = vpop.f32.mrf.mxu0 }
  0xfc   :  { %v4169_v46 = vadd.f32 %v212_v35, %v132_v37 }
  0xfd   :  { %v214_v36 = vpop.f32.mrf.mxu0 }
  0xfe   :  { %v4163_v38 = vadd.f32 %v214_v36, %v136_v34 }
  0xff   :  { %v218_v39 = vpop.f32.mrf.mxu0 }
 0x100   :  { %v4165_v40 = vadd.f32 %v218_v39, %v132_v37 }
 0x101   :  { %v220_v41 = vpop.f32.mrf.mxu0 }
 0x102   :  { %v4167_v44 = vadd.f32 %v220_v41, %v136_v34 }
 0x103   :  { %v305_v42 = vpop.f32.mrf.mxu1 }
 0x104   :  { %v310_v48 = vadd.f32 %v305_v42, %v4169_v46 }
 0x105   :  { %v307_v43 = vpop.f32.mrf.mxu1 }
 0x106   :  { %v312_v45 = vrot.slane %v307_v43, 2  ;;  %v3479_v53 = vmul.f32 -1.442695, %v310_v48 }
 0x108   :  { %v314_v47 = vadd.f32 %v312_v45, %v4167_v44 }
 0x10a   :  { %3546 = vtanh.f32 %v314_v47  ;;  %v3480_v52 = vmul.f32 -1.442695, %v314_v47 }
 0x10b   :  { %3548 = vtanh.f32 %v310_v48 }
 0x10c   :  { %3550 = vpow2.f32 %v3480_v52 }
 0x10d   :  { %3552 = vpow2.f32 %v3479_v53 }
 0x117   :  { %v3547_v50 = vpop.eup %3546 }
 0x118   :  { %345 = vrot.lane.b32.xlu0 %v3547_v50, %s3949_s3  ;;  %v3549_v51 = vpop.eup %3548 }
 0x119   :  { %v3551_v54 = vpop.eup %3550 }
 0x11a   :  { %v324_v55 = vadd.f32 1.0, %v3551_v54  ;;  %v3553_v56 = vpop.eup %3552 }
 0x11b   :  { %v318_v57 = vadd.f32 1.0, %v3553_v56 }
 0x11c   :  { %334 = vrot.lane.b32.xlu0 %v3549_v51, %s3949_s3  ;;  %3554 = vrcp.f32 %v324_v55 }
 0x11d   :  { %3556 = vrcp.f32 %v318_v57 }
 0x129   :  { %v3555_v58 = vpop.eup %3554 }
 0x12a   :  { %v3557_v63 = vpop.eup %3556  ;;  %v343_v13 = vmul.f32 %v3555_v58, %v4085_v22 }
 0x12b   :  { %v332_v18 = vmul.f32 %v3557_v63, %v330_v11 }
 0x18a   :  { %v346_v59 = vpop.permute.xlu0 %345 }
 0x18b   :  { %v348_v61 = vmul.f32 %v3555_v58, %v346_v59 }
 0x18d   :  { %350 = vrot.lane.b32.xlu1 %v348_v61, %s3947_s27 }
 0x18e   :  { %v335_v3 = vpop.permute.xlu0 %334 }
 0x18f   :  { %v337_v7 = vmul.f32 %v3557_v63, %v335_v3 }
 0x191   :  { %339 = vrot.lane.b32.xlu0 %v337_v7, %s3947_s27  ;;  %400 = vperm.xlu1 %3544, %v397_v62  }
 0x195   :  { %374 = vperm.xlu1 %3544, %v98_v60   ;;  %381 = vperm.xlu0 %3545, %v378_v9  }
 0x199   :  { %368 = vperm.xlu1 %3544, %v97_v5  }
 0x1ff   :  { %v351_v14 = vpop.permute.xlu1 %350 }
 0x200   :  { %v4184_v16 = vadd.f32 %v351_v14, %v343_v13 }
 0x202   :  { %3558 = vtanh.f32 %v4184_v16 }
 0x203   :  { %v340_v24 = vpop.permute.xlu0 %339 }
 0x204   :  { %v4187_v29 = vadd.f32 %v340_v24, %v332_v18 }
 0x206   :  { %3560 = vtanh.f32 %v4187_v29 }
 0x20c   :  { %v4190_v34 = vpop.permute.xlu1 %400 }
 0x20d   :  { %v403_v35 = vmul.f32 %v4111_v28, %v4190_v34 }
 0x20f   :  { %v3559_v32 = vpop.eup %3558 }
 0x210   :  { %362 = vrot.lane.b32.xlu0 %v3559_v32, %s3949_s3  ;;  %v4195_v36 = vpop.permute.xlu0 %381  ;;  %v4202_v41 = vpop.permute.xlu1 %374 }
 0x211   :  { %v384_v39 = vmul.f32 %v4111_v28, %v4195_v36  ;;  %v391_v7 = vmul.f32 %v4085_v22, %v4195_v36 }
 0x213   :  { %v3561_v37 = vpop.eup %3560 }
 0x214   :  { %356 = vrot.lane.b32.xlu1 %v3561_v37, %s3949_s3  ;;  %405 = vrot.lane.b32.xlu0 %v403_v35, %s3949_s3  ;;  %v4204_v42 = vpop.permute.xlu1 %368 }
 0x218   :  { %386 = vrot.lane.b32.xlu1 %v384_v39, %s3950_s1 }
 0x282   :  { %v363_v43 = vpop.permute.xlu0 %362 }
 0x283   :  { %v365_v45 = vmul.f32 %v3555_v58, %v363_v43 }
 0x285   :  { %v4207_v47 = vmul.f32 %v4202_v41, %v365_v45 }
 0x286   :  { %v357_v48 = vpop.permute.xlu1 %356  ;;  %v406_v49 = vpop.permute.xlu0 %405 }
 0x287   :  { %v359_v50 = vmul.f32 %v3557_v63, %v357_v48  ;;  %v4210_v51 = vadd.f32 %v406_v49, %v4207_v47 }
 0x289   :  { %v417_v28 = vrot.slane %v4210_v51, 6  ;;  %v4214_v52 = vmul.f32 %v4204_v42, %v359_v50  ;;  %v580_v49 = vrot.slane %v4210_v51, 2 }
 0x28a   :  { %v387_v53 = vpop.permute.xlu1 %386 }
 0x28b   :  { %v389_v54 = vadd.f32 %v387_v53, %v4214_v52  ;;  %418 = vrot.lane.b32.xlu1 %v417_v28, %s3949_s3  ;;  %v390_v28 = vmul.f32 %v4204_v42, %v4187_v29 }
 0x28d   :  { %413 = vrot.lane.b32.xlu0 %v389_v54, %s3947_s27  ;;  %v560_v48 = vrot.slane %v389_v54, 6 }
 0x2fd   :  { %v419_v55 = vpop.permute.xlu1 %418 }
 0x2ff   :  { %v414_v56 = vpop.permute.xlu0 %413 }
 0x300   :  { %v421_v57 = vsel %vm139_vm0, %v414_v56, %v419_v55  ;;  %v409_v55 = vmul.f32 %v4202_v41, %v4184_v16  ;;  %v410_v56 = vmul.f32 %v4085_v22, %v4190_v34 }
 0x301   :  { %3481 = vmatmul.mubr.msk.f32.vlgmr.msra.gmra.mxu0 %vm235_vm1, %v421_v57 }
 0x302   :  { %819 = vmatpush1.msra.mxu0 %v4047_v2  ;;  %866 = vmatprep.mubr.f32.mxu0 %v3946_v0  ;;  %v411_v57 = vadd.f32 %v410_v56, %v409_v55 }
 0x303   :  { %820 = vmatprep.subr.mxu0 %v4050_v4 }
 0x304   :  { %821 = vmatpush1.msra.mxu0 %v4052_v6 }
 0x305   :  { %822 = vmatprep.subr.mxu0 %v4055_v8 }
 0x306   :  { %823 = vmatpush1.msra.mxu0 %v4058_v10 }
 0x307   :  { %824 = vmatprep.subr.mxu0 %v4061_v12 }
 0x308   :  { %825 = vmatpush1.msra.mxu0 %v4064_v15 }
 0x309   :  { %826 = vmatprep.subr.mxu0 %v4067_v17 }
 0x30a   :  { %827 = vmatpush1.msra.mxu0 %v4073_v19 }
 0x30b   :  { %828 = vmatprep.subr.mxu0 %v4076_v20 }
 0x30c   :  { %829 = vmatpush1.msra.mxu0 %v4080_v21 }
 0x30d   :  { %830 = vmatprep.subr.mxu0 %v4088_v23 }
 0x30e   :  { %831 = vmatpush1.msra.mxu0 %v4095_v25 }
 0x30f   :  { %832 = vmatprep.subr.mxu0 %v4100_v26 }
 0x310   :  { %833 = vmatpush1.msra.mxu0 %v4105_v27 }
 0x311   :  { %1188 = vmatprep.subr.mxu0 %v4045_v1 }
 0x3c1   :  { %v491_v58 = vpop.f32.mrf.mxu0 }
 0x3c2   :  { %v497_v59 = vrot.slane %v491_v58, 6 }
 0x3c3   :  { %v493_v60 = vpop.f32.mrf.mxu0 }
 0x3c4   :  { %v499_v61 = vadd.f32 %v497_v59, %v4169_v46  ;;  %v501_v62 = vrot.slane %v493_v60, 4  ;;  %v533_v60 = vrot.slane %v411_v57, 2 }
 0x3c6   :  { %3562 = vtanh.f32 %v499_v61  ;;  %v503_v63 = vadd.f32 %v501_v62, %v4167_v44  ;;  %v3482_v9 = vmul.f32 -1.442695, %v499_v61 }
 0x3c8   :  { %3564 = vtanh.f32 %v503_v63  ;;  %v3483_v11 = vmul.f32 -1.442695, %v503_v63 }
 0x3c9   :  { %3566 = vpow2.f32 %v3482_v9 }
 0x3ca   :  { %3568 = vpow2.f32 %v3483_v11 }
 0x3d3   :  { %v3563_v3 = vpop.eup %3562 }
 0x3d4   :  { %523 = vrot.lane.b32.xlu1 %v3563_v3, %s3949_s3 }
 0x3d5   :  { %v3565_v5 = vpop.eup %3564 }
 0x3d6   :  { %537 = vrot.lane.b32.xlu0 %v3565_v5, %s3949_s3  ;;  %v3567_v13 = vpop.eup %3566 }
 0x3d7   :  { %v3569_v14 = vpop.eup %3568  ;;  %v507_v18 = vadd.f32 1.0, %v3567_v13 }
 0x3d8   :  { %v513_v24 = vadd.f32 1.0, %v3569_v14 }
 0x3d9   :  { %3570 = vrcp.f32 %v507_v18 }
 0x3da   :  { %393 = vrot.lane.b32.xlu0 %v391_v7, %s3947_s27  ;;  %3572 = vrcp.f32 %v513_v24 }
 0x3e6   :  { %v3571_v32 = vpop.eup %3570 }
 0x3e7   :  { %v3573_v39 = vpop.eup %3572 }
 0x3e8   :  { %v535_v51 = vmul.f32 %v3573_v39, %v533_v60 }
 0x446   :  { %v524_v35 = vpop.permute.xlu1 %523 }
 0x447   :  { %v526_v37 = vmul.f32 %v3571_v32, %v524_v35 }
 0x448   :  { %v538_v43 = vpop.permute.xlu0 %537 }
 0x449   :  { %528 = vrot.lane.b32.xlu0 %v526_v37, %s3947_s27  ;;  %v540_v45 = vmul.f32 %v3573_v39, %v538_v43 }
 0x44b   :  { %542 = vrot.lane.b32.xlu1 %v540_v45, %s3947_s27 }
 0x44c   :  { %v394_v50 = vpop.permute.xlu0 %393 }
 0x44d   :  { %561 = vrot.lane.b32.xlu0 %v560_v48, %s3947_s27  ;;  %v396_v53 = vadd.f32 %v394_v50, %v390_v28 }
 0x44f   :  { %581 = vrot.lane.b32.xlu1 %v580_v49, %s3947_s27  ;;  %v519_v54 = vrot.slane %v396_v53, 6 }
 0x451   :  { %v521_v58 = vmul.f32 %v3571_v32, %v519_v54 }
 0x4bb   :  { %v529_v59 = vpop.permute.xlu0 %528 }
 0x4bc   :  { %v4256_v61 = vadd.f32 %v529_v59, %v521_v58 }
 0x4bd   :  { %v543_v62 = vpop.permute.xlu1 %542 }
 0x4be   :  { %3574 = vtanh.f32 %v4256_v61  ;;  %v4259_v63 = vadd.f32 %v543_v62, %v535_v51 }
 0x4bf   :  { %v562_v16 = vpop.permute.xlu0 %561 }
 0x4c0   :  { %3576 = vtanh.f32 %v4259_v63  ;;  %v564_v3 = vmul.f32 %v562_v16, %v4195_v36 }
 0x4c1   :  { %v582_v5 = vpop.permute.xlu1 %581 }
 0x4c2   :  { %v584_v7 = vmul.f32 %v582_v5, %v4190_v34 }
 0x4cb   :  { %v3575_v29 = vpop.eup %3574 }
 0x4cc   :  { %548 = vrot.lane.b32.xlu0 %v3575_v29, %s3949_s3 }
 0x4cd   :  { %v3577_v22 = vpop.eup %3576 }
 0x4ce   :  { %554 = vrot.lane.b32.xlu1 %v3577_v22, %s3949_s3 }
 0x4d0   :  { %566 = vrot.lane.b32.xlu0 %v564_v3, %s3950_s1 }
 0x4d2   :  { %586 = vrot.lane.b32.xlu1 %v584_v7, %s3950_s1 }
 0x53e   :  { %v549_v9 = vpop.permute.xlu0 %548 }
 0x53f   :  { %v551_v11 = vmul.f32 %v3571_v32, %v549_v9 }
 0x540   :  { %v555_v13 = vpop.permute.xlu1 %554 }
 0x541   :  { %v4269_v14 = vmul.f32 %v551_v11, %v4204_v42  ;;  %v557_v18 = vmul.f32 %v3573_v39, %v555_v13 }
 0x542   :  { %v567_v24 = vpop.permute.xlu0 %566 }
 0x543   :  { %v4272_v35 = vadd.f32 %v567_v24, %v4269_v14  ;;  %v4275_v37 = vmul.f32 %v557_v18, %v4202_v41 }
 0x544   :  { %v587_v43 = vpop.permute.xlu1 %586 }
 0x545   :  { %601 = vrot.lane.b32.xlu1 %v4272_v35, %s3947_s27  ;;  %v4280_v45 = vadd.f32 %v587_v43, %v4275_v37 }
 0x547   :  { %v605_v32 = vrot.slane %v4280_v45, 2 }
 0x549   :  { %591 = vrot.lane.b32.xlu1 %v533_v60, %s3950_s1  ;;  %606 = vrot.lane.b32.xlu0 %v605_v32, %s3949_s3 }
 0x54d   :  { %571 = vrot.lane.b32.xlu0 %v519_v54, %s3950_s1 }
 0x5b7   :  { %v602_v39 = vpop.permute.xlu1 %601 }
 0x5bb   :  { %v607_v48 = vpop.permute.xlu0 %606  ;;  %v592_v51 = vpop.permute.xlu1 %591 }
 0x5bc   :  { %v609_v49 = vsel %vm139_vm0, %v602_v39, %v607_v48  ;;  %v594_v29 = vmul.f32 %v592_v51, %v4190_v34  ;;  %v749_v48 = vrot.slane %v4272_v35, 6 }
 0x5bd   :  { %v611_v50 = vrot.slane %v609_v49, 2 }
 0x5bf   :  { %3484 = vmatmul.mubr.msk.f32.vlgmr.msra.gmra.mxu1 %vm235_vm1, %v611_v50  ;;  %v572_v59 = vpop.permute.xlu0 %571  ;;  %v570_v50 = vmul.f32 %v4256_v61, %v4204_v42 }
 0x5c0   :  { %1005 = vmatpush1.msra.mxu1 %v4047_v2  ;;  %1052 = vmatprep.mubr.f32.mxu1 %v3946_v0  ;;  %v574_v62 = vmul.f32 %v572_v59, %v4195_v36 }
 0x5c1   :  { %1006 = vmatprep.subr.mxu1 %v4050_v4 }
 0x5c2   :  { %1007 = vmatpush1.msra.mxu1 %v4052_v6 }
 0x5c3   :  { %1008 = vmatprep.subr.mxu1 %v4055_v8 }
 0x5c4   :  { %1009 = vmatpush1.msra.mxu1 %v4058_v10 }
 0x5c5   :  { %1010 = vmatprep.subr.mxu1 %v4061_v12 }
 0x5c6   :  { %1011 = vmatpush1.msra.mxu1 %v4064_v15 }
 0x5c7   :  { %1012 = vmatprep.subr.mxu1 %v4067_v17 }
 0x5c8   :  { %1013 = vmatpush1.msra.mxu1 %v4073_v19 }
 0x5c9   :  { %1014 = vmatprep.subr.mxu1 %v4076_v20 }
 0x5ca   :  { %1015 = vmatpush1.msra.mxu1 %v4080_v21 }
 0x5cb   :  { %1016 = vmatprep.subr.mxu1 %v4088_v23 }
 0x5cc   :  { %1017 = vmatpush1.msra.mxu1 %v4095_v25 }
 0x5cd   :  { %1018 = vmatprep.subr.mxu1 %v4100_v26 }
 0x5ce   :  { %1019 = vmatpush1.msra.mxu1 %v4105_v27 }
 0x5cf   :  { %1377 = vmatprep.subr.mxu1 %v4045_v1 }
 0x67f   :  { %v680_v28 = vpop.f32.mrf.mxu1 }
 0x680   :  { %v686_v53 = vrot.slane %v680_v28, 4 }
 0x681   :  { %v682_v55 = vpop.f32.mrf.mxu1 }
 0x682   :  { %v688_v56 = vadd.f32 %v686_v53, %v4169_v46  ;;  %v690_v54 = vrot.slane %v682_v55, 6  ;;  %v590_v55 = vmul.f32 %v4259_v63, %v4202_v41 }
 0x684   :  { %3578 = vtanh.f32 %v688_v56  ;;  %v692_v57 = vadd.f32 %v690_v54, %v4167_v44  ;;  %v3485_v16 = vmul.f32 -1.442695, %v688_v56 }
 0x686   :  { %3580 = vtanh.f32 %v692_v57  ;;  %v3486_v22 = vmul.f32 -1.442695, %v692_v57 }
 0x687   :  { %3582 = vpow2.f32 %v3485_v16 }
 0x688   :  { %3584 = vpow2.f32 %v3486_v22 }
 0x691   :  { %v3579_v58 = vpop.eup %3578 }
 0x692   :  { %712 = vrot.lane.b32.xlu0 %v3579_v58, %s3949_s3 }
 0x693   :  { %v3581_v60 = vpop.eup %3580 }
 0x694   :  { %726 = vrot.lane.b32.xlu1 %v3581_v60, %s3949_s3  ;;  %v3583_v3 = vpop.eup %3582 }
 0x695   :  { %v3585_v5 = vpop.eup %3584  ;;  %v696_v7 = vadd.f32 1.0, %v3583_v3 }
 0x696   :  { %576 = vrot.lane.b32.xlu0 %v574_v62, %s3947_s27  ;;  %v702_v9 = vadd.f32 1.0, %v3585_v5 }
 0x697   :  { %3586 = vrcp.f32 %v696_v7 }
 0x698   :  { %596 = vrot.lane.b32.xlu1 %v594_v29, %s3947_s27  ;;  %3588 = vrcp.f32 %v702_v9 }
 0x6a4   :  { %v3587_v11 = vpop.eup %3586 }
 0x6a5   :  { %v3589_v24 = vpop.eup %3588 }
 0x704   :  { %v713_v13 = vpop.permute.xlu0 %712 }
 0x705   :  { %v715_v18 = vmul.f32 %v3587_v11, %v713_v13 }
 0x706   :  { %v727_v43 = vpop.permute.xlu1 %726 }
 0x707   :  { %717 = vrot.lane.b32.xlu0 %v715_v18, %s3947_s27  ;;  %v729_v39 = vmul.f32 %v3589_v24, %v727_v43 }
 0x708   :  { %v577_v49 = vpop.permute.xlu0 %576 }
 0x709   :  { %731 = vrot.lane.b32.xlu1 %v729_v39, %s3947_s27  ;;  %v579_v28 = vadd.f32 %v577_v49, %v570_v50 }
 0x70a   :  { %v597_v53 = vpop.permute.xlu1 %596 }
 0x70b   :  { %750 = vrot.lane.b32.xlu0 %v749_v48, %s3947_s27  ;;  %v599_v56 = vadd.f32 %v597_v53, %v590_v55  ;;  %v708_v54 = vrot.slane %v579_v28, 6 }
 0x70d   :  { %769 = vrot.lane.b32.xlu1 %v605_v32, %s3947_s27  ;;  %v722_v35 = vrot.slane %v599_v56, 2  ;;  %v710_v57 = vmul.f32 %v3587_v11, %v708_v54 }
 0x70f   :  { %v724_v60 = vmul.f32 %v3589_v24, %v722_v35 }
 0x779   :  { %v718_v58 = vpop.permute.xlu0 %717 }
 0x77a   :  { %v4326_v59 = vadd.f32 %v718_v58, %v710_v57 }
 0x77b   :  { %v732_v45 = vpop.permute.xlu1 %731 }
 0x77c   :  { %3590 = vtanh.f32 %v4326_v59  ;;  %v4329_v32 = vadd.f32 %v732_v45, %v724_v60 }
 0x77d   :  { %v751_v51 = vpop.permute.xlu0 %750 }
 0x77e   :  { %3592 = vtanh.f32 %v4329_v32  ;;  %v753_v62 = vmul.f32 %v751_v51, %v4195_v36 }
 0x77f   :  { %v770_v29 = vpop.permute.xlu1 %769 }
 0x780   :  { %v772_v16 = vmul.f32 %v770_v29, %v4190_v34 }
 0x789   :  { %v3591_v61 = vpop.eup %3590 }
 0x78a   :  { %737 = vrot.lane.b32.xlu0 %v3591_v61, %s3949_s3 }
 0x78b   :  { %v3593_v63 = vpop.eup %3592 }
 0x78c   :  { %743 = vrot.lane.b32.xlu1 %v3593_v63, %s3949_s3 }
 0x78e   :  { %755 = vrot.lane.b32.xlu0 %v753_v62, %s3950_s1 }
 0x790   :  { %774 = vrot.lane.b32.xlu1 %v772_v16, %s3950_s1 }
 0x7fc   :  { %v738_v22 = vpop.permute.xlu0 %737 }
 0x7fd   :  { %v740_v3 = vmul.f32 %v3587_v11, %v738_v22 }
 0x7fe   :  { %v744_v5 = vpop.permute.xlu1 %743 }
 0x7ff   :  { %v4339_v7 = vmul.f32 %v740_v3, %v4204_v42  ;;  %v746_v9 = vmul.f32 %v3589_v24, %v744_v5 }
 0x800   :  { %v756_v13 = vpop.permute.xlu0 %755 }
 0x801   :  { %v4342_v18 = vadd.f32 %v756_v13, %v4339_v7  ;;  %v4345_v43 = vmul.f32 %v746_v9, %v4202_v41 }
 0x802   :  { %v775_v39 = vpop.permute.xlu1 %774 }
 0x803   :  { %789 = vrot.lane.b32.xlu1 %v4342_v18, %s3947_s27  ;;  %v4350_v48 = vadd.f32 %v775_v39, %v4345_v43  ;;  %v934_v39 = vrot.slane %v4342_v18, 6 }
 0x805   :  { %v793_v11 = vrot.slane %v4350_v48, 6 }
 0x807   :  { %779 = vrot.lane.b32.xlu1 %v722_v35, %s3950_s1  ;;  %794 = vrot.lane.b32.xlu0 %v793_v11, %s3949_s3  ;;  %v954_v11 = vrot.slane %v4350_v48, 2 }
 0x80b   :  { %760 = vrot.lane.b32.xlu0 %v708_v54, %s3950_s1 }
 0x875   :  { %v790_v24 = vpop.permute.xlu1 %789 }
 0x879   :  { %v795_v49 = vpop.permute.xlu0 %794  ;;  %v780_v45 = vpop.permute.xlu1 %779 }
 0x87a   :  { %v797_v50 = vsel %vm139_vm0, %v790_v24, %v795_v49  ;;  %v759_v49 = vmul.f32 %v4326_v59, %v4204_v42 }
 0x87b   :  { %v799_v28 = vrot.slane %v797_v50, 4 }
 0x87d   :  { %3487 = vmatmul.mubr.msk.f32.vlgmr.msra.gmra.mxu0 %vm235_vm1, %v799_v28  ;;  %v761_v58 = vpop.permute.xlu0 %760  ;;  %v778_v28 = vmul.f32 %v4329_v32, %v4202_v41 }
 0x87e   :  { %1189 = vmatpush1.msra.mxu0 %v4047_v2  ;;  %1236 = vmatprep.mubr.f32.mxu0 %v3946_v0  ;;  %v763_v61 = vmul.f32 %v761_v58, %v4195_v36 }
 0x87f   :  { %1190 = vmatprep.subr.mxu0 %v4050_v4 }
 0x880   :  { %1191 = vmatpush1.msra.mxu0 %v4052_v6 }
 0x881   :  { %1192 = vmatprep.subr.mxu0 %v4055_v8 }
 0x882   :  { %1193 = vmatpush1.msra.mxu0 %v4058_v10 }
 0x883   :  { %1194 = vmatprep.subr.mxu0 %v4061_v12 }
 0x884   :  { %1195 = vmatpush1.msra.mxu0 %v4064_v15 }
 0x885   :  { %1196 = vmatprep.subr.mxu0 %v4067_v17 }
 0x886   :  { %1197 = vmatpush1.msra.mxu0 %v4073_v19 }
 0x887   :  { %1198 = vmatprep.subr.mxu0 %v4076_v20 }
 0x888   :  { %1199 = vmatpush1.msra.mxu0 %v4080_v21 }
 0x889   :  { %1200 = vmatprep.subr.mxu0 %v4088_v23 }
 0x88a   :  { %1201 = vmatpush1.msra.mxu0 %v4095_v25 }
 0x88b   :  { %1202 = vmatprep.subr.mxu0 %v4100_v26 }
 0x88c   :  { %1203 = vmatpush1.msra.mxu0 %v4105_v27 }
 0x88d   :  { %1565 = vmatprep.subr.mxu0 %v4045_v1  ;;  %v782_v1 = vmul.f32 %v780_v45, %v4190_v34 }
 0x93d   :  { %v868_v53 = vpop.f32.mrf.mxu0 }
 0x93e   :  { %v874_v55 = vrot.slane %v868_v53, 2 }
 0x93f   :  { %v870_v56 = vpop.f32.mrf.mxu0 }
 0x940   :  { %v876_v54 = vadd.f32 %v874_v55, %v4169_v46  ;;  %v877_v35 = vadd.f32 %v870_v56, %v4167_v44 }
 0x942   :  { %3594 = vtanh.f32 %v876_v54  ;;  %v3488_v46 = vmul.f32 -1.442695, %v876_v54  ;;  %v3489_v44 = vmul.f32 -1.442695, %v877_v35 }
 0x943   :  { %3596 = vtanh.f32 %v877_v35 }
 0x944   :  { %3598 = vpow2.f32 %v3488_v46 }
 0x945   :  { %3600 = vpow2.f32 %v3489_v44 }
 0x94f   :  { %v3595_v57 = vpop.eup %3594 }
 0x950   :  { %v3597_v60 = vpop.eup %3596  ;;  %897 = vrot.lane.b32.xlu0 %v3595_v57, %s3949_s3 }
 0x951   :  { %911 = vrot.lane.b32.xlu1 %v3597_v60, %s3949_s3  ;;  %v3599_v51 = vpop.eup %3598 }
 0x952   :  { %v3601_v63 = vpop.eup %3600  ;;  %v881_v62 = vadd.f32 1.0, %v3599_v51 }
 0x953   :  { %v887_v29 = vadd.f32 1.0, %v3601_v63 }
 0x954   :  { %765 = vrot.lane.b32.xlu0 %v763_v61, %s3947_s27  ;;  %3602 = vrcp.f32 %v881_v62 }
 0x955   :  { %784 = vrot.lane.b32.xlu1 %v782_v1, %s3947_s27  ;;  %3604 = vrcp.f32 %v887_v29 }
 0x961   :  { %v3603_v16 = vpop.eup %3602 }
 0x962   :  { %v3605_v3 = vpop.eup %3604 }
 0x9c2   :  { %v898_v22 = vpop.permute.xlu0 %897 }
 0x9c3   :  { %v900_v5 = vmul.f32 %v3603_v16, %v898_v22  ;;  %v912_v9 = vpop.permute.xlu1 %911 }
 0x9c4   :  { %v914_v13 = vmul.f32 %v3605_v3, %v912_v9 }
 0x9c5   :  { %902 = vrot.lane.b32.xlu0 %v900_v5, %s3947_s27 }
 0x9c6   :  { %916 = vrot.lane.b32.xlu1 %v914_v13, %s3947_s27  ;;  %v766_v24 = vpop.permute.xlu0 %765 }
 0x9c7   :  { %v785_v50 = vpop.permute.xlu1 %784  ;;  %v768_v53 = vadd.f32 %v766_v24, %v759_v49 }
 0x9c8   :  { %v787_v55 = vadd.f32 %v785_v50, %v778_v28 }
 0x9c9   :  { %935 = vrot.lane.b32.xlu0 %v934_v39, %s3947_s27  ;;  %v893_v56 = vrot.slane %v768_v53, 6 }
 0x9ca   :  { %955 = vrot.lane.b32.xlu1 %v954_v11, %s3947_s27  ;;  %v907_v54 = vrot.slane %v787_v55, 2 }
 0x9cb   :  { %v895_v35 = vmul.f32 %v3603_v16, %v893_v56 }
 0x9cc   :  { %v909_v57 = vmul.f32 %v3605_v3, %v907_v54 }
 0xa37   :  { %v903_v18 = vpop.permute.xlu0 %902 }
 0xa38   :  { %v4393_v48 = vadd.f32 %v903_v18, %v895_v35  ;;  %v917_v58 = vpop.permute.xlu1 %916 }
 0xa39   :  { %v4395_v60 = vadd.f32 %v917_v58, %v909_v57 }
 0xa3a   :  { %3606 = vtanh.f32 %v4393_v48 }
 0xa3b   :  { %3608 = vtanh.f32 %v4395_v60  ;;  %v936_v45 = vpop.permute.xlu0 %935 }
 0xa3c   :  { %v956_v32 = vpop.permute.xlu1 %955  ;;  %v938_v1 = vmul.f32 %v936_v45, %v4195_v36 }
 0xa3d   :  { %v958_v46 = vmul.f32 %v956_v32, %v4190_v34  ;;  %v964_v32 = vmul.f32 %v4395_v60, %v4202_v41 }
 0xa47   :  { %v3607_v59 = vpop.eup %3606 }
 0xa48   :  { %v3609_v61 = vpop.eup %3608  ;;  %922 = vrot.lane.b32.xlu0 %v3607_v59, %s3949_s3  ;;  %v944_v59 = vmul.f32 %v4393_v48, %v4204_v42 }
 0xa49   :  { %928 = vrot.lane.b32.xlu1 %v3609_v61, %s3949_s3 }
 0xa4c   :  { %940 = vrot.lane.b32.xlu0 %v938_v1, %s3950_s1 }
 0xa4d   :  { %960 = vrot.lane.b32.xlu1 %v958_v46, %s3950_s1 }
 0xaba   :  { %v923_v44 = vpop.permute.xlu0 %922 }
 0xabb   :  { %v925_v51 = vmul.f32 %v3603_v16, %v923_v44  ;;  %v929_v63 = vpop.permute.xlu1 %928 }
 0xabc   :  { %v931_v62 = vmul.f32 %v3605_v3, %v929_v63 }
 0xabd   :  { %v4406_v29 = vmul.f32 %v925_v51, %v4204_v42 }
 0xabe   :  { %v941_v22 = vpop.permute.xlu0 %940  ;;  %v4409_v5 = vmul.f32 %v931_v62, %v4202_v41 }
 0xabf   :  { %v4412_v9 = vadd.f32 %v941_v22, %v4406_v29  ;;  %v961_v13 = vpop.permute.xlu1 %960 }
 0xac0   :  { %v4415_v39 = vadd.f32 %v961_v13, %v4409_v5 }
 0xac1   :  { %975 = vrot.lane.b32.xlu1 %v4412_v9, %s3947_s27  ;;  %v1120_v18 = vrot.slane %v4412_v9, 6 }
 0xac2   :  { %v979_v16 = vrot.slane %v4415_v39, 2 }
 0xac4   :  { %980 = vrot.lane.b32.xlu0 %v979_v16, %s3949_s3 }
 0xac5   :  { %965 = vrot.lane.b32.xlu1 %v907_v54, %s3950_s1 }
 0xac8   :  { %945 = vrot.lane.b32.xlu0 %v893_v56, %s3950_s1 }
 0xb33   :  { %v976_v3 = vpop.permute.xlu1 %975 }
 0xb36   :  { %v981_v11 = vpop.permute.xlu0 %980 }
 0xb37   :  { %v983_v24 = vsel %vm139_vm0, %v976_v3, %v981_v11 }
 0xb38   :  { %v985_v49 = vrot.slane %v983_v24, 6 }
 0xb3a   :  { %3490 = vmatmul.mubr.msk.f32.vlgmr.msra.gmra.mxu1 %vm235_vm1, %v985_v49 }
 0xb3b   :  { %1378 = vmatpush1.msra.mxu1 %v4047_v2  ;;  %1425 = vmatprep.mubr.f32.mxu1 %v3946_v0 }
 0xb3c   :  { %1379 = vmatprep.subr.mxu1 %v4050_v4 }
 0xb3d   :  { %1380 = vmatpush1.msra.mxu1 %v4052_v6 }
 0xb3e   :  { %1381 = vmatprep.subr.mxu1 %v4055_v8 }
 0xb3f   :  { %1382 = vmatpush1.msra.mxu1 %v4058_v10 }
 0xb40   :  { %1383 = vmatprep.subr.mxu1 %v4061_v12 }
 0xb41   :  { %1384 = vmatpush1.msra.mxu1 %v4064_v15  ;;  %v946_v15 = vpop.permute.xlu0 %945 }
 0xb42   :  { %1385 = vmatprep.subr.mxu1 %v4067_v17  ;;  %v948_v17 = vmul.f32 %v946_v15, %v4195_v36 }
 0xb43   :  { %1386 = vmatpush1.msra.mxu1 %v4073_v19 }
 0xb44   :  { %1387 = vmatprep.subr.mxu1 %v4076_v20  ;;  %v966_v20 = vpop.permute.xlu1 %965 }
 0xb45   :  { %1388 = vmatpush1.msra.mxu1 %v4080_v21  ;;  %v968_v21 = vmul.f32 %v966_v20, %v4190_v34 }
 0xb46   :  { %1389 = vmatprep.subr.mxu1 %v4088_v23 }
 0xb47   :  { %1390 = vmatpush1.msra.mxu1 %v4095_v25 }
 0xb48   :  { %1391 = vmatprep.subr.mxu1 %v4100_v26 }
 0xb49   :  { %1392 = vmatpush1.msra.mxu1 %v4105_v27 }
 0xbfa   :  { %v1054_v2 = vpop.f32.mrf.mxu1 }
 0xbfb   :  { %v1059_v4 = vadd.f32 %v1054_v2, %v4165_v40 }
 0xbfc   :  { %v1056_v6 = vpop.f32.mrf.mxu1 }
 0xbfd   :  { %3610 = vtanh.f32 %v1059_v4  ;;  %v1061_v8 = vrot.slane %v1056_v6, 2  ;;  %v3491_v23 = vmul.f32 -1.442695, %v1059_v4 }
 0xbff   :  { %v1063_v10 = vadd.f32 %v1061_v8, %v4163_v38 }
 0xc01   :  { %3612 = vtanh.f32 %v1063_v10  ;;  %v3492_v25 = vmul.f32 -1.442695, %v1063_v10 }
 0xc02   :  { %3614 = vpow2.f32 %v3491_v23 }
 0xc03   :  { %3616 = vpow2.f32 %v3492_v25  ;;  %v3802_v25 = vld [vmem:[#allocation5 + $0x70] sm:$0xff] }
 0xc0a   :  { %v3611_v12 = vpop.eup %3610 }
 0xc0b   :  { %1083 = vrot.lane.b32.xlu0 %v3611_v12, %s3949_s3 }
 0xc0e   :  { %v3613_v19 = vpop.eup %3612 }
 0xc0f   :  { %950 = vrot.lane.b32.xlu0 %v948_v17, %s3947_s27  ;;  %1097 = vrot.lane.b32.xlu1 %v3613_v19, %s3949_s3  ;;  %v3615_v26 = vpop.eup %3614 }
 0xc10   :  { %v1067_v27 = vadd.f32 1.0, %v3615_v26  ;;  %v3617_v50 = vpop.eup %3616  ;;  %v3803_v26 = vld [vmem:[#allocation5 + $0x68] sm:$0xff] }
 0xc11   :  { %v1073_v28 = vadd.f32 1.0, %v3617_v50  ;;  %v3805_v50 = vld [vmem:[#allocation5 + $0x58] sm:$0xff] }
 0xc12   :  { %3618 = vrcp.f32 %v1067_v27  ;;  %v3804_v27 = vld [vmem:[#allocation5 + $0x60] sm:$0xff] }
 0xc13   :  { %970 = vrot.lane.b32.xlu1 %v968_v21, %s3947_s27  ;;  %3620 = vrcp.f32 %v1073_v28  ;;  %v3806_v28 = vld [vmem:[#allocation5 + $0x50] sm:$0xff] }
 0xc1f   :  { %v3619_v53 = vpop.eup %3618 }
 0xc20   :  { %v3621_v54 = vpop.eup %3620 }
 0xc7d   :  { %v1084_v55 = vpop.permute.xlu0 %1083 }
 0xc7e   :  { %v1086_v56 = vmul.f32 %v3619_v53, %v1084_v55  ;;  %v3808_v55 = vld [vmem:[#allocation5 + $0x40] sm:$0xff] }
 0xc80   :  { %1088 = vrot.lane.b32.xlu0 %v1086_v56, %s3947_s27  ;;  %v3809_v56 = vld [vmem:[#allocation5 + $0x38] sm:$0xff] }
 0xc81   :  { %v1098_v35 = vpop.permute.xlu1 %1097  ;;  %v951_v58 = vpop.permute.xlu0 %950 }
 0xc82   :  { %v1100_v57 = vmul.f32 %v3621_v54, %v1098_v35  ;;  %v953_v45 = vadd.f32 %v951_v58, %v944_v59  ;;  %v3811_v35 = vld [vmem:[#allocation5 + $0x28] sm:$0xff]  ;;  %v3814_v58 = vld [vmem:[#allocation5 + $0x10] sm:$0xff] }
 0xc83   :  { %v3815_v59 = vld [vmem:[#allocation5 + $0x8] sm:$0xff] }
 0xc84   :  { %1121 = vrot.lane.b32.xlu0 %v1120_v18, %s3947_s27  ;;  %1102 = vrot.lane.b32.xlu1 %v1100_v57, %s3947_s27  ;;  %v1079_v1 = vrot.slane %v953_v45, 6  ;;  %v3812_v18 = vld [vmem:[#allocation5 + $0x20] sm:$0xff]  ;;  %v3813_v57 = vld [vmem:[#allocation5 + $0x18] sm:$0xff] }
 0xc85   :  { %v971_v61 = vpop.permute.xlu1 %970  ;;  %v3816_v45 = vld [vmem:[#allocation5] sm:$0xff] }
 0xc86   :  { %v973_v46 = vadd.f32 %v971_v61, %v964_v32  ;;  %v1081_v51 = vmul.f32 %v3619_v53, %v1079_v1 }
 0xc88   :  { %1140 = vrot.lane.b32.xlu1 %v979_v16, %s3947_s27  ;;  %v1093_v44 = vrot.slane %v973_v46, 2 }
 0xc8a   :  { %v1095_v22 = vmul.f32 %v3621_v54, %v1093_v44 }
 0xcf2   :  { %v1089_v63 = vpop.permute.xlu0 %1088 }
 0xcf3   :  { %v4458_v62 = vadd.f32 %v1089_v63, %v1081_v51 }
 0xcf5   :  { %3622 = vtanh.f32 %v4458_v62 }
 0xcf6   :  { %v1103_v9 = vpop.permute.xlu1 %1102  ;;  %v1122_v39 = vpop.permute.xlu0 %1121 }
 0xcf7   :  { %v4461_v13 = vadd.f32 %v1103_v9, %v1095_v22  ;;  %v1124_v60 = vmul.f32 %v1122_v39, %v4190_v34 }
 0xcf9   :  { %3624 = vtanh.f32 %v4461_v13 }
 0xcfa   :  { %v1141_v3 = vpop.permute.xlu1 %1140 }
 0xcfb   :  { %v1143_v11 = vmul.f32 %v1141_v3, %v4195_v36 }
 0xd02   :  { %v3623_v48 = vpop.eup %3622 }
 0xd03   :  { %1108 = vrot.lane.b32.xlu0 %v3623_v48, %s3949_s3 }
 0xd06   :  { %v3625_v16 = vpop.eup %3624 }
 0xd07   :  { %1126 = vrot.lane.b32.xlu0 %v1124_v60, %s3950_s1  ;;  %1114 = vrot.lane.b32.xlu1 %v3625_v16, %s3949_s3 }
 0xd0b   :  { %1145 = vrot.lane.b32.xlu1 %v1143_v11, %s3950_s1 }
 0xd75   :  { %v1109_v24 = vpop.permute.xlu0 %1108 }
 0xd76   :  { %v1111_v49 = vmul.f32 %v3619_v53, %v1109_v24  ;;  %v3807_v53 = vld [vmem:[#allocation5 + $0x48] sm:$0xff] }
 0xd78   :  { %v4471_v2 = vmul.f32 %v1111_v49, %v4202_v41 }
 0xd79   :  { %v1127_v4 = vpop.permute.xlu0 %1126  ;;  %v1115_v6 = vpop.permute.xlu1 %1114 }
 0xd7a   :  { %v4474_v8 = vadd.f32 %v1127_v4, %v4471_v2  ;;  %v1117_v10 = vmul.f32 %v3621_v54, %v1115_v6  ;;  %v3810_v54 = vld [vmem:[#allocation5 + $0x30] sm:$0xff] }
 0xd7c   :  { %1160 = vrot.lane.b32.xlu1 %v4474_v8, %s3947_s27  ;;  %v4479_v12 = vmul.f32 %v1117_v10, %v4204_v42 }
 0xd7d   :  { %v1146_v15 = vpop.permute.xlu1 %1145 }
 0xd7e   :  { %v4482_v17 = vadd.f32 %v1146_v15, %v4479_v12 }
 0xd80   :  { %v1164_v19 = vrot.slane %v4482_v17, 6  ;;  %1150 = vrot.lane.b32.xlu1 %v1093_v44, %s3950_s1 }
 0xd82   :  { %1165 = vrot.lane.b32.xlu0 %v1164_v19, %s3949_s3 }
 0xd86   :  { %1131 = vrot.lane.b32.xlu0 %v1079_v1, %s3950_s1 }
 0xdee   :  { %v1161_v20 = vpop.permute.xlu1 %1160 }
 0xdf2   :  { %v1151_v48 = vpop.permute.xlu1 %1150 }
 0xdf3   :  { %v1153_v60 = vmul.f32 %v1151_v48, %v4195_v36 }
 0xdf4   :  { %v1166_v21 = vpop.permute.xlu0 %1165 }
 0xdf5   :  { %v1168_v23 = vsel %vm139_vm0, %v1161_v20, %v1166_v21 }
 0xdf6   :  { %3493 = vmatmul.mubr.msk.f32.vlgmr.msra.gmra.mxu0 %vm235_vm1, %v1168_v23  ;;  %v1307_v23 = vrot.slane %v4474_v8, 6 }
 0xdf7   :  { %1566 = vmatpush1.msra.mxu0 %v3802_v25  ;;  %1613 = vmatprep.mubr.f32.mxu0 %v3946_v0  ;;  %v1327_v25 = vrot.slane %v4482_v17, 2 }
 0xdf8   :  { %1567 = vmatprep.subr.mxu0 %v3803_v26  ;;  %v1132_v22 = vpop.permute.xlu0 %1131 }
 0xdf9   :  { %1568 = vmatpush1.msra.mxu0 %v3804_v27  ;;  %v1134_v39 = vmul.f32 %v1132_v22, %v4190_v34  ;;  %v1130_v27 = vmul.f32 %v4458_v62, %v4202_v41 }
 0xdfa   :  { %1569 = vmatprep.subr.mxu0 %v3805_v50 }
 0xdfb   :  { %1570 = vmatpush1.msra.mxu0 %v3806_v28 }
 0xdfc   :  { %1571 = vmatprep.subr.mxu0 %v3807_v53  ;;  %v1149_v53 = vmul.f32 %v4461_v13, %v4204_v42 }
 0xdfd   :  { %1572 = vmatpush1.msra.mxu0 %v3808_v55 }
 0xdfe   :  { %1573 = vmatprep.subr.mxu0 %v3809_v56 }
 0xdff   :  { %1574 = vmatpush1.msra.mxu0 %v3810_v54 }
 0xe00   :  { %1575 = vmatprep.subr.mxu0 %v3811_v35 }
 0xe01   :  { %1576 = vmatpush1.msra.mxu0 %v3812_v18 }
 0xe02   :  { %1577 = vmatprep.subr.mxu0 %v3813_v57 }
 0xe03   :  { %1578 = vmatpush1.msra.mxu0 %v3814_v58 }
 0xe04   :  { %1579 = vmatprep.subr.mxu0 %v3815_v59 }
 0xe05   :  { %1580 = vmatpush1.msra.mxu0 %v3816_v45 }
 0xeb6   :  { %v1238_v61 = vpop.f32.mrf.mxu0 }
 0xeb7   :  { %v1244_v32 = vrot.slane %v1238_v61, 6 }
 0xeb8   :  { %v1240_v1 = vpop.f32.mrf.mxu0 }
 0xeb9   :  { %v1246_v46 = vadd.f32 %v1244_v32, %v4165_v40  ;;  %v1248_v44 = vrot.slane %v1240_v1, 4 }
 0xebb   :  { %3626 = vtanh.f32 %v1246_v46  ;;  %v1250_v51 = vadd.f32 %v1248_v44, %v4163_v38  ;;  %v3494_v16 = vmul.f32 -1.442695, %v1246_v46 }
 0xebd   :  { %3628 = vtanh.f32 %v1250_v51  ;;  %v3495_v3 = vmul.f32 -1.442695, %v1250_v51 }
 0xebe   :  { %3630 = vpow2.f32 %v3494_v16 }
 0xebf   :  { %3632 = vpow2.f32 %v3495_v3 }
 0xec8   :  { %v3627_v63 = vpop.eup %3626 }
 0xec9   :  { %1270 = vrot.lane.b32.xlu0 %v3627_v63, %s3949_s3 }
 0xeca   :  { %v3629_v9 = vpop.eup %3628 }
 0xecb   :  { %1284 = vrot.lane.b32.xlu1 %v3629_v9, %s3949_s3  ;;  %v3631_v11 = vpop.eup %3630 }
 0xecc   :  { %v3633_v24 = vpop.eup %3632  ;;  %v1254_v49 = vadd.f32 1.0, %v3631_v11 }
 0xecd   :  { %1136 = vrot.lane.b32.xlu0 %v1134_v39, %s3947_s27  ;;  %v1260_v4 = vadd.f32 1.0, %v3633_v24 }
 0xece   :  { %3634 = vrcp.f32 %v1254_v49 }
 0xecf   :  { %1155 = vrot.lane.b32.xlu1 %v1153_v60, %s3947_s27  ;;  %3636 = vrcp.f32 %v1260_v4 }
 0xedb   :  { %v3635_v6 = vpop.eup %3634 }
 0xedc   :  { %v3637_v19 = vpop.eup %3636 }
 0xf3b   :  { %v1271_v10 = vpop.permute.xlu0 %1270 }
 0xf3c   :  { %v1273_v15 = vmul.f32 %v3635_v6, %v1271_v10 }
 0xf3d   :  { %v1285_v20 = vpop.permute.xlu1 %1284 }
 0xf3e   :  { %1275 = vrot.lane.b32.xlu0 %v1273_v15, %s3947_s27  ;;  %v1287_v21 = vmul.f32 %v3637_v19, %v1285_v20 }
 0xf3f   :  { %v1137_v26 = vpop.permute.xlu0 %1136 }
 0xf40   :  { %1289 = vrot.lane.b32.xlu1 %v1287_v21, %s3947_s27  ;;  %v1139_v50 = vadd.f32 %v1137_v26, %v1130_v27 }
 0xf41   :  { %v1156_v28 = vpop.permute.xlu1 %1155 }
 0xf42   :  { %1308 = vrot.lane.b32.xlu0 %v1307_v23, %s3947_s27  ;;  %v1158_v55 = vadd.f32 %v1156_v28, %v1149_v53  ;;  %v1266_v56 = vrot.slane %v1139_v50, 6 }
 0xf44   :  { %1328 = vrot.lane.b32.xlu1 %v1327_v25, %s3947_s27  ;;  %v1280_v8 = vrot.slane %v1158_v55, 2  ;;  %v1268_v54 = vmul.f32 %v3635_v6, %v1266_v56 }
 0xf46   :  { %v1282_v57 = vmul.f32 %v3637_v19, %v1280_v8 }
 0xfb0   :  { %v1276_v35 = vpop.permute.xlu0 %1275 }
 0xfb1   :  { %v4509_v18 = vadd.f32 %v1276_v35, %v1268_v54 }
 0xfb2   :  { %v1290_v17 = vpop.permute.xlu1 %1289 }
 0xfb3   :  { %3638 = vtanh.f32 %v4509_v18  ;;  %v4512_v58 = vadd.f32 %v1290_v17, %v1282_v57 }
 0xfb4   :  { %v1309_v59 = vpop.permute.xlu0 %1308 }
 0xfb5   :  { %3640 = vtanh.f32 %v4512_v58  ;;  %v1311_v45 = vmul.f32 %v1309_v59, %v4190_v34 }
 0xfb6   :  { %v1329_v61 = vpop.permute.xlu1 %1328 }
 0xfb7   :  { %v1331_v32 = vmul.f32 %v1329_v61, %v4195_v36 }
 0xfc0   :  { %v3639_v62 = vpop.eup %3638 }
 0xfc1   :  { %1295 = vrot.lane.b32.xlu0 %v3639_v62, %s3949_s3 }
 0xfc2   :  { %v3641_v13 = vpop.eup %3640 }
 0xfc3   :  { %1301 = vrot.lane.b32.xlu1 %v3641_v13, %s3949_s3 }
 0xfc5   :  { %1313 = vrot.lane.b32.xlu0 %v1311_v45, %s3950_s1 }
 0xfc7   :  { %1333 = vrot.lane.b32.xlu1 %v1331_v32, %s3950_s1  ;;  %v1317_v32 = vmul.f32 %v4509_v18, %v4202_v41 }
0x1033   :  { %v1296_v1 = vpop.permute.xlu0 %1295 }
0x1034   :  { %v1298_v46 = vmul.f32 %v3635_v6, %v1296_v1 }
0x1035   :  { %v1302_v44 = vpop.permute.xlu1 %1301 }
0x1036   :  { %v4522_v51 = vmul.f32 %v1298_v46, %v4202_v41  ;;  %v1304_v63 = vmul.f32 %v3637_v19, %v1302_v44  ;;  %v1337_v44 = vmul.f32 %v4512_v58, %v4204_v42 }
0x1037   :  { %v1314_v22 = vpop.permute.xlu0 %1313 }
0x1038   :  { %v1316_v9 = vadd.f32 %v1314_v22, %v4522_v51  ;;  %v4526_v48 = vmul.f32 %v1304_v63, %v4204_v42 }
0x1039   :  { %v1334_v39 = vpop.permute.xlu1 %1333 }
0x103a   :  { %1348 = vrot.lane.b32.xlu1 %v1316_v9, %s3947_s27  ;;  %v1336_v60 = vadd.f32 %v1334_v39, %v4526_v48  ;;  %v1496_v45 = vrot.slane %v1316_v9, 6 }
0x103c   :  { %v1352_v16 = vrot.slane %v1336_v60, 2 }
0x103e   :  { %1338 = vrot.lane.b32.xlu1 %v1280_v8, %s3950_s1  ;;  %1353 = vrot.lane.b32.xlu0 %v1352_v16, %s3949_s3 }
0x1042   :  { %1318 = vrot.lane.b32.xlu0 %v1266_v56, %s3950_s1 }
0x10ac   :  { %v1349_v3 = vpop.permute.xlu1 %1348 }
0x10b0   :  { %v1354_v11 = vpop.permute.xlu0 %1353  ;;  %v1339_v26 = vpop.permute.xlu1 %1338 }
0x10b1   :  { %v1356_v24 = vsel %vm139_vm0, %v1349_v3, %v1354_v11  ;;  %v1341_v50 = vmul.f32 %v1339_v26, %v4195_v36 }
0x10b2   :  { %v1358_v49 = vrot.slane %v1356_v24, 2 }
0x10b4   :  { %3496 = vmatmul.mubr.msk.f32.vlgmr.msra.gmra.mxu1 %vm235_vm1, %v1358_v49  ;;  %v1319_v23 = vpop.permute.xlu0 %1318 }
0x10b5   :  { %1878 = vmatprep.mubr.f32.mxu1 %v3946_v0  ;;  %v1321_v27 = vmul.f32 %v1319_v23, %v4190_v34 }
0x1174   :  { %v1427_v4 = vpop.f32.mrf.mxu1 }
0x1175   :  { %v1433_v6 = vrot.slane %v1427_v4, 4 }
0x1176   :  { %v1429_v10 = vpop.f32.mrf.mxu1 }
0x1177   :  { %v1435_v15 = vadd.f32 %v1433_v6, %v4165_v40  ;;  %v1437_v19 = vrot.slane %v1429_v10, 6 }
0x1179   :  { %3642 = vtanh.f32 %v1435_v15  ;;  %v1439_v20 = vadd.f32 %v1437_v19, %v4163_v38  ;;  %v3497_v28 = vmul.f32 -1.442695, %v1435_v15 }
0x117b   :  { %3644 = vtanh.f32 %v1439_v20  ;;  %v3498_v53 = vmul.f32 -1.442695, %v1439_v20 }
0x117c   :  { %3646 = vpow2.f32 %v3497_v28 }
0x117d   :  { %3648 = vpow2.f32 %v3498_v53 }
0x1186   :  { %v3643_v21 = vpop.eup %3642 }
0x1187   :  { %1459 = vrot.lane.b32.xlu0 %v3643_v21, %s3949_s3 }
0x1188   :  { %v3645_v25 = vpop.eup %3644 }
0x1189   :  { %1473 = vrot.lane.b32.xlu1 %v3645_v25, %s3949_s3  ;;  %v3647_v55 = vpop.eup %3646 }
0x118a   :  { %v3649_v56 = vpop.eup %3648  ;;  %v1443_v8 = vadd.f32 1.0, %v3647_v55 }
0x118b   :  { %1323 = vrot.lane.b32.xlu0 %v1321_v27, %s3947_s27  ;;  %v1449_v54 = vadd.f32 1.0, %v3649_v56 }
0x118c   :  { %3650 = vrcp.f32 %v1443_v8 }
0x118d   :  { %1343 = vrot.lane.b32.xlu1 %v1341_v50, %s3947_s27  ;;  %3652 = vrcp.f32 %v1449_v54 }
0x1199   :  { %v3651_v35 = vpop.eup %3650 }
0x119a   :  { %v3653_v62 = vpop.eup %3652 }
0x11f9   :  { %v1460_v57 = vpop.permute.xlu0 %1459 }
0x11fa   :  { %v1462_v17 = vmul.f32 %v3651_v35, %v1460_v57 }
0x11fb   :  { %v1474_v59 = vpop.permute.xlu1 %1473 }
0x11fc   :  { %1464 = vrot.lane.b32.xlu0 %v1462_v17, %s3947_s27  ;;  %v1476_v13 = vmul.f32 %v3653_v62, %v1474_v59 }
0x11fd   :  { %v1324_v61 = vpop.permute.xlu0 %1323 }
0x11fe   :  { %1478 = vrot.lane.b32.xlu1 %v1476_v13, %s3947_s27  ;;  %v1326_v1 = vadd.f32 %v1324_v61, %v1317_v32 }
0x11ff   :  { %v1344_v46 = vpop.permute.xlu1 %1343 }
0x1200   :  { %1497 = vrot.lane.b32.xlu0 %v1496_v45, %s3947_s27  ;;  %v1346_v63 = vadd.f32 %v1344_v46, %v1337_v44  ;;  %v1455_v22 = vrot.slane %v1326_v1, 6 }
0x1202   :  { %1516 = vrot.lane.b32.xlu1 %v1352_v16, %s3947_s27  ;;  %v1469_v39 = vrot.slane %v1346_v63, 2  ;;  %v1457_v60 = vmul.f32 %v3651_v35, %v1455_v22 }
0x1204   :  { %v1471_v11 = vmul.f32 %v3653_v62, %v1469_v39 }
0x126e   :  { %v1465_v9 = vpop.permute.xlu0 %1464 }
0x126f   :  { %v4552_v3 = vadd.f32 %v1465_v9, %v1457_v60 }
0x1270   :  { %v1479_v16 = vpop.permute.xlu1 %1478 }
0x1271   :  { %3654 = vtanh.f32 %v4552_v3  ;;  %v4555_v24 = vadd.f32 %v1479_v16, %v1471_v11 }
0x1272   :  { %v1498_v49 = vpop.permute.xlu0 %1497 }
0x1273   :  { %3656 = vtanh.f32 %v4555_v24  ;;  %v1500_v4 = vmul.f32 %v1498_v49, %v4190_v34 }
0x1274   :  { %v1517_v6 = vpop.permute.xlu1 %1516 }
0x1275   :  { %v1519_v10 = vmul.f32 %v1517_v6, %v4195_v36 }
0x127e   :  { %v3655_v18 = vpop.eup %3654 }
0x127f   :  { %1484 = vrot.lane.b32.xlu0 %v3655_v18, %s3949_s3 }
0x1280   :  { %v3657_v58 = vpop.eup %3656 }
0x1281   :  { %1490 = vrot.lane.b32.xlu1 %v3657_v58, %s3949_s3 }
0x1283   :  { %1502 = vrot.lane.b32.xlu0 %v1500_v4, %s3950_s1  ;;  %v1506_v4 = vmul.f32 %v4552_v3, %v4202_v41 }
0x1285   :  { %1521 = vrot.lane.b32.xlu1 %v1519_v10, %s3950_s1  ;;  %v1525_v10 = vmul.f32 %v4555_v24, %v4204_v42  ;;  %v1777_v24 = vld [vmem:[#allocation7 + $0x78] sm:$0xff] }
0x1286   :  { %1830 = vmatprep.subr.mxu1 %v1777_v24 }
0x12f1   :  { %v1485_v15 = vpop.permute.xlu0 %1484 }
0x12f2   :  { %v1487_v19 = vmul.f32 %v3651_v35, %v1485_v15 }
0x12f3   :  { %v1491_v20 = vpop.permute.xlu1 %1490 }
0x12f4   :  { %v4565_v21 = vmul.f32 %v1487_v19, %v4202_v41  ;;  %v1493_v23 = vmul.f32 %v3653_v62, %v1491_v20 }
0x12f5   :  { %v1503_v25 = vpop.permute.xlu0 %1502 }
0x12f6   :  { %v1505_v26 = vadd.f32 %v1503_v25, %v4565_v21  ;;  %v4569_v27 = vmul.f32 %v1493_v23, %v4204_v42 }
0x12f7   :  { %v1522_v50 = vpop.permute.xlu1 %1521 }
0x12f8   :  { %1536 = vrot.lane.b32.xlu1 %v1505_v26, %s3947_s27  ;;  %v1524_v28 = vadd.f32 %v1522_v50, %v4569_v27 }
0x12fa   :  { %v1540_v53 = vrot.slane %v1524_v28, 6 }
0x12fc   :  { %1526 = vrot.lane.b32.xlu1 %v1469_v39, %s3950_s1  ;;  %1541 = vrot.lane.b32.xlu0 %v1540_v53, %s3949_s3 }
0x1300   :  { %1507 = vrot.lane.b32.xlu0 %v1455_v22, %s3950_s1 }
0x136a   :  { %v1537_v55 = vpop.permute.xlu1 %1536 }
0x136e   :  { %v1542_v56 = vpop.permute.xlu0 %1541  ;;  %v1527_v32 = vpop.permute.xlu1 %1526 }
0x136f   :  { %v1544_v8 = vsel %vm139_vm0, %v1537_v55, %v1542_v56  ;;  %v1529_v46 = vmul.f32 %v1527_v32, %v4195_v36  ;;  %v4650_v32 = vld [vmem:[#allocation8 + $0x30] sm:$0xff] }
0x1370   :  { %v1546_v54 = vrot.slane %v1544_v8, 4  ;;  %v1776_v8 = vld [vmem:[#allocation7 + $0x70] sm:$0xff] }
0x1371   :  { %1831 = vmatpush1.msra.mxu1 %v1776_v8 }
0x1372   :  { %3499 = vmatmul.mubr.msk.f32.vlgmr.msra.gmra.mxu0 %vm235_vm1, %v1546_v54  ;;  %v1508_v45 = vpop.permute.xlu0 %1507  ;;  %v1775_v54 = vld [vmem:[#allocation7 + $0x68] sm:$0xff] }
0x1373   :  { %1970 = vmatprep.mubr.f32.mxu0 %v3946_v0  ;;  %v1510_v1 = vmul.f32 %v1508_v45, %v4190_v34  ;;  %1832 = vmatprep.subr.mxu1 %v1775_v54  ;;  %v4647_v45 = vld [vmem:[#allocation8 + $0x38] sm:$0xff] }
0x1432   :  { %v1615_v35 = vpop.f32.mrf.mxu0 }
0x1433   :  { %v1621_v57 = vrot.slane %v1615_v35, 2  ;;  %v1771_v35 = vld [vmem:[#allocation7 + $0x48] sm:$0xff] }
0x1434   :  { %v1617_v17 = vpop.f32.mrf.mxu0 }
0x1435   :  { %v1623_v62 = vadd.f32 %v1621_v57, %v4165_v40  ;;  %v1624_v59 = vadd.f32 %v1617_v17, %v4163_v38  ;;  %v4631_v57 = vld [vmem:[#allocation8 + $0x58] sm:$0xff]  ;;  %v4636_v17 = vld [vmem:[#allocation8 + $0x50] sm:$0xff] }
0x1437   :  { %3658 = vtanh.f32 %v1623_v62  ;;  %v3500_v40 = vmul.f32 -1.442695, %v1623_v62  ;;  %v3501_v38 = vmul.f32 -1.442695, %v1624_v59  ;;  %v1769_v62 = vld [vmem:[#allocation7 + $0x38] sm:$0xff] }
0x1438   :  { %3660 = vtanh.f32 %v1624_v59  ;;  %v1768_v59 = vld [vmem:[#allocation7 + $0x30] sm:$0xff] }
0x1439   :  { %3662 = vpow2.f32 %v3500_v40  ;;  %v4660_v40 = vld [vmem:[#allocation8 + $0x20] sm:$0xff] }
0x143a   :  { %3664 = vpow2.f32 %v3501_v38  ;;  %v1763_v38 = vld [vmem:[#allocation7 + $0x8] sm:$0xff] }
0x1444   :  { %v3659_v13 = vpop.eup %3658 }
0x1445   :  { %v3661_v61 = vpop.eup %3660  ;;  %1644 = vrot.lane.b32.xlu0 %v3659_v13, %s3949_s3  ;;  %v4643_v13 = vld [vmem:[#allocation8 + $0x40] sm:$0xff] }
0x1446   :  { %1658 = vrot.lane.b32.xlu1 %v3661_v61, %s3949_s3  ;;  %v3663_v44 = vpop.eup %3662  ;;  %v1766_v61 = vld [vmem:[#allocation7 + $0x20] sm:$0xff] }
0x1447   :  { %v3665_v63 = vpop.eup %3664  ;;  %v1628_v22 = vadd.f32 1.0, %v3663_v44  ;;  %v4663_v44 = vld [vmem:[#allocation8 + $0x18] sm:$0xff] }
0x1448   :  { %v1634_v39 = vadd.f32 1.0, %v3665_v63  ;;  %v4666_v63 = vld [vmem:[#allocation8 + $0x10] sm:$0xff] }
0x1449   :  { %1512 = vrot.lane.b32.xlu0 %v1510_v1, %s3947_s27  ;;  %3666 = vrcp.f32 %v1628_v22  ;;  %v4657_v1 = vld [vmem:[#allocation8 + $0x28] sm:$0xff] }
0x144a   :  { %1531 = vrot.lane.b32.xlu1 %v1529_v46, %s3947_s27  ;;  %3668 = vrcp.f32 %v1634_v39  ;;  %v1764_v46 = vld [vmem:[#allocation7 + $0x10] sm:$0xff]  ;;  %v4669_v22 = vld [vmem:[#allocation8 + $0x8] sm:$0xff]  ;;  %v4672_v39 = vld [vmem:[#allocation8] sm:$0xff] }
0x1456   :  { %v4587_v60 = vpop.eup %3666 }
0x1457   :  { %v4589_v11 = vpop.eup %3668 }
0x14b7   :  { %v1645_v9 = vpop.permute.xlu0 %1644 }
0x14b8   :  { %v1647_v16 = vmul.f32 %v4587_v60, %v1645_v9  ;;  %v1659_v18 = vpop.permute.xlu1 %1658  ;;  %v4679_v9 = vld [vmem:[%s5261_s10] ss:$0 sm:$0xff] }
0x14b9   :  { %v1661_v49 = vmul.f32 %v4589_v11, %v1659_v18 }
0x14ba   :  { %1649 = vrot.lane.b32.xlu0 %v1647_v16, %s3947_s27 }
0x14bb   :  { %1663 = vrot.lane.b32.xlu1 %v1661_v49, %s3947_s27  ;;  %v1513_v58 = vpop.permute.xlu0 %1512 }
0x14bc   :  { %v1532_v6 = vpop.permute.xlu1 %1531  ;;  %v1515_v15 = vadd.f32 %v1513_v58, %v1506_v4 }
0x14bd   :  { %v1534_v19 = vadd.f32 %v1532_v6, %v1525_v10 }
0x14be   :  { %v1640_v20 = vrot.slane %v1515_v15, 6 }
0x14bf   :  { %v1654_v23 = vrot.slane %v1534_v19, 2 }
0x14c0   :  { %v1642_v25 = vmul.f32 %v4587_v60, %v1640_v20 }
0x14c1   :  { %v1656_v50 = vmul.f32 %v4589_v11, %v1654_v23 }
0x152c   :  { %v1650_v26 = vpop.permute.xlu0 %1649 }
0x152d   :  { %v1652_v28 = vadd.f32 %v1650_v26, %v1642_v25  ;;  %v1664_v53 = vpop.permute.xlu1 %1663 }
0x152e   :  { %v1666_v55 = vadd.f32 %v1664_v53, %v1656_v50 }
0x152f   :  { %3670 = vtanh.f32 %v1652_v28 }
0x1530   :  { %3672 = vtanh.f32 %v1666_v55 }
0x153c   :  { %v3671_v56 = vpop.eup %3670 }
0x153d   :  { %v3673_v3 = vpop.eup %3672  ;;  %1669 = vrot.lane.b32.xlu0 %v3671_v56, %s3949_s3 }
0x153e   :  { %1675 = vrot.lane.b32.xlu1 %v3673_v3, %s3949_s3 }
0x1541   :  { %1695 = vrot.lane.b32.xlu0 %v4569_v27, %s3949_s3  ;;  %v1774_v27 = vld [vmem:[#allocation7 + $0x60] sm:$0xff] }
0x1542   :  { %1682 = vrot.lane.b32.xlu1 %v4214_v52, %s3947_s27  ;;  %v4617_v52 = vld [vmem:[#allocation8 + $0x78] sm:$0xff]  ;;  %1833 = vmatpush1.msra.mxu1 %v1774_v27 }
0x1543   :  { %1922 = vmatprep.subr.mxu0 %v4617_v52 }
0x1545   :  { %1704 = vrot.lane.b32.xlu0 %v4526_v48, %s3949_s3  ;;  %v4619_v48 = vld [vmem:[#allocation8 + $0x70] sm:$0xff] }
0x1546   :  { %1691 = vrot.lane.b32.xlu1 %v4269_v14, %s3947_s27  ;;  %v1773_v14 = vld [vmem:[#allocation7 + $0x58] sm:$0xff]  ;;  %1923 = vmatpush1.msra.mxu0 %v4619_v48 }
0x1547   :  { %1834 = vmatprep.subr.mxu1 %v1773_v14 }
0x1549   :  { %1713 = vrot.lane.b32.xlu0 %v4479_v12, %s3949_s3  ;;  %v4627_v12 = vld [vmem:[#allocation8 + $0x60] sm:$0xff] }
0x154a   :  { %1700 = vrot.lane.b32.xlu1 %v4339_v7, %s3947_s27  ;;  %v4624_v7 = vld [vmem:[#allocation8 + $0x68] sm:$0xff] }
0x154b   :  { %1924 = vmatprep.subr.mxu0 %v4624_v7 }
0x154c   :  { %1925 = vmatpush1.msra.mxu0 %v4627_v12 }
0x154d   :  { %1722 = vrot.lane.b32.xlu0 %v4409_v5, %s3949_s3  ;;  %v1772_v5 = vld [vmem:[#allocation7 + $0x50] sm:$0xff]  ;;  %1926 = vmatprep.subr.mxu0 %v4631_v57 }
0x154e   :  { %1709 = vrot.lane.b32.xlu1 %v4406_v29, %s3947_s27  ;;  %v1770_v29 = vld [vmem:[#allocation7 + $0x40] sm:$0xff]  ;;  %1835 = vmatpush1.msra.mxu1 %v1772_v5 }
0x154f   :  { %1836 = vmatprep.subr.mxu1 %v1771_v35  ;;  %1927 = vmatpush1.msra.mxu0 %v4636_v17 }
0x1550   :  { %1837 = vmatpush1.msra.mxu1 %v1770_v29 }
0x1551   :  { %1731 = vrot.lane.b32.xlu0 %v4345_v43, %s3949_s3  ;;  %v4640_v43 = vld [vmem:[#allocation8 + $0x48] sm:$0xff]  ;;  %1838 = vmatprep.subr.mxu1 %v1769_v62 }
0x1552   :  { %1718 = vrot.lane.b32.xlu1 %v4471_v2, %s3947_s27  ;;  %v1767_v2 = vld [vmem:[#allocation7 + $0x28] sm:$0xff]  ;;  %1928 = vmatprep.subr.mxu0 %v4640_v43 }
0x1553   :  { %1839 = vmatpush1.msra.mxu1 %v1768_v59  ;;  %1929 = vmatpush1.msra.mxu0 %v4643_v13 }
0x1554   :  { %1840 = vmatprep.subr.mxu1 %v1767_v2  ;;  %1930 = vmatprep.subr.mxu0 %v4647_v45 }
0x1555   :  { %1841 = vmatpush1.msra.mxu1 %v1766_v61  ;;  %1931 = vmatpush1.msra.mxu0 %v4650_v32 }
0x1556   :  { %1727 = vrot.lane.b32.xlu1 %v4522_v51, %s3947_s27  ;;  %v1765_v51 = vld [vmem:[#allocation7 + $0x18] sm:$0xff]  ;;  %1932 = vmatprep.subr.mxu0 %v4657_v1 }
0x1557   :  { %1842 = vmatprep.subr.mxu1 %v1765_v51  ;;  %1933 = vmatpush1.msra.mxu0 %v4660_v40 }
0x1558   :  { %1843 = vmatpush1.msra.mxu1 %v1764_v46  ;;  %1934 = vmatprep.subr.mxu0 %v4663_v44  ;;  %v1778_v46 = vld [vmem:[%s5259_s8] sm:$0x3] }
0x1559   :  { %1844 = vmatprep.subr.mxu1 %v1763_v38  ;;  %1935 = vmatpush1.msra.mxu0 %v4666_v63  ;;  %v1801_v38 = vrot.slane %v1778_v46, %v131_v33 }
0x155a   :  { %1736 = vrot.lane.b32.xlu1 %v4565_v21, %s3947_s27  ;;  %v1762_v21 = vld [vmem:[#allocation7] sm:$0xff]  ;;  %1936 = vmatprep.subr.mxu0 %v4669_v22 }
0x155b   :  { %1845 = vmatpush1.msra.mxu1 %v1762_v21  ;;  %1937 = vmatpush1.msra.mxu0 %v4672_v39  ;;  %v1805_v21 = vrot.slane %v1778_v46, %v135_v31 }
0x155c   :  { %2086 = vmatprep.subr.mxu1 %v4617_v52  ;;  %3506 = vmatmul.mubr.msk.f32.vlgmr.msra.gmra.mxu0 %vm235_vm1, %v4679_v9 }
0x155d   :  { %2275 = vmatprep.subr.mxu0 %v4617_v52  ;;  %2323 = vmatprep.mubr.f32.mxu0 %v3946_v0 }
0x155e   :  { %2276 = vmatpush1.msra.mxu0 %v4619_v48 }
0x155f   :  { %2277 = vmatprep.subr.mxu0 %v4624_v7 }
0x1560   :  { %2278 = vmatpush1.msra.mxu0 %v4627_v12 }
0x1561   :  { %2279 = vmatprep.subr.mxu0 %v4631_v57 }
0x1562   :  { %2280 = vmatpush1.msra.mxu0 %v4636_v17 }
0x1563   :  { %2281 = vmatprep.subr.mxu0 %v4640_v43 }
0x1564   :  { %2282 = vmatpush1.msra.mxu0 %v4643_v13 }
0x1565   :  { %2283 = vmatprep.subr.mxu0 %v4647_v45 }
0x1566   :  { %2284 = vmatpush1.msra.mxu0 %v4650_v32 }
0x1567   :  { %2285 = vmatprep.subr.mxu0 %v4657_v1 }
0x1568   :  { %2286 = vmatpush1.msra.mxu0 %v4660_v40 }
0x1569   :  { %2287 = vmatprep.subr.mxu0 %v4663_v44 }
0x156a   :  { %2288 = vmatpush1.msra.mxu0 %v4666_v63 }
0x156b   :  { %2289 = vmatprep.subr.mxu0 %v4669_v22 }
0x156c   :  { %2290 = vmatpush1.msra.mxu0 %v4672_v39 }
0x156d   :  { %2649 = vmatprep.subr.mxu0 %v4617_v52 }
0x15af   :  { %v1670_v16 = vpop.permute.xlu0 %1669 }
0x15b0   :  { %v1672_v18 = vmul.f32 %v4587_v60, %v1670_v16  ;;  %v1676_v49 = vpop.permute.xlu1 %1675 }
0x15b1   :  { %v1678_v58 = vmul.f32 %v4589_v11, %v1676_v49 }
0x15b2   :  { %v1679_v4 = vmul.f32 %v1672_v18, %v4202_v41 }
0x15b3   :  { %v1680_v6 = vmul.f32 %v1678_v58, %v4204_v42  ;;  %v1696_v11 = vpop.permute.xlu0 %1695 }
0x15b4   :  { %1745 = vrot.lane.b32.xlu1 %v1679_v4, %s3947_s27  ;;  %v1683_v60 = vpop.permute.xlu1 %1682 }
0x15b5   :  { %1686 = vrot.lane.b32.xlu0 %v1680_v6, %s3949_s3 }
0x15b7   :  { %v1705_v15 = vpop.permute.xlu0 %1704 }
0x15b8   :  { %v1692_v10 = vpop.permute.xlu1 %1691 }
0x15b9   :  { %1740 = vrot.lane.b32.xlu0 %v4275_v37, %s3949_s3  ;;  %v1698_v53 = vsel %vm139_vm0, %v1692_v10, %v1696_v11 }
0x15bb   :  { %v1714_v19 = vpop.permute.xlu0 %1713 }
0x15bc   :  { %v1701_v37 = vpop.permute.xlu1 %1700 }
0x15bd   :  { %1749 = vrot.lane.b32.xlu0 %v4207_v47, %s3949_s3  ;;  %v1707_v55 = vsel %vm139_vm0, %v1701_v37, %v1705_v15 }
0x15bf   :  { %v1723_v23 = vpop.permute.xlu0 %1722 }
0x15c0   :  { %v1710_v20 = vpop.permute.xlu1 %1709 }
0x15c1   :  { %v1716_v3 = vsel %vm139_vm0, %v1710_v20, %v1714_v19  ;;  %v4767_v20 = vld [vmem:[%s5262_s11] ss:$0 sm:$0xff]  ;;  %s3951_s11 = smov [#allocation10]  }
0x15c2   :  { %s3460_s4 = sshll.u32 %s3951_s11, 4  ;;  %s3461_s4 = int_to_ptr.vmem [resolvable:$true] %s3460_s4 }
0x15c3   :  { %v1732_v26 = vpop.permute.xlu0 %1731  ;;  %s3912_s19 = scalar_lea.vmem %s3461_s4, 256  ;;  %p3917_p7 = scmp.lt.s32.totalorder %s3461_s4, %s3461_s4 }
0x15c4   :  { %v1719_v25 = vpop.permute.xlu1 %1718  ;;  %p3913_p6 = scmp.ne.s32.totalorder %s3461_s4, %s3912_s19  ;;  %p3918_p8 = scmp.lt.s32.totalorder %s3912_s19, %s3912_s19 }
0x15c5   :  { %v1725_v35 = vsel %vm139_vm0, %v1719_v25, %v1723_v23 }
0x15c6   :  { %p3919_p9 = por %p3918_p8, %p3917_p7 }
0x15c8   :  { %v1728_v50 = vpop.permute.xlu1 %1727  ;;  %p3920_p10 = pnand %p3919_p9, %p3913_p6 }
0x15c9   :  { %v1734_v14 = vsel %vm139_vm0, %v1728_v50, %v1732_v26 }
0x15ca   :  { %v1759_v29 = vsel %vm1753_vm3, %v1725_v35, %v1734_v14 }
0x15cc   :  { %v1737_v8 = vpop.permute.xlu1 %1736 }
0x161c   :  { %v1972_v18 = vpop.f32.mrf.mxu0 }
0x161e   :  { %v1974_v11 = vpop.f32.mrf.mxu0 }
0x161f   :  { %v1979_v37 = vrot.slane %v1974_v11, 2 }
0x1626   :  { %v1746_v62 = vpop.permute.xlu1 %1745 }
0x1627   :  { %v1687_v28 = vpop.permute.xlu0 %1686 }
0x1628   :  { %v1689_v47 = vsel %vm139_vm0, %v1683_v60, %v1687_v28 }
0x1629   :  { %v1754_v56 = vsel %vm1753_vm3, %v1689_v47, %v1698_v53 }
0x162a   :  { %v1756_v24 = vsel %vm1755_vm2, %v1754_v56, %v1707_v55 }
0x162b   :  { %v1741_v54 = vpop.permute.xlu0 %1740  ;;  %v1758_v27 = vsel %vm1757_vm4, %v1756_v24, %v1716_v3 }
0x162c   :  { %3502 = vmatmul.mubr.msk.f32.vlgmr.msra.gmra.mxu1 %vm235_vm1, %v1758_v27  ;;  %v1743_v5 = vsel %vm139_vm0, %v1737_v8, %v1741_v54 }
0x162d   :  { %1884 = vmatprep.mubr.f32.mxu1 %v3946_v0  ;;  %2087 = vmatpush1.msra.mxu1 %v4619_v48  ;;  %v1760_v2 = vsel %vm1755_vm2, %v1759_v29, %v1743_v5 }
0x162e   :  { %2088 = vmatprep.subr.mxu1 %v4624_v7 }
0x162f   :  { %v1750_v59 = vpop.permute.xlu0 %1749  ;;  %2089 = vmatpush1.msra.mxu1 %v4627_v12 }
0x1630   :  { %v1752_v61 = vsel %vm139_vm0, %v1746_v62, %v1750_v59  ;;  %2090 = vmatprep.subr.mxu1 %v4631_v57 }
0x1631   :  { %v1761_v51 = vsel %vm1757_vm4, %v1760_v2, %v1752_v61  ;;  %2091 = vmatpush1.msra.mxu1 %v4636_v17  ;;  %v2035_v2 = vmul.f32 %v4679_v9, %v4195_v36 }
0x1632   :  { %3503 = vmatmul.mubr.msk.f32.gmra.mxu1 %vm235_vm1, %v1761_v51  ;;  %2092 = vmatprep.subr.mxu1 %v4640_v43  ;;  %v2048_v51 = vmul.f32 %v4679_v9, %v4190_v34 }
0x1633   :  { %2093 = vmatpush1.msra.mxu1 %v4643_v13  ;;  %2134 = vmatprep.mubr.f32.mxu1 %v3946_v0 }
0x1634   :  { %2094 = vmatprep.subr.mxu1 %v4647_v45 }
0x1635   :  { %2095 = vmatpush1.msra.mxu1 %v4650_v32 }
0x1636   :  { %2096 = vmatprep.subr.mxu1 %v4657_v1 }
0x1637   :  { %2097 = vmatpush1.msra.mxu1 %v4660_v40 }
0x1638   :  { %2098 = vmatprep.subr.mxu1 %v4663_v44 }
0x1639   :  { %2099 = vmatpush1.msra.mxu1 %v4666_v63 }
0x163a   :  { %2100 = vmatprep.subr.mxu1 %v4669_v22 }
0x163b   :  { %2101 = vmatpush1.msra.mxu1 %v4672_v39 }
0x163c   :  { %2463 = vmatprep.subr.mxu1 %v4617_v52 }
0x16ec   :  { %v1880_v16 = vpop.f32.mrf.mxu1 }
0x16ed   :  { %v4752_v49 = vadd.f32 %v1880_v16, %v1801_v38 }
0x16ee   :  { %v1882_v58 = vpop.f32.mrf.mxu1 }
0x16ef   :  { %v4754_v4 = vadd.f32 %v1882_v58, %v1805_v21  ;;  %v1977_v6 = vadd.f32 %v1972_v18, %v4752_v49 }
0x16f1   :  { %3674 = vtanh.f32 %v1977_v6  ;;  %v3507_v23 = vmul.f32 -1.442695, %v1977_v6 }
0x16f2   :  { %v1886_v60 = vpop.f32.mrf.mxu1 }
0x16f3   :  { %v4757_v10 = vadd.f32 %v1886_v60, %v1801_v38 }
0x16f4   :  { %v1888_v15 = vpop.f32.mrf.mxu1 }
0x16f5   :  { %v4759_v33 = vadd.f32 %v1888_v15, %v1805_v21 }
0x16f7   :  { %v1981_v30 = vadd.f32 %v1979_v37, %v4759_v33 }
0x16f9   :  { %3676 = vtanh.f32 %v1981_v30  ;;  %v3508_v25 = vmul.f32 -1.442695, %v1981_v30 }
0x16fa   :  { %3678 = vpow2.f32 %v3507_v23 }
0x16fb   :  { %3680 = vpow2.f32 %v3508_v25 }
0x16fe   :  { %v3675_v31 = vpop.eup %3674 }
0x16ff   :  { %2001 = vrot.lane.b32.xlu0 %v3675_v31, %s3949_s3 }
0x1706   :  { %v3677_v19 = vpop.eup %3676 }
0x1707   :  { %2012 = vrot.lane.b32.xlu1 %v3677_v19, %s3949_s3  ;;  %v3679_v26 = vpop.eup %3678 }
0x1708   :  { %v1985_v50 = vadd.f32 1.0, %v3679_v26  ;;  %v3681_v28 = vpop.eup %3680 }
0x1709   :  { %v1991_v53 = vadd.f32 1.0, %v3681_v28 }
0x170a   :  { %3682 = vrcp.f32 %v1985_v50 }
0x170b   :  { %1996 = vrot.lane.b32.xlu1 %v4767_v20, %s3947_s27  ;;  %3684 = vrcp.f32 %v1991_v53 }
0x1717   :  { %v3683_v47 = vpop.eup %3682 }
0x1718   :  { %v3685_v3 = vpop.eup %3684 }
0x1719   :  { %v2010_v35 = vmul.f32 %v3685_v3, %v4767_v20 }
0x1771   :  { %v2002_v55 = vpop.permute.xlu0 %2001 }
0x1772   :  { %v2004_v56 = vmul.f32 %v3683_v47, %v2002_v55  ;;  %v2042_v55 = vmul.f32 %v4767_v20, %v4195_v36 }
0x1774   :  { %2006 = vrot.lane.b32.xlu1 %v2004_v56, %s3947_s27 }
0x1779   :  { %v2013_v24 = vpop.permute.xlu1 %2012 }
0x177a   :  { %v2015_v8 = vmul.f32 %v3685_v3, %v2013_v24 }
0x177c   :  { %2017 = vrot.lane.b32.xlu0 %v2015_v8, %s3947_s27 }
0x177d   :  { %v1997_v54 = vpop.permute.xlu1 %1996 }
0x177e   :  { %v1999_v27 = vmul.f32 %v3683_v47, %v1997_v54 }
0x17e6   :  { %v2007_v14 = vpop.permute.xlu1 %2006 }
0x17e7   :  { %v4773_v5 = vadd.f32 %v2007_v14, %v1999_v27 }
0x17e9   :  { %3686 = vtanh.f32 %v4773_v5 }
0x17ee   :  { %v2018_v29 = vpop.permute.xlu0 %2017 }
0x17ef   :  { %v4777_v62 = vadd.f32 %v2018_v29, %v2010_v35 }
0x17f1   :  { %3688 = vtanh.f32 %v4777_v62 }
0x17f6   :  { %v3687_v59 = vpop.eup %3686 }
0x17f7   :  { %2023 = vrot.lane.b32.xlu1 %v3687_v59, %s3949_s3 }
0x17fb   :  { %2037 = vrot.lane.b32.xlu1 %v2035_v2, %s3950_s1 }
0x17fe   :  { %v3689_v61 = vpop.eup %3688 }
0x17ff   :  { %2029 = vrot.lane.b32.xlu0 %v3689_v61, %s3949_s3 }
0x1803   :  { %2050 = vrot.lane.b32.xlu0 %v2048_v51, %s3949_s3 }
0x1869   :  { %v2024_v46 = vpop.permute.xlu1 %2023 }
0x186a   :  { %v2026_v38 = vmul.f32 %v3683_v47, %v2024_v46 }
0x186c   :  { %v4789_v21 = vmul.f32 %v2026_v38, %v4204_v42 }
0x186d   :  { %v2038_v16 = vpop.permute.xlu1 %2037 }
0x186e   :  { %v4792_v18 = vadd.f32 %v2038_v16, %v4789_v21  ;;  %v2041_v16 = vmul.f32 %v4773_v5, %v4204_v42 }
0x1870   :  { %2058 = vrot.lane.b32.xlu0 %v4792_v18, %s3947_s27  ;;  %v2205_v51 = vrot.slane %v4792_v18, 6 }
0x1871   :  { %v2030_v58 = vpop.permute.xlu0 %2029 }
0x1872   :  { %v2032_v6 = vmul.f32 %v3685_v3, %v2030_v58 }
0x1874   :  { %v4797_v60 = vmul.f32 %v2032_v6, %v4202_v41  ;;  %v2054_v6 = vmul.f32 %v4777_v62, %v4202_v41 }
0x1875   :  { %v2051_v9 = vpop.permute.xlu0 %2050 }
0x1876   :  { %v2053_v11 = vadd.f32 %v2051_v9, %v4797_v60  ;;  %v2055_v9 = vmul.f32 %v4767_v20, %v4190_v34 }
0x1878   :  { %v2062_v15 = vrot.slane %v2053_v11, 6  ;;  %v2225_v46 = vrot.slane %v2053_v11, 2  ;;  %v2056_v18 = vadd.f32 %v2055_v9, %v2054_v6 }
0x187a   :  { %2063 = vrot.lane.b32.xlu1 %v2062_v15, %s3949_s3 }
0x18e2   :  { %v2059_v37 = vpop.permute.xlu0 %2058 }
0x18ec   :  { %v2064_v30 = vpop.permute.xlu1 %2063 }
0x18ed   :  { %v2066_v31 = vsel %vm139_vm0, %v2059_v37, %v2064_v30 }
0x18ee   :  { %3509 = vmatmul.mubr.msk.f32.vlgmr.msra.gmra.mxu1 %vm235_vm1, %v2066_v31  ;;  %v2178_v31 = vrot.slane %v2056_v18, 2 }
0x18ef   :  { %2464 = vmatpush1.msra.mxu1 %v4619_v48  ;;  %2511 = vmatprep.mubr.f32.mxu1 %v3946_v0 }
0x18f0   :  { %2465 = vmatprep.subr.mxu1 %v4624_v7 }
0x18f1   :  { %2466 = vmatpush1.msra.mxu1 %v4627_v12 }
0x18f2   :  { %2467 = vmatprep.subr.mxu1 %v4631_v57 }
0x18f3   :  { %2468 = vmatpush1.msra.mxu1 %v4636_v17 }
0x18f4   :  { %2469 = vmatprep.subr.mxu1 %v4640_v43 }
0x18f5   :  { %2470 = vmatpush1.msra.mxu1 %v4643_v13 }
0x18f6   :  { %2471 = vmatprep.subr.mxu1 %v4647_v45 }
0x18f7   :  { %2472 = vmatpush1.msra.mxu1 %v4650_v32 }
0x18f8   :  { %2473 = vmatprep.subr.mxu1 %v4657_v1 }
0x18f9   :  { %2474 = vmatpush1.msra.mxu1 %v4660_v40 }
0x18fa   :  { %2475 = vmatprep.subr.mxu1 %v4663_v44 }
0x18fb   :  { %2476 = vmatpush1.msra.mxu1 %v4666_v63 }
0x18fc   :  { %2477 = vmatprep.subr.mxu1 %v4669_v22 }
0x18fd   :  { %2478 = vmatpush1.msra.mxu1 %v4672_v39 }
0x18fe   :  { %2833 = vmatprep.subr.mxu1 %v4617_v52 }
0x19ae   :  { %v2136_v19 = vpop.f32.mrf.mxu1 }
0x19af   :  { %v2142_v23 = vrot.slane %v2136_v19, 6 }
0x19b0   :  { %v2138_v25 = vpop.f32.mrf.mxu1 }
0x19b1   :  { %v2144_v26 = vadd.f32 %v2142_v23, %v4752_v49  ;;  %v2146_v50 = vrot.slane %v2138_v25, 4 }
0x19b3   :  { %3690 = vtanh.f32 %v2144_v26  ;;  %v2148_v28 = vadd.f32 %v2146_v50, %v4759_v33  ;;  %v3510_v56 = vmul.f32 -1.442695, %v2144_v26 }
0x19b5   :  { %3692 = vtanh.f32 %v2148_v28  ;;  %v3511_v3 = vmul.f32 -1.442695, %v2148_v28 }
0x19b6   :  { %3694 = vpow2.f32 %v3510_v56 }
0x19b7   :  { %3696 = vpow2.f32 %v3511_v3 }
0x19c0   :  { %v3691_v53 = vpop.eup %3690 }
0x19c1   :  { %2168 = vrot.lane.b32.xlu1 %v3691_v53, %s3949_s3 }
0x19c2   :  { %v3693_v47 = vpop.eup %3692 }
0x19c3   :  { %2182 = vrot.lane.b32.xlu0 %v3693_v47, %s3949_s3  ;;  %v3695_v24 = vpop.eup %3694 }
0x19c4   :  { %v3697_v8 = vpop.eup %3696  ;;  %v2152_v54 = vadd.f32 1.0, %v3695_v24 }
0x19c5   :  { %v2158_v27 = vadd.f32 1.0, %v3697_v8 }
0x19c6   :  { %3698 = vrcp.f32 %v2152_v54 }
0x19c7   :  { %2044 = vrot.lane.b32.xlu0 %v2042_v55, %s3947_s27  ;;  %3700 = vrcp.f32 %v2158_v27 }
0x19d3   :  { %v3699_v14 = vpop.eup %3698 }
0x19d4   :  { %v3701_v59 = vpop.eup %3700 }
0x19d5   :  { %v2180_v11 = vmul.f32 %v3701_v59, %v2178_v31 }
0x1a33   :  { %v2169_v35 = vpop.permute.xlu1 %2168 }
0x1a34   :  { %v2171_v29 = vmul.f32 %v3699_v14, %v2169_v35 }
0x1a35   :  { %v2183_v2 = vpop.permute.xlu0 %2182 }
0x1a36   :  { %2173 = vrot.lane.b32.xlu0 %v2171_v29, %s3947_s27  ;;  %v2185_v61 = vmul.f32 %v3701_v59, %v2183_v2 }
0x1a38   :  { %2187 = vrot.lane.b32.xlu1 %v2185_v61, %s3947_s27 }
0x1a39   :  { %v2045_v38 = vpop.permute.xlu0 %2044 }
0x1a3a   :  { %2206 = vrot.lane.b32.xlu0 %v2205_v51, %s3947_s27  ;;  %v2047_v58 = vadd.f32 %v2045_v38, %v2041_v16 }
0x1a3c   :  { %2226 = vrot.lane.b32.xlu1 %v2225_v46, %s3947_s27  ;;  %v2164_v15 = vrot.slane %v2047_v58, 6 }
0x1a3e   :  { %v2166_v37 = vmul.f32 %v3699_v14, %v2164_v15 }
0x1aa8   :  { %v2174_v30 = vpop.permute.xlu0 %2173 }
0x1aa9   :  { %v4838_v19 = vadd.f32 %v2174_v30, %v2166_v37 }
0x1aaa   :  { %v2188_v23 = vpop.permute.xlu1 %2187 }
0x1aab   :  { %3702 = vtanh.f32 %v4838_v19  ;;  %v4841_v25 = vadd.f32 %v2188_v23, %v2180_v11 }
0x1aac   :  { %v2207_v62 = vpop.permute.xlu0 %2206 }
0x1aad   :  { %3704 = vtanh.f32 %v4841_v25  ;;  %v2209_v26 = vmul.f32 %v2207_v62, %v4195_v36 }
0x1aae   :  { %v2227_v50 = vpop.permute.xlu1 %2226 }
0x1aaf   :  { %v2229_v28 = vmul.f32 %v2227_v50, %v4190_v34 }
0x1ab8   :  { %v3703_v5 = vpop.eup %3702 }
0x1ab9   :  { %2193 = vrot.lane.b32.xlu0 %v3703_v5, %s3949_s3 }
0x1aba   :  { %v3705_v20 = vpop.eup %3704 }
0x1abb   :  { %2199 = vrot.lane.b32.xlu1 %v3705_v20, %s3949_s3 }
0x1abd   :  { %2211 = vrot.lane.b32.xlu0 %v2209_v26, %s3950_s1 }
0x1abf   :  { %2231 = vrot.lane.b32.xlu1 %v2229_v28, %s3950_s1 }
0x1b2b   :  { %v2194_v53 = vpop.permute.xlu0 %2193 }
0x1b2c   :  { %v2196_v47 = vmul.f32 %v3699_v14, %v2194_v53 }
0x1b2d   :  { %v2200_v55 = vpop.permute.xlu1 %2199 }
0x1b2e   :  { %v4851_v56 = vmul.f32 %v2196_v47, %v4204_v42  ;;  %v2202_v3 = vmul.f32 %v3701_v59, %v2200_v55 }
0x1b2f   :  { %v2212_v24 = vpop.permute.xlu0 %2211 }
0x1b30   :  { %v4854_v8 = vadd.f32 %v2212_v24, %v4851_v56  ;;  %v4857_v54 = vmul.f32 %v2202_v3, %v4202_v41 }
0x1b31   :  { %v2232_v27 = vpop.permute.xlu1 %2231 }
0x1b32   :  { %2246 = vrot.lane.b32.xlu1 %v4854_v8, %s3947_s27  ;;  %v4862_v35 = vadd.f32 %v2232_v27, %v4857_v54  ;;  %v2394_v24 = vrot.slane %v4854_v8, 6 }
0x1b34   :  { %v2250_v14 = vrot.slane %v4862_v35, 2 }
0x1b36   :  { %2236 = vrot.lane.b32.xlu1 %v2178_v31, %s3950_s1  ;;  %2251 = vrot.lane.b32.xlu0 %v2250_v14, %s3949_s3 }
0x1b3a   :  { %2216 = vrot.lane.b32.xlu0 %v2164_v15, %s3950_s1 }
0x1ba4   :  { %v2247_v29 = vpop.permute.xlu1 %2246 }
0x1ba8   :  { %v2252_v59 = vpop.permute.xlu0 %2251  ;;  %v2237_v37 = vpop.permute.xlu1 %2236 }
0x1ba9   :  { %v2254_v2 = vsel %vm139_vm0, %v2247_v29, %v2252_v59  ;;  %v2239_v31 = vmul.f32 %v2237_v37, %v4190_v34  ;;  %v2215_v29 = vmul.f32 %v4838_v19, %v4204_v42 }
0x1baa   :  { %v2256_v61 = vrot.slane %v2254_v2, 2 }
0x1bac   :  { %3512 = vmatmul.mubr.msk.f32.vlgmr.msra.gmra.mxu0 %vm235_vm1, %v2256_v61  ;;  %v2217_v15 = vpop.permute.xlu0 %2216  ;;  %v2235_v61 = vmul.f32 %v4841_v25, %v4202_v41 }
0x1bad   :  { %2650 = vmatpush1.msra.mxu0 %v4619_v48  ;;  %2697 = vmatprep.mubr.f32.mxu0 %v3946_v0  ;;  %v2219_v30 = vmul.f32 %v2217_v15, %v4195_v36 }
0x1bae   :  { %2651 = vmatprep.subr.mxu0 %v4624_v7 }
0x1baf   :  { %2652 = vmatpush1.msra.mxu0 %v4627_v12 }
0x1bb0   :  { %2653 = vmatprep.subr.mxu0 %v4631_v57 }
0x1bb1   :  { %2654 = vmatpush1.msra.mxu0 %v4636_v17 }
0x1bb2   :  { %2655 = vmatprep.subr.mxu0 %v4640_v43 }
0x1bb3   :  { %2656 = vmatpush1.msra.mxu0 %v4643_v13 }
0x1bb4   :  { %2657 = vmatprep.subr.mxu0 %v4647_v45 }
0x1bb5   :  { %2658 = vmatpush1.msra.mxu0 %v4650_v32 }
0x1bb6   :  { %2659 = vmatprep.subr.mxu0 %v4657_v1 }
0x1bb7   :  { %2660 = vmatpush1.msra.mxu0 %v4660_v40 }
0x1bb8   :  { %2661 = vmatprep.subr.mxu0 %v4663_v44 }
0x1bb9   :  { %2662 = vmatpush1.msra.mxu0 %v4666_v63 }
0x1bba   :  { %2663 = vmatprep.subr.mxu0 %v4669_v22 }
0x1bbb   :  { %2664 = vmatpush1.msra.mxu0 %v4672_v39 }
0x1bbc   :  { %3022 = vmatprep.subr.mxu0 %v4617_v52 }
0x1c6c   :  { %v2325_v51 = vpop.f32.mrf.mxu0 }
0x1c6d   :  { %v2331_v46 = vrot.slane %v2325_v51, 4 }
0x1c6e   :  { %v2327_v38 = vpop.f32.mrf.mxu0 }
0x1c6f   :  { %v2333_v16 = vadd.f32 %v2331_v46, %v4752_v49  ;;  %v2335_v58 = vrot.slane %v2327_v38, 6 }
0x1c71   :  { %3706 = vtanh.f32 %v2333_v16  ;;  %v2337_v6 = vadd.f32 %v2335_v58, %v4759_v33  ;;  %v3513_v11 = vmul.f32 -1.442695, %v2333_v16 }
0x1c73   :  { %3708 = vtanh.f32 %v2337_v6  ;;  %v3514_v23 = vmul.f32 -1.442695, %v2337_v6 }
0x1c74   :  { %3710 = vpow2.f32 %v3513_v11 }
0x1c75   :  { %3712 = vpow2.f32 %v3514_v23 }
0x1c7e   :  { %v3707_v9 = vpop.eup %3706 }
0x1c7f   :  { %2357 = vrot.lane.b32.xlu0 %v3707_v9, %s3949_s3 }
0x1c80   :  { %v3709_v18 = vpop.eup %3708 }
0x1c81   :  { %2371 = vrot.lane.b32.xlu1 %v3709_v18, %s3949_s3  ;;  %v3711_v5 = vpop.eup %3710 }
0x1c82   :  { %v3713_v62 = vpop.eup %3712  ;;  %v2341_v20 = vadd.f32 1.0, %v3711_v5 }
0x1c83   :  { %2221 = vrot.lane.b32.xlu0 %v2219_v30, %s3947_s27  ;;  %v2347_v26 = vadd.f32 1.0, %v3713_v62 }
0x1c84   :  { %3714 = vrcp.f32 %v2341_v20 }
0x1c85   :  { %2241 = vrot.lane.b32.xlu1 %v2239_v31, %s3947_s27  ;;  %3716 = vrcp.f32 %v2347_v26 }
0x1c91   :  { %v3715_v50 = vpop.eup %3714 }
0x1c92   :  { %v3717_v47 = vpop.eup %3716 }
0x1cf1   :  { %v2358_v28 = vpop.permute.xlu0 %2357 }
0x1cf2   :  { %v2360_v53 = vmul.f32 %v3715_v50, %v2358_v28 }
0x1cf3   :  { %v2372_v55 = vpop.permute.xlu1 %2371 }
0x1cf4   :  { %2362 = vrot.lane.b32.xlu0 %v2360_v53, %s3947_s27  ;;  %v2374_v3 = vmul.f32 %v3717_v47, %v2372_v55 }
0x1cf5   :  { %v2222_v27 = vpop.permute.xlu0 %2221 }
0x1cf6   :  { %2376 = vrot.lane.b32.xlu1 %v2374_v3, %s3947_s27  ;;  %v2224_v59 = vadd.f32 %v2222_v27, %v2215_v29 }
0x1cf7   :  { %v2242_v2 = vpop.permute.xlu1 %2241 }
0x1cf8   :  { %2395 = vrot.lane.b32.xlu0 %v2394_v24, %s3947_s27  ;;  %v2244_v51 = vadd.f32 %v2242_v2, %v2235_v61  ;;  %v2353_v46 = vrot.slane %v2224_v59, 6 }
0x1cfa   :  { %2414 = vrot.lane.b32.xlu1 %v2250_v14, %s3947_s27  ;;  %v2367_v8 = vrot.slane %v2244_v51, 2  ;;  %v2355_v38 = vmul.f32 %v3715_v50, %v2353_v46 }
0x1cfc   :  { %v2369_v6 = vmul.f32 %v3717_v47, %v2367_v8 }
0x1d66   :  { %v2363_v16 = vpop.permute.xlu0 %2362 }
0x1d67   :  { %v4908_v58 = vadd.f32 %v2363_v16, %v2355_v38 }
0x1d68   :  { %v2377_v35 = vpop.permute.xlu1 %2376 }
0x1d69   :  { %3718 = vtanh.f32 %v4908_v58  ;;  %v4911_v14 = vadd.f32 %v2377_v35, %v2369_v6 }
0x1d6a   :  { %v2396_v9 = vpop.permute.xlu0 %2395 }
0x1d6b   :  { %3720 = vtanh.f32 %v4911_v14  ;;  %v2398_v15 = vmul.f32 %v2396_v9, %v4195_v36 }
0x1d6c   :  { %v2415_v18 = vpop.permute.xlu1 %2414 }
0x1d6d   :  { %v2417_v37 = vmul.f32 %v2415_v18, %v4190_v34 }
0x1d76   :  { %v3719_v19 = vpop.eup %3718 }
0x1d77   :  { %2382 = vrot.lane.b32.xlu0 %v3719_v19, %s3949_s3 }
0x1d78   :  { %v3721_v25 = vpop.eup %3720 }
0x1d79   :  { %2388 = vrot.lane.b32.xlu1 %v3721_v25, %s3949_s3 }
0x1d7b   :  { %2400 = vrot.lane.b32.xlu0 %v2398_v15, %s3950_s1 }
0x1d7d   :  { %2419 = vrot.lane.b32.xlu1 %v2417_v37, %s3950_s1 }
0x1de9   :  { %v2383_v30 = vpop.permute.xlu0 %2382 }
0x1dea   :  { %v2385_v31 = vmul.f32 %v3715_v50, %v2383_v30  ;;  %v2404_v30 = vmul.f32 %v4908_v58, %v4204_v42 }
0x1deb   :  { %v2389_v11 = vpop.permute.xlu1 %2388 }
0x1dec   :  { %v4921_v23 = vmul.f32 %v2385_v31, %v4204_v42  ;;  %v2391_v5 = vmul.f32 %v3717_v47, %v2389_v11  ;;  %v2423_v11 = vmul.f32 %v4911_v14, %v4202_v41 }
0x1ded   :  { %v2401_v62 = vpop.permute.xlu0 %2400 }
0x1dee   :  { %v4924_v20 = vadd.f32 %v2401_v62, %v4921_v23  ;;  %v4927_v26 = vmul.f32 %v2391_v5, %v4202_v41 }
0x1def   :  { %v2420_v28 = vpop.permute.xlu1 %2419 }
0x1df0   :  { %2434 = vrot.lane.b32.xlu1 %v4924_v20, %s3947_s27  ;;  %v4932_v53 = vadd.f32 %v2420_v28, %v4927_v26  ;;  %v2579_v15 = vrot.slane %v4924_v20, 6 }
0x1df2   :  { %v2438_v50 = vrot.slane %v4932_v53, 6  ;;  %v2599_v18 = vrot.slane %v4932_v53, 2 }
0x1df4   :  { %2424 = vrot.lane.b32.xlu1 %v2367_v8, %s3950_s1  ;;  %2439 = vrot.lane.b32.xlu0 %v2438_v50, %s3949_s3 }
0x1df8   :  { %2405 = vrot.lane.b32.xlu0 %v2353_v46, %s3950_s1 }
0x1e62   :  { %v2435_v47 = vpop.permute.xlu1 %2434 }
0x1e66   :  { %v2440_v55 = vpop.permute.xlu0 %2439  ;;  %v2425_v2 = vpop.permute.xlu1 %2424 }
0x1e67   :  { %v2442_v3 = vsel %vm139_vm0, %v2435_v47, %v2440_v55 }
0x1e68   :  { %v2444_v24 = vrot.slane %v2442_v3, 4 }
0x1e6a   :  { %3515 = vmatmul.mubr.msk.f32.vlgmr.msra.gmra.mxu1 %vm235_vm1, %v2444_v24  ;;  %v2406_v29 = vpop.permute.xlu0 %2405 }
0x1e6b   :  { %2834 = vmatpush1.msra.mxu1 %v4619_v48  ;;  %2881 = vmatprep.mubr.f32.mxu1 %v3946_v0  ;;  %v2408_v61 = vmul.f32 %v2406_v29, %v4195_v36 }
0x1e6c   :  { %2835 = vmatprep.subr.mxu1 %v4624_v7 }
0x1e6d   :  { %2836 = vmatpush1.msra.mxu1 %v4627_v12 }
0x1e6e   :  { %2837 = vmatprep.subr.mxu1 %v4631_v57 }
0x1e6f   :  { %2838 = vmatpush1.msra.mxu1 %v4636_v17 }
0x1e70   :  { %2839 = vmatprep.subr.mxu1 %v4640_v43 }
0x1e71   :  { %2840 = vmatpush1.msra.mxu1 %v4643_v13 }
0x1e72   :  { %2841 = vmatprep.subr.mxu1 %v4647_v45 }
0x1e73   :  { %2842 = vmatpush1.msra.mxu1 %v4650_v32 }
0x1e74   :  { %2843 = vmatprep.subr.mxu1 %v4657_v1 }
0x1e75   :  { %2844 = vmatpush1.msra.mxu1 %v4660_v40 }
0x1e76   :  { %2845 = vmatprep.subr.mxu1 %v4663_v44 }
0x1e77   :  { %2846 = vmatpush1.msra.mxu1 %v4666_v63 }
0x1e78   :  { %2847 = vmatprep.subr.mxu1 %v4669_v22 }
0x1e79   :  { %2848 = vmatpush1.msra.mxu1 %v4672_v39 }
0x1e7a   :  { %3210 = vmatprep.subr.mxu1 %v4617_v52  ;;  %v2427_v52 = vmul.f32 %v2425_v2, %v4190_v34 }
0x1f2a   :  { %v2513_v48 = vpop.f32.mrf.mxu1 }
0x1f2b   :  { %v2519_v7 = vrot.slane %v2513_v48, 2 }
0x1f2c   :  { %v2515_v12 = vpop.f32.mrf.mxu1 }
0x1f2d   :  { %v2521_v57 = vadd.f32 %v2519_v7, %v4752_v49  ;;  %v2522_v17 = vadd.f32 %v2515_v12, %v4759_v33 }
0x1f2f   :  { %3722 = vtanh.f32 %v2521_v57  ;;  %v3516_v49 = vmul.f32 -1.442695, %v2521_v57  ;;  %v3517_v33 = vmul.f32 -1.442695, %v2522_v17 }
0x1f30   :  { %3724 = vtanh.f32 %v2522_v17 }
0x1f31   :  { %3726 = vpow2.f32 %v3516_v49 }
0x1f32   :  { %3728 = vpow2.f32 %v3517_v33 }
0x1f3c   :  { %v3723_v27 = vpop.eup %3722 }
0x1f3d   :  { %v3725_v59 = vpop.eup %3724  ;;  %2542 = vrot.lane.b32.xlu0 %v3723_v27, %s3949_s3 }
0x1f3e   :  { %2556 = vrot.lane.b32.xlu1 %v3725_v59, %s3949_s3  ;;  %v3727_v51 = vpop.eup %3726 }
0x1f3f   :  { %v3729_v46 = vpop.eup %3728  ;;  %v2526_v8 = vadd.f32 1.0, %v3727_v51 }
0x1f40   :  { %v2532_v38 = vadd.f32 1.0, %v3729_v46 }
0x1f41   :  { %2410 = vrot.lane.b32.xlu0 %v2408_v61, %s3947_s27  ;;  %3730 = vrcp.f32 %v2526_v8 }
0x1f42   :  { %2429 = vrot.lane.b32.xlu1 %v2427_v52, %s3947_s27  ;;  %3732 = vrcp.f32 %v2532_v38 }
0x1f4e   :  { %v3731_v16 = vpop.eup %3730 }
0x1f4f   :  { %v3733_v35 = vpop.eup %3732 }
0x1faf   :  { %v2543_v6 = vpop.permute.xlu0 %2542 }
0x1fb0   :  { %v2545_v19 = vmul.f32 %v3731_v16, %v2543_v6  ;;  %v2557_v9 = vpop.permute.xlu1 %2556 }
0x1fb1   :  { %v2559_v25 = vmul.f32 %v3733_v35, %v2557_v9  ;;  %v5016_v9 = vld [vmem:[#allocation8 + $0x60] sm:$0xff] }
0x1fb2   :  { %2547 = vrot.lane.b32.xlu0 %v2545_v19, %s3947_s27  ;;  %v5013_v19 = vld [vmem:[#allocation8 + $0x68] sm:$0xff] }
0x1fb3   :  { %2561 = vrot.lane.b32.xlu1 %v2559_v25, %s3947_s27  ;;  %v2411_v37 = vpop.permute.xlu0 %2410  ;;  %v5019_v25 = vld [vmem:[#allocation8 + $0x58] sm:$0xff] }
0x1fb4   :  { %v2430_v31 = vpop.permute.xlu1 %2429  ;;  %v2413_v5 = vadd.f32 %v2411_v37, %v2404_v30 }
0x1fb5   :  { %v2432_v62 = vadd.f32 %v2430_v31, %v2423_v11 }
0x1fb6   :  { %2580 = vrot.lane.b32.xlu0 %v2579_v15, %s3947_s27  ;;  %v2538_v28 = vrot.slane %v2413_v5, 6  ;;  %v5022_v15 = vld [vmem:[#allocation8 + $0x50] sm:$0xff] }
0x1fb7   :  { %2600 = vrot.lane.b32.xlu1 %v2599_v18, %s3947_s27  ;;  %v2552_v50 = vrot.slane %v2432_v62, 2 }
0x1fb8   :  { %v2540_v47 = vmul.f32 %v3731_v16, %v2538_v28 }
0x1fb9   :  { %v2554_v55 = vmul.f32 %v3733_v35, %v2552_v50 }
0x2024   :  { %v2548_v20 = vpop.permute.xlu0 %2547 }
0x2025   :  { %v4975_v53 = vadd.f32 %v2548_v20, %v2540_v47  ;;  %v2562_v3 = vpop.permute.xlu1 %2561 }
0x2026   :  { %v4977_v24 = vadd.f32 %v2562_v3, %v2554_v55 }
0x2027   :  { %3734 = vtanh.f32 %v4975_v53 }
0x2028   :  { %3736 = vtanh.f32 %v4977_v24  ;;  %v2581_v48 = vpop.permute.xlu0 %2580 }
0x2029   :  { %v2601_v14 = vpop.permute.xlu1 %2600  ;;  %v2583_v12 = vmul.f32 %v2581_v48, %v4195_v36 }
0x202a   :  { %v2603_v57 = vmul.f32 %v2601_v14, %v4190_v34 }
0x2034   :  { %v3735_v58 = vpop.eup %3734 }
0x2035   :  { %v3737_v7 = vpop.eup %3736  ;;  %2567 = vrot.lane.b32.xlu0 %v3735_v58, %s3949_s3 }
0x2036   :  { %2573 = vrot.lane.b32.xlu1 %v3737_v7, %s3949_s3  ;;  %v2589_v7 = vmul.f32 %v4975_v53, %v4204_v42 }
0x2039   :  { %2585 = vrot.lane.b32.xlu0 %v2583_v12, %s3950_s1 }
0x203a   :  { %2605 = vrot.lane.b32.xlu1 %v2603_v57, %s3950_s1  ;;  %v2609_v57 = vmul.f32 %v4977_v24, %v4202_v41 }
0x20a7   :  { %v2568_v17 = vpop.permute.xlu0 %2567 }
0x20a8   :  { %v2570_v27 = vmul.f32 %v3731_v16, %v2568_v17  ;;  %v2574_v29 = vpop.permute.xlu1 %2573 }
0x20a9   :  { %v2576_v59 = vmul.f32 %v3733_v35, %v2574_v29  ;;  %v5009_v35 = vld [vmem:[#allocation8 + $0x70] sm:$0xff] }
0x20aa   :  { %v4988_v2 = vmul.f32 %v2570_v27, %v4204_v42 }
0x20ab   :  { %v2586_v61 = vpop.permute.xlu0 %2585  ;;  %v4991_v52 = vmul.f32 %v2576_v59, %v4202_v41 }
0x20ac   :  { %v4994_v49 = vadd.f32 %v2586_v61, %v4988_v2  ;;  %v2606_v33 = vpop.permute.xlu1 %2605 }
0x20ad   :  { %v4997_v51 = vadd.f32 %v2606_v33, %v4991_v52 }
0x20ae   :  { %2620 = vrot.lane.b32.xlu1 %v4994_v49, %s3947_s27  ;;  %v2765_v3 = vrot.slane %v4994_v49, 6 }
0x20af   :  { %v2624_v46 = vrot.slane %v4997_v51, 2 }
0x20b1   :  { %2625 = vrot.lane.b32.xlu0 %v2624_v46, %s3949_s3 }
0x20b2   :  { %2610 = vrot.lane.b32.xlu1 %v2552_v50, %s3950_s1 }
0x20b5   :  { %2590 = vrot.lane.b32.xlu0 %v2538_v28, %s3950_s1 }
0x2120   :  { %v2621_v8 = vpop.permute.xlu1 %2620 }
0x2123   :  { %v2626_v38 = vpop.permute.xlu0 %2625 }
0x2124   :  { %v2628_v16 = vsel %vm139_vm0, %v2621_v8, %v2626_v38 }
0x2125   :  { %v2630_v6 = vrot.slane %v2628_v16, 6 }
0x2127   :  { %3518 = vmatmul.mubr.msk.f32.vlgmr.msra.gmra.mxu0 %vm235_vm1, %v2630_v6  ;;  %v2591_v37 = vpop.permute.xlu0 %2590 }
0x2128   :  { %3023 = vmatpush1.msra.mxu0 %v5009_v35  ;;  %3070 = vmatprep.mubr.f32.mxu0 %v3946_v0 }
0x2129   :  { %3024 = vmatprep.subr.mxu0 %v5013_v19 }
0x212a   :  { %3025 = vmatpush1.msra.mxu0 %v5016_v9 }
0x212b   :  { %3026 = vmatprep.subr.mxu0 %v5019_v25 }
0x212c   :  { %3027 = vmatpush1.msra.mxu0 %v5022_v15 }
0x212d   :  { %3028 = vmatprep.subr.mxu0 %v4640_v43 }
0x212e   :  { %3029 = vmatpush1.msra.mxu0 %v4643_v13 }
0x212f   :  { %3030 = vmatprep.subr.mxu0 %v4647_v45 }
0x2130   :  { %3031 = vmatpush1.msra.mxu0 %v4650_v32 }
0x2131   :  { %3032 = vmatprep.subr.mxu0 %v4657_v1 }
0x2132   :  { %3033 = vmatpush1.msra.mxu0 %v4660_v40  ;;  %v2593_v40 = vmul.f32 %v2591_v37, %v4195_v36 }
0x2133   :  { %3034 = vmatprep.subr.mxu0 %v4663_v44 }
0x2134   :  { %3035 = vmatpush1.msra.mxu0 %v4666_v63  ;;  %v2611_v63 = vpop.permute.xlu1 %2610 }
0x2135   :  { %3036 = vmatprep.subr.mxu0 %v4669_v22  ;;  %v2613_v22 = vmul.f32 %v2611_v63, %v4190_v34 }
0x2136   :  { %3037 = vmatpush1.msra.mxu0 %v4672_v39 }
0x21e7   :  { %v2699_v18 = vpop.f32.mrf.mxu0 }
0x21e8   :  { %v2704_v43 = vadd.f32 %v2699_v18, %v4757_v10 }
0x21e9   :  { %v2701_v13 = vpop.f32.mrf.mxu0 }
0x21ea   :  { %3738 = vtanh.f32 %v2704_v43  ;;  %v2706_v45 = vrot.slane %v2701_v13, 2  ;;  %v3519_v39 = vmul.f32 -1.442695, %v2704_v43 }
0x21ec   :  { %v2708_v32 = vadd.f32 %v2706_v45, %v4754_v4 }
0x21ee   :  { %3740 = vtanh.f32 %v2708_v32  ;;  %v3520_v30 = vmul.f32 -1.442695, %v2708_v32 }
0x21ef   :  { %3742 = vpow2.f32 %v3519_v39 }
0x21f0   :  { %3744 = vpow2.f32 %v3520_v30 }
0x21f7   :  { %v3739_v1 = vpop.eup %3738 }
0x21f8   :  { %2728 = vrot.lane.b32.xlu0 %v3739_v1, %s3949_s3 }
0x21fb   :  { %v3741_v44 = vpop.eup %3740 }
0x21fc   :  { %2742 = vrot.lane.b32.xlu1 %v3741_v44, %s3949_s3  ;;  %2595 = vrot.lane.b32.xlu0 %v2593_v40, %s3947_s27  ;;  %v3743_v31 = vpop.eup %3742 }
0x21fd   :  { %v2712_v11 = vadd.f32 1.0, %v3743_v31  ;;  %v3745_v5 = vpop.eup %3744 }
0x21fe   :  { %v2718_v62 = vadd.f32 1.0, %v3745_v5  ;;  %v3823_v5 = vld [vmem:[#allocation8 + $0x40] sm:$0xff] }
0x21ff   :  { %3746 = vrcp.f32 %v2712_v11  ;;  %v3822_v11 = vld [vmem:[#allocation8 + $0x48] sm:$0xff] }
0x2200   :  { %2615 = vrot.lane.b32.xlu1 %v2613_v22, %s3947_s27  ;;  %3748 = vrcp.f32 %v2718_v62  ;;  %v3824_v62 = vld [vmem:[#allocation8 + $0x38] sm:$0xff] }
0x220c   :  { %v3747_v28 = vpop.eup %3746 }
0x220d   :  { %v3749_v20 = vpop.eup %3748 }
0x226a   :  { %v2729_v50 = vpop.permute.xlu0 %2728 }
0x226b   :  { %v2731_v47 = vmul.f32 %v3747_v28, %v2729_v50  ;;  %v3826_v50 = vld [vmem:[#allocation8 + $0x28] sm:$0xff] }
0x226d   :  { %2733 = vrot.lane.b32.xlu0 %v2731_v47, %s3947_s27 }
0x226e   :  { %v2743_v55 = vpop.permute.xlu1 %2742  ;;  %v2596_v48 = vpop.permute.xlu0 %2595 }
0x226f   :  { %v2745_v58 = vmul.f32 %v3749_v20, %v2743_v55  ;;  %v2598_v14 = vadd.f32 %v2596_v48, %v2589_v7 }
0x2271   :  { %2747 = vrot.lane.b32.xlu1 %v2745_v58, %s3947_s27  ;;  %2766 = vrot.lane.b32.xlu0 %v2765_v3, %s3947_s27  ;;  %v2724_v17 = vrot.slane %v2598_v14, 6 }
0x2272   :  { %v2616_v12 = vpop.permute.xlu1 %2615 }
0x2273   :  { %v2618_v27 = vadd.f32 %v2616_v12, %v2609_v57  ;;  %v2726_v59 = vmul.f32 %v3747_v28, %v2724_v17 }
0x2275   :  { %2785 = vrot.lane.b32.xlu1 %v2624_v46, %s3947_s27  ;;  %v2738_v29 = vrot.slane %v2618_v27, 2 }
0x2277   :  { %v2740_v33 = vmul.f32 %v3749_v20, %v2738_v29 }
0x22df   :  { %v2734_v61 = vpop.permute.xlu0 %2733 }
0x22e0   :  { %v5054_v49 = vadd.f32 %v2734_v61, %v2726_v59 }
0x22e2   :  { %3750 = vtanh.f32 %v5054_v49 }
0x22e3   :  { %v2748_v51 = vpop.permute.xlu1 %2747  ;;  %v2767_v8 = vpop.permute.xlu0 %2766 }
0x22e4   :  { %v5057_v46 = vadd.f32 %v2748_v51, %v2740_v33  ;;  %v2769_v24 = vmul.f32 %v2767_v8, %v4190_v34 }
0x22e6   :  { %3752 = vtanh.f32 %v5057_v46 }
0x22e7   :  { %v2786_v16 = vpop.permute.xlu1 %2785 }
0x22e8   :  { %v2788_v6 = vmul.f32 %v2786_v16, %v4195_v36 }
0x22ef   :  { %v3751_v53 = vpop.eup %3750 }
0x22f0   :  { %2753 = vrot.lane.b32.xlu0 %v3751_v53, %s3949_s3 }
0x22f3   :  { %v3753_v38 = vpop.eup %3752 }
0x22f4   :  { %2759 = vrot.lane.b32.xlu1 %v3753_v38, %s3949_s3  ;;  %2771 = vrot.lane.b32.xlu0 %v2769_v24, %s3950_s1 }
0x22f8   :  { %2790 = vrot.lane.b32.xlu1 %v2788_v6, %s3950_s1 }
0x2362   :  { %v2754_v18 = vpop.permute.xlu0 %2753 }
0x2363   :  { %v2756_v43 = vmul.f32 %v3747_v28, %v2754_v18  ;;  %v3825_v28 = vld [vmem:[#allocation8 + $0x30] sm:$0xff] }
0x2365   :  { %v5067_v13 = vmul.f32 %v2756_v43, %v4202_v41 }
0x2366   :  { %v2760_v45 = vpop.permute.xlu1 %2759  ;;  %v2772_v32 = vpop.permute.xlu0 %2771 }
0x2367   :  { %v2762_v1 = vmul.f32 %v3749_v20, %v2760_v45  ;;  %v5070_v37 = vadd.f32 %v2772_v32, %v5067_v13  ;;  %v2775_v32 = vmul.f32 %v5054_v49, %v4202_v41 }
0x2369   :  { %2805 = vrot.lane.b32.xlu1 %v5070_v37, %s3947_s27  ;;  %v5075_v40 = vmul.f32 %v2762_v1, %v4204_v42  ;;  %v2952_v18 = vrot.slane %v5070_v37, 6 }
0x236a   :  { %v2791_v44 = vpop.permute.xlu1 %2790 }
0x236b   :  { %v5078_v63 = vadd.f32 %v2791_v44, %v5075_v40 }
0x236d   :  { %v2809_v22 = vrot.slane %v5078_v63, 6  ;;  %2795 = vrot.lane.b32.xlu1 %v2738_v29, %s3950_s1  ;;  %v2972_v43 = vrot.slane %v5078_v63, 2 }
0x236f   :  { %2810 = vrot.lane.b32.xlu0 %v2809_v22, %s3949_s3  ;;  %v2794_v22 = vmul.f32 %v5057_v46, %v4204_v42 }
0x2373   :  { %2776 = vrot.lane.b32.xlu0 %v2724_v17, %s3950_s1 }
0x23db   :  { %v2806_v39 = vpop.permute.xlu1 %2805 }
0x23df   :  { %v2796_v12 = vpop.permute.xlu1 %2795 }
0x23e0   :  { %v2798_v17 = vmul.f32 %v2796_v12, %v4195_v36 }
0x23e1   :  { %v2811_v30 = vpop.permute.xlu0 %2810 }
0x23e2   :  { %v2813_v31 = vsel %vm139_vm0, %v2806_v39, %v2811_v30 }
0x23e3   :  { %3521 = vmatmul.mubr.msk.f32.vlgmr.msra.gmra.mxu1 %vm235_vm1, %v2813_v31 }
0x23e4   :  { %3211 = vmatpush1.msra.mxu1 %v5009_v35  ;;  %3258 = vmatprep.mubr.f32.mxu1 %v3946_v0  ;;  %v3827_v35 = vld [vmem:[#allocation8 + $0x20] sm:$0xff]  ;;  %v3828_v0 = vld [vmem:[#allocation8 + $0x18] sm:$0xff] }
0x23e5   :  { %3212 = vmatprep.subr.mxu1 %v5013_v19  ;;  %v3829_v19 = vld [vmem:[#allocation8 + $0x10] sm:$0xff]  ;;  %v2777_v7 = vpop.permute.xlu0 %2776 }
0x23e6   :  { %3213 = vmatpush1.msra.mxu1 %v5016_v9  ;;  %v3830_v9 = vld [vmem:[#allocation8 + $0x8] sm:$0xff]  ;;  %v2779_v57 = vmul.f32 %v2777_v7, %v4190_v34 }
0x23e7   :  { %3214 = vmatprep.subr.mxu1 %v5019_v25  ;;  %v3831_v25 = vld [vmem:[#allocation8] sm:$0xff] }
0x23e8   :  { %3215 = vmatpush1.msra.mxu1 %v5022_v15 }
0x23e9   :  { %3216 = vmatprep.subr.mxu1 %v3822_v11 }
0x23ea   :  { %3217 = vmatpush1.msra.mxu1 %v3823_v5 }
0x23eb   :  { %3218 = vmatprep.subr.mxu1 %v3824_v62 }
0x23ec   :  { %3219 = vmatpush1.msra.mxu1 %v3825_v28 }
0x23ed   :  { %3220 = vmatprep.subr.mxu1 %v3826_v50 }
0x23ee   :  { %3221 = vmatpush1.msra.mxu1 %v3827_v35 }
0x23ef   :  { %3222 = vmatprep.subr.mxu1 %v3828_v0 }
0x23f0   :  { %3223 = vmatpush1.msra.mxu1 %v3829_v19 }
0x23f1   :  { %3224 = vmatprep.subr.mxu1 %v3830_v9 }
0x23f2   :  { %3225 = vmatpush1.msra.mxu1 %v3831_v25 }
0x24a3   :  { %v2883_v15 = vpop.f32.mrf.mxu1 }
0x24a4   :  { %v2889_v47 = vrot.slane %v2883_v15, 6 }
0x24a5   :  { %v2885_v20 = vpop.f32.mrf.mxu1 }
0x24a6   :  { %v2891_v55 = vadd.f32 %v2889_v47, %v4757_v10  ;;  %v2893_v3 = vrot.slane %v2885_v20, 4 }
0x24a8   :  { %3754 = vtanh.f32 %v2891_v55  ;;  %v2895_v58 = vadd.f32 %v2893_v3, %v4754_v4  ;;  %v3522_v27 = vmul.f32 -1.442695, %v2891_v55 }
0x24aa   :  { %3756 = vtanh.f32 %v2895_v58  ;;  %v3523_v29 = vmul.f32 -1.442695, %v2895_v58 }
0x24ab   :  { %3758 = vpow2.f32 %v3522_v27 }
0x24ac   :  { %3760 = vpow2.f32 %v3523_v29 }
0x24b5   :  { %v3755_v48 = vpop.eup %3754 }
0x24b6   :  { %2915 = vrot.lane.b32.xlu0 %v3755_v48, %s3949_s3 }
0x24b7   :  { %v3757_v14 = vpop.eup %3756 }
0x24b8   :  { %2929 = vrot.lane.b32.xlu1 %v3757_v14, %s3949_s3  ;;  %v3759_v59 = vpop.eup %3758 }
0x24b9   :  { %v3761_v61 = vpop.eup %3760  ;;  %v2899_v33 = vadd.f32 1.0, %v3759_v59 }
0x24ba   :  { %2781 = vrot.lane.b32.xlu0 %v2779_v57, %s3947_s27  ;;  %v2905_v51 = vadd.f32 1.0, %v3761_v61 }
0x24bb   :  { %3762 = vrcp.f32 %v2899_v33 }
0x24bc   :  { %2800 = vrot.lane.b32.xlu1 %v2798_v17, %s3947_s27  ;;  %3764 = vrcp.f32 %v2905_v51 }
0x24c8   :  { %v3763_v53 = vpop.eup %3762 }
0x24c9   :  { %v3765_v38 = vpop.eup %3764 }
0x2528   :  { %v2916_v8 = vpop.permute.xlu0 %2915 }
0x2529   :  { %v2918_v24 = vmul.f32 %v3763_v53, %v2916_v8 }
0x252a   :  { %v2930_v16 = vpop.permute.xlu1 %2929 }
0x252b   :  { %2920 = vrot.lane.b32.xlu0 %v2918_v24, %s3947_s27  ;;  %v2932_v6 = vmul.f32 %v3765_v38, %v2930_v16 }
0x252c   :  { %v2782_v45 = vpop.permute.xlu0 %2781 }
0x252d   :  { %2934 = vrot.lane.b32.xlu1 %v2932_v6, %s3947_s27  ;;  %v2784_v1 = vadd.f32 %v2782_v45, %v2775_v32 }
0x252e   :  { %v2801_v44 = vpop.permute.xlu1 %2800 }
0x252f   :  { %2953 = vrot.lane.b32.xlu0 %v2952_v18, %s3947_s27  ;;  %v2803_v39 = vadd.f32 %v2801_v44, %v2794_v22  ;;  %v2911_v30 = vrot.slane %v2784_v1, 6 }
0x2531   :  { %2973 = vrot.lane.b32.xlu1 %v2972_v43, %s3947_s27  ;;  %v2925_v37 = vrot.slane %v2803_v39, 2  ;;  %v2913_v31 = vmul.f32 %v3763_v53, %v2911_v30 }
0x2533   :  { %v2927_v62 = vmul.f32 %v3765_v38, %v2925_v37 }
0x259d   :  { %v2921_v11 = vpop.permute.xlu0 %2920 }
0x259e   :  { %v5110_v5 = vadd.f32 %v2921_v11, %v2913_v31 }
0x259f   :  { %v2935_v63 = vpop.permute.xlu1 %2934 }
0x25a0   :  { %3766 = vtanh.f32 %v5110_v5  ;;  %v5113_v28 = vadd.f32 %v2935_v63, %v2927_v62 }
0x25a1   :  { %v2954_v50 = vpop.permute.xlu0 %2953 }
0x25a2   :  { %3768 = vtanh.f32 %v5113_v28  ;;  %v2956_v35 = vmul.f32 %v2954_v50, %v4190_v34  ;;  %v2962_v50 = vmul.f32 %v5110_v5, %v4202_v41 }
0x25a3   :  { %v2974_v0 = vpop.permute.xlu1 %2973 }
0x25a4   :  { %v2976_v19 = vmul.f32 %v2974_v0, %v4195_v36  ;;  %v2982_v0 = vmul.f32 %v5113_v28, %v4204_v42 }
0x25ad   :  { %v3767_v49 = vpop.eup %3766 }
0x25ae   :  { %2940 = vrot.lane.b32.xlu0 %v3767_v49, %s3949_s3 }
0x25af   :  { %v3769_v46 = vpop.eup %3768 }
0x25b0   :  { %2946 = vrot.lane.b32.xlu1 %v3769_v46, %s3949_s3 }
0x25b2   :  { %2958 = vrot.lane.b32.xlu0 %v2956_v35, %s3950_s1 }
0x25b4   :  { %2978 = vrot.lane.b32.xlu1 %v2976_v19, %s3950_s1 }
0x2620   :  { %v2941_v9 = vpop.permute.xlu0 %2940 }
0x2621   :  { %v2943_v25 = vmul.f32 %v3763_v53, %v2941_v9 }
0x2622   :  { %v2947_v15 = vpop.permute.xlu1 %2946 }
0x2623   :  { %v5123_v47 = vmul.f32 %v2943_v25, %v4202_v41  ;;  %v2949_v20 = vmul.f32 %v3765_v38, %v2947_v15 }
0x2624   :  { %v2959_v55 = vpop.permute.xlu0 %2958 }
0x2625   :  { %v2961_v3 = vadd.f32 %v2959_v55, %v5123_v47  ;;  %v5127_v58 = vmul.f32 %v2949_v20, %v4204_v42 }
0x2626   :  { %v2979_v48 = vpop.permute.xlu1 %2978 }
0x2627   :  { %2993 = vrot.lane.b32.xlu1 %v2961_v3, %s3947_s27  ;;  %v2981_v7 = vadd.f32 %v2979_v48, %v5127_v58  ;;  %v3141_v63 = vrot.slane %v2961_v3, 6 }
0x2629   :  { %v2997_v14 = vrot.slane %v2981_v7, 2 }
0x262b   :  { %2983 = vrot.lane.b32.xlu1 %v2925_v37, %s3950_s1  ;;  %2998 = vrot.lane.b32.xlu0 %v2997_v14, %s3949_s3 }
0x262f   :  { %2963 = vrot.lane.b32.xlu0 %v2911_v30, %s3950_s1 }
0x2699   :  { %v2994_v12 = vpop.permute.xlu1 %2993 }
0x269d   :  { %v2999_v57 = vpop.permute.xlu0 %2998  ;;  %v2984_v16 = vpop.permute.xlu1 %2983 }
0x269e   :  { %v3001_v17 = vsel %vm139_vm0, %v2994_v12, %v2999_v57  ;;  %v2986_v18 = vmul.f32 %v2984_v16, %v4195_v36 }
0x269f   :  { %v3003_v27 = vrot.slane %v3001_v17, 2 }
0x26a1   :  { %3524 = vmatmul.mubr.msk.f32.vlgmr.msra.gmra.mxu0 %vm235_vm1, %v3003_v27  ;;  %v2964_v24 = vpop.permute.xlu0 %2963 }
0x26a2   :  { %v2966_v6 = vmul.f32 %v2964_v24, %v4190_v34 }
0x2761   :  { %v3072_v29 = vpop.f32.mrf.mxu0 }
0x2762   :  { %v3078_v59 = vrot.slane %v3072_v29, 4 }
0x2763   :  { %v3074_v61 = vpop.f32.mrf.mxu0 }
0x2764   :  { %v3080_v33 = vadd.f32 %v3078_v59, %v4757_v10  ;;  %v3082_v51 = vrot.slane %v3074_v61, 6 }
0x2766   :  { %3770 = vtanh.f32 %v3080_v33  ;;  %v3084_v53 = vadd.f32 %v3082_v51, %v4754_v4  ;;  %v3525_v43 = vmul.f32 -1.442695, %v3080_v33 }
0x2768   :  { %3772 = vtanh.f32 %v3084_v53  ;;  %v3526_v45 = vmul.f32 -1.442695, %v3084_v53 }
0x2769   :  { %3774 = vpow2.f32 %v3525_v43 }
0x276a   :  { %3776 = vpow2.f32 %v3526_v45 }
0x2773   :  { %v3771_v8 = vpop.eup %3770 }
0x2774   :  { %3104 = vrot.lane.b32.xlu0 %v3771_v8, %s3949_s3 }
0x2775   :  { %v3773_v38 = vpop.eup %3772 }
0x2776   :  { %3118 = vrot.lane.b32.xlu1 %v3773_v38, %s3949_s3  ;;  %v3775_v32 = vpop.eup %3774 }
0x2777   :  { %v3777_v1 = vpop.eup %3776  ;;  %v3088_v44 = vadd.f32 1.0, %v3775_v32 }
0x2778   :  { %2968 = vrot.lane.b32.xlu0 %v2966_v6, %s3947_s27  ;;  %v3094_v22 = vadd.f32 1.0, %v3777_v1 }
0x2779   :  { %3778 = vrcp.f32 %v3088_v44 }
0x277a   :  { %2988 = vrot.lane.b32.xlu1 %v2986_v18, %s3947_s27  ;;  %3780 = vrcp.f32 %v3094_v22 }
0x2786   :  { %v3779_v39 = vpop.eup %3778 }
0x2787   :  { %v3781_v31 = vpop.eup %3780 }
0x27e6   :  { %v3105_v30 = vpop.permute.xlu0 %3104 }
0x27e7   :  { %v3107_v37 = vmul.f32 %v3779_v39, %v3105_v30 }
0x27e8   :  { %v3119_v11 = vpop.permute.xlu1 %3118 }
0x27e9   :  { %3109 = vrot.lane.b32.xlu0 %v3107_v37, %s3947_s27  ;;  %v3121_v62 = vmul.f32 %v3781_v31, %v3119_v11 }
0x27ea   :  { %v2969_v49 = vpop.permute.xlu0 %2968 }
0x27eb   :  { %3123 = vrot.lane.b32.xlu1 %v3121_v62, %s3947_s27  ;;  %v2971_v46 = vadd.f32 %v2969_v49, %v2962_v50 }
0x27ec   :  { %v2989_v35 = vpop.permute.xlu1 %2988 }
0x27ed   :  { %3142 = vrot.lane.b32.xlu0 %v3141_v63, %s3947_s27  ;;  %v2991_v19 = vadd.f32 %v2989_v35, %v2982_v0  ;;  %v3100_v9 = vrot.slane %v2971_v46, 6 }
0x27ef   :  { %3161 = vrot.lane.b32.xlu1 %v2997_v14, %s3947_s27  ;;  %v3114_v25 = vrot.slane %v2991_v19, 2  ;;  %v3102_v15 = vmul.f32 %v3779_v39, %v3100_v9 }
0x27f1   :  { %v3116_v3 = vmul.f32 %v3781_v31, %v3114_v25 }
0x285b   :  { %v3110_v20 = vpop.permute.xlu0 %3109 }
0x285c   :  { %v5152_v55 = vadd.f32 %v3110_v20, %v3102_v15 }
0x285d   :  { %v3124_v48 = vpop.permute.xlu1 %3123 }
0x285e   :  { %3782 = vtanh.f32 %v5152_v55  ;;  %v5155_v7 = vadd.f32 %v3124_v48, %v3116_v3  ;;  %v3151_v3 = vmul.f32 %v5152_v55, %v4202_v41 }
0x285f   :  { %v3143_v14 = vpop.permute.xlu0 %3142 }
0x2860   :  { %3784 = vtanh.f32 %v5155_v7  ;;  %v3145_v12 = vmul.f32 %v3143_v14, %v4190_v34  ;;  %v3170_v48 = vmul.f32 %v5155_v7, %v4204_v42 }
0x2861   :  { %v3162_v57 = vpop.permute.xlu1 %3161 }
0x2862   :  { %v3164_v17 = vmul.f32 %v3162_v57, %v4195_v36 }
0x286b   :  { %v3783_v5 = vpop.eup %3782 }
0x286c   :  { %3129 = vrot.lane.b32.xlu0 %v3783_v5, %s3949_s3 }
0x286d   :  { %v3785_v28 = vpop.eup %3784 }
0x286e   :  { %3135 = vrot.lane.b32.xlu1 %v3785_v28, %s3949_s3 }
0x2870   :  { %3147 = vrot.lane.b32.xlu0 %v3145_v12, %s3950_s1 }
0x2872   :  { %3166 = vrot.lane.b32.xlu1 %v3164_v17, %s3950_s1 }
0x28de   :  { %v3130_v27 = vpop.permute.xlu0 %3129 }
0x28df   :  { %v3132_v29 = vmul.f32 %v3779_v39, %v3130_v27 }
0x28e0   :  { %v3136_v59 = vpop.permute.xlu1 %3135 }
0x28e1   :  { %v5165_v61 = vmul.f32 %v3132_v29, %v4202_v41  ;;  %v3138_v33 = vmul.f32 %v3781_v31, %v3136_v59 }
0x28e2   :  { %v3148_v51 = vpop.permute.xlu0 %3147 }
0x28e3   :  { %v3150_v53 = vadd.f32 %v3148_v51, %v5165_v61  ;;  %v5169_v8 = vmul.f32 %v3138_v33, %v4204_v42 }
0x28e4   :  { %v3167_v24 = vpop.permute.xlu1 %3166 }
0x28e5   :  { %3181 = vrot.lane.b32.xlu1 %v3150_v53, %s3947_s27  ;;  %v3169_v38 = vadd.f32 %v3167_v24, %v5169_v8 }
0x28e7   :  { %v3185_v16 = vrot.slane %v3169_v38, 6 }
0x28e9   :  { %3171 = vrot.lane.b32.xlu1 %v3114_v25, %s3950_s1  ;;  %3186 = vrot.lane.b32.xlu0 %v3185_v16, %s3949_s3 }
0x28ed   :  { %3152 = vrot.lane.b32.xlu0 %v3100_v9, %s3950_s1 }
0x2957   :  { %v3182_v6 = vpop.permute.xlu1 %3181 }
0x295b   :  { %v3187_v18 = vpop.permute.xlu0 %3186  ;;  %v3172_v11 = vpop.permute.xlu1 %3171 }
0x295c   :  { %v3189_v43 = vsel %vm139_vm0, %v3182_v6, %v3187_v18  ;;  %v3174_v63 = vmul.f32 %v3172_v11, %v4195_v36 }
0x295d   :  { %v3191_v45 = vrot.slane %v3189_v43, 4 }
0x295f   :  { %3527 = vmatmul.mubr.msk.f32.vlgmr.msra.gmra.mxu1 %vm235_vm1, %v3191_v45  ;;  %v3153_v37 = vpop.permute.xlu0 %3152 }
0x2960   :  { %v3155_v62 = vmul.f32 %v3153_v37, %v4190_v34 }
0x2a1f   :  { %v3260_v32 = vpop.f32.mrf.mxu1 }
0x2a20   :  { %v3266_v1 = vrot.slane %v3260_v32, 2 }
0x2a21   :  { %v3262_v44 = vpop.f32.mrf.mxu1 }
0x2a22   :  { %v3268_v22 = vadd.f32 %v3266_v1, %v4757_v10  ;;  %v3269_v39 = vadd.f32 %v3262_v44, %v4754_v4 }
0x2a24   :  { %3786 = vtanh.f32 %v3268_v22  ;;  %v3528_v10 = vmul.f32 -1.442695, %v3268_v22  ;;  %v3529_v4 = vmul.f32 -1.442695, %v3269_v39 }
0x2a25   :  { %3788 = vtanh.f32 %v3269_v39 }
0x2a26   :  { %3790 = vpow2.f32 %v3528_v10 }
0x2a27   :  { %3792 = vpow2.f32 %v3529_v4 }
0x2a31   :  { %v3787_v30 = vpop.eup %3786 }
0x2a32   :  { %v3789_v31 = vpop.eup %3788  ;;  %3289 = vrot.lane.b32.xlu0 %v3787_v30, %s3949_s3 }
0x2a33   :  { %3303 = vrot.lane.b32.xlu1 %v3789_v31, %s3949_s3  ;;  %v3791_v49 = vpop.eup %3790 }
0x2a34   :  { %v3793_v50 = vpop.eup %3792  ;;  %v3273_v46 = vadd.f32 1.0, %v3791_v49 }
0x2a35   :  { %v3279_v35 = vadd.f32 1.0, %v3793_v50 }
0x2a36   :  { %3157 = vrot.lane.b32.xlu0 %v3155_v62, %s3947_s27  ;;  %3794 = vrcp.f32 %v3273_v46 }
0x2a37   :  { %3176 = vrot.lane.b32.xlu1 %v3174_v63, %s3947_s27  ;;  %3796 = vrcp.f32 %v3279_v35 }
0x2a43   :  { %v3795_v0 = vpop.eup %3794 }
0x2a44   :  { %v3797_v9 = vpop.eup %3796 }
0x2aa4   :  { %v3290_v19 = vpop.permute.xlu0 %3289 }
0x2aa5   :  { %v3304_v34 = vpop.permute.xlu1 %3303  ;;  %v3292_v25 = vmul.f32 %v3795_v0, %v3290_v19 }
0x2aa6   :  { %v3306_v36 = vmul.f32 %v3797_v9, %v3304_v34 }
0x2aa7   :  { %3294 = vrot.lane.b32.xlu0 %v3292_v25, %s3947_s27 }
0x2aa8   :  { %3308 = vrot.lane.b32.xlu1 %v3306_v36, %s3947_s27  ;;  %v3158_v15 = vpop.permute.xlu0 %3157 }
0x2aa9   :  { %v3177_v20 = vpop.permute.xlu1 %3176  ;;  %v3160_v5 = vadd.f32 %v3158_v15, %v3151_v3 }
0x2aaa   :  { %v3179_v14 = vadd.f32 %v3177_v20, %v3170_v48 }
0x2aab   :  { %v3285_v28 = vrot.slane %v3160_v5, 6 }
0x2aac   :  { %v3299_v12 = vrot.slane %v3179_v14, 2 }
0x2aad   :  { %v3287_v57 = vmul.f32 %v3795_v0, %v3285_v28 }
0x2aae   :  { %v3301_v17 = vmul.f32 %v3797_v9, %v3299_v12 }
0x2b19   :  { %v3295_v27 = vpop.permute.xlu0 %3294 }
0x2b1a   :  { %v3309_v29 = vpop.permute.xlu1 %3308  ;;  %v3297_v59 = vadd.f32 %v3295_v27, %v3287_v57 }
0x2b1b   :  { %v3311_v33 = vadd.f32 %v3309_v29, %v3301_v17 }
0x2b1c   :  { %3798 = vtanh.f32 %v3297_v59 }
0x2b1d   :  { %3800 = vtanh.f32 %v3311_v33 }
0x2b29   :  { %v3799_v51 = vpop.eup %3798 }
0x2b2a   :  { %v3801_v53 = vpop.eup %3800  ;;  %3314 = vrot.lane.b32.xlu0 %v3799_v51, %s3949_s3 }
0x2b2b   :  { %3320 = vrot.lane.b32.xlu1 %v3801_v53, %s3949_s3 }
0x2b2e   :  { %3340 = vrot.lane.b32.xlu0 %v5169_v8, %s3949_s3 }
0x2b2f   :  { %3327 = vrot.lane.b32.xlu1 %v4789_v21, %s3947_s27 }
0x2b32   :  { %3349 = vrot.lane.b32.xlu0 %v5127_v58, %s3949_s3 }
0x2b33   :  { %3336 = vrot.lane.b32.xlu1 %v4851_v56, %s3947_s27 }
0x2b36   :  { %3358 = vrot.lane.b32.xlu0 %v5075_v40, %s3949_s3 }
0x2b37   :  { %3345 = vrot.lane.b32.xlu1 %v4921_v23, %s3947_s27 }
0x2b3a   :  { %3367 = vrot.lane.b32.xlu0 %v4991_v52, %s3949_s3 }
0x2b3b   :  { %3354 = vrot.lane.b32.xlu1 %v4988_v2, %s3947_s27 }
0x2b3e   :  { %3376 = vrot.lane.b32.xlu0 %v4927_v26, %s3949_s3 }
0x2b3f   :  { %3363 = vrot.lane.b32.xlu1 %v5067_v13, %s3947_s27 }
0x2b43   :  { %3372 = vrot.lane.b32.xlu1 %v5123_v47, %s3947_s27 }
0x2b47   :  { %3381 = vrot.lane.b32.xlu1 %v5165_v61, %s3947_s27 }
0x2b9c   :  { %v3315_v21 = vpop.permute.xlu0 %3314 }
0x2b9d   :  { %v3321_v56 = vpop.permute.xlu1 %3320  ;;  %v3317_v23 = vmul.f32 %v3795_v0, %v3315_v21 }
0x2b9e   :  { %v3323_v40 = vmul.f32 %v3797_v9, %v3321_v56 }
0x2b9f   :  { %v3324_v52 = vmul.f32 %v3317_v23, %v4202_v41 }
0x2ba0   :  { %v3325_v2 = vmul.f32 %v3323_v40, %v4204_v42  ;;  %v3341_v13 = vpop.permute.xlu0 %3340 }
0x2ba1   :  { %3390 = vrot.lane.b32.xlu1 %v3324_v52, %s3947_s27  ;;  %v3328_v26 = vpop.permute.xlu1 %3327 }
0x2ba2   :  { %3331 = vrot.lane.b32.xlu0 %v3325_v2, %s3949_s3 }
0x2ba4   :  { %v3350_v58 = vpop.permute.xlu0 %3349 }
0x2ba5   :  { %v3337_v47 = vpop.permute.xlu1 %3336 }
0x2ba6   :  { %3385 = vrot.lane.b32.xlu0 %v4857_v54, %s3949_s3  ;;  %v3343_v24 = vsel %vm139_vm0, %v3337_v47, %v3341_v13 }
0x2ba7   :  { %v3399_v6 = vrot.slane %v3343_v24, 1  ;;  %v3434_v32 = vrot.slane %v3343_v24, 2 }
0x2ba8   :  { %v3359_v7 = vpop.permute.xlu0 %3358 }
0x2ba9   :  { %v3346_v55 = vpop.permute.xlu1 %3345 }
0x2baa   :  { %3394 = vrot.lane.b32.xlu0 %v4797_v60, %s3949_s3  ;;  %v3352_v38 = vsel %vm139_vm0, %v3346_v55, %v3350_v58 }
0x2bab   :  { %v3402_v43 = vrot.slane %v3352_v38, 2  ;;  %v3436_v39 = vrot.slane %v3352_v38, 3 }
0x2bac   :  { %v3368_v41 = vpop.permute.xlu0 %3367 }
0x2bad   :  { %v3355_v61 = vpop.permute.xlu1 %3354 }
0x2bae   :  { %v3361_v54 = vsel %vm139_vm0, %v3355_v61, %v3359_v7 }
0x2baf   :  { %v3405_v1 = vrot.slane %v3361_v54, 3  ;;  %v3438_v11 = vrot.slane %v3361_v54, 4 }
0x2bb0   :  { %v3377_v42 = vpop.permute.xlu0 %3376 }
0x2bb1   :  { %v3364_v8 = vpop.permute.xlu1 %3363 }
0x2bb2   :  { %v3370_v60 = vsel %vm139_vm0, %v3364_v8, %v3368_v41 }
0x2bb3   :  { %v3408_v30 = vrot.slane %v3370_v60, 4  ;;  %v3440_v49 = vrot.slane %v3370_v60, 5 }
0x2bb5   :  { %v3373_v16 = vpop.permute.xlu1 %3372 }
0x2bb6   :  { %v3379_v37 = vsel %vm139_vm0, %v3373_v16, %v3377_v42 }
0x2bb7   :  { %v3411_v0 = vrot.slane %v3379_v37, 5  ;;  %v3442_v19 = vrot.slane %v3379_v37, 6 }
0x2bb9   :  { %v3382_v62 = vpop.permute.xlu1 %3381 }
0x2c13   :  { %v3391_v15 = vpop.permute.xlu1 %3390 }
0x2c14   :  { %v3332_v18 = vpop.permute.xlu0 %3331 }
0x2c15   :  { %v3334_v45 = vsel %vm139_vm0, %v3328_v26, %v3332_v18 }
0x2c16   :  { %v3420_v44 = vsel %vm3419_vm5, %v3334_v45, %v3399_v6  ;;  %v3432_v22 = vrot.slane %v3334_v45, 1 }
0x2c17   :  { %v3421_v31 = vsel %vm1753_vm3, %v3420_v44, %v3402_v43 }
0x2c18   :  { %v3423_v63 = vsel %vm3422_vm6, %v3421_v31, %v3405_v1  ;;  %v3446_v10 = vsel %vm3419_vm5, %v3432_v22, %v3434_v32  ;;  %v3386_v4 = vpop.permute.xlu0 %3385 }
0x2c19   :  { %v3424_v50 = vsel %vm1755_vm2, %v3423_v63, %v3408_v30  ;;  %v3447_v46 = vsel %vm1753_vm3, %v3446_v10, %v3436_v39  ;;  %v3388_v35 = vsel %vm139_vm0, %v3382_v62, %v3386_v4 }
0x2c1a   :  { %v3448_v9 = vsel %vm3422_vm6, %v3447_v46, %v3438_v11  ;;  %v3444_v34 = vrot.slane %v3388_v35, 7  ;;  %v3414_v25 = vrot.slane %v3388_v35, 6  ;;  %v3426_v20 = vsel %vm3425_vm7, %v3424_v50, %v3411_v0 }
0x2c1b   :  { %v3449_v36 = vsel %vm1755_vm2, %v3448_v9, %v3440_v49 }
0x2c1c   :  { %v3450_v3 = vsel %vm3425_vm7, %v3449_v36, %v3442_v19  ;;  %v3395_v48 = vpop.permute.xlu0 %3394  ;;  %v3427_v57 = vsel %vm1757_vm4, %v3426_v20, %v3414_v25 }
0x2c1d   :  { %v3451_v5 = vsel %vm1757_vm4, %v3450_v3, %v3444_v34  ;;  %v3397_v14 = vsel %vm139_vm0, %v3391_v15, %v3395_v48 }
0x2c1e   :  { %v3417_v28 = vrot.slane %v3397_v14, 7  ;;  %v3452_v12 = vsel %vm3428_vm8, %v3451_v5, %v3397_v14 }
0x2c1f   :  { %3454 = vst.msk [vmem:[#allocation10 + $0x8] sm:$0xff] %vm235_vm1, %v3452_v12 }
0x2c20   :  { %v3429_v17 = vsel %vm3428_vm8, %v3427_v57, %v3417_v28 }
0x2c21   :  { %3430 = vst.msk [vmem:[#allocation10] sm:$0xff] %vm235_vm1, %v3429_v17 }
0x2c22   :  { %3923 = shalt.err (!%p3920_p10)
}
0x2c23   :  { %s3952_s20 = smov 128   ;;  %s3953_s2 = smov 8  }
0x2c24   :  { %3466 = dma.vmem_to_hbm [thread:$0]  %s3461_s4, 256, %s5263_s12, [#allocation4], %s3952_s20, %s3952_s20, %s3953_s2  }
0x2c25   :  { %3938 = dma.done.wait [#allocation4], 256  }
0x2c26   :  { %3939 = vsyncadd [#allocation4], 4294967040 }
0x2c27   :  { %3470 = vsyncpa [#allocation3], 1 }
0x2c28   :  { %3471 = vsyncpa [#allocation6], 1 }
0x2c29   :  { %3472 = vsyncpa [#allocation9], 1 }
0x2c2a   :  { %3473 = vsyncpa [#allocation4], 1 }

</bundles_post_ra>
